<compile_context>
chip_gen: v7x
topology: tpu7x:2x2x1
jax: 0.10.0
libtpu: 0.0.40
codegen_flags: <defaults>
</compile_context>

<pallas_src>
import numpy as np
import jax
import jax.numpy as jnp
from jax.experimental import pallas as pl
from jax.experimental.pallas import tpu as pltpu

# ---- constants of the flattened-padded spatial layout -----------------------
_IMG = 16                     # input spatial size
_HP = _IMG + 2                # zero-padded spatial size (18)
_PFLAT = _HP * _HP            # flattened padded image length (324)
_B0 = 64                      # lane offset of the image window inside a block buffer
_NPOOL2 = 16                  # 4x4 pooled positions per image
_HIGH = jax.lax.Precision.HIGHEST


def _ceil_to(v, m):
    return ((v + m - 1) // m) * m


# -----------------------------------------------------------------------------
# The single fused kernel (one batch block per grid step)
# -----------------------------------------------------------------------------
def _net_kernel(x_ref, ctx_ref, w1_ref, b1_ref, w2_ref, b2_ref, mask_ref,
                ssel_ref, wfc1_ref, wctx_ref, bfc1_ref, wfc2_ref, bfc2_ref,
                o_ref):
    f32 = jnp.float32
    wblk = ssel_ref.shape[0]              # NB * 324 lanes of real image data
    nb = ssel_ref.shape[1] // _NPOOL2     # images in this batch block
    w1w = wblk + 144                      # conv1 window (covers pool1 + conv2 halo)
    wmw = wblk + 120                      # masked pool1 window (covers conv2 taps)
    w2w = wblk + 40                       # conv2 window (covers pool2 shifts)
    a0 = _B0 - 40                         # buffer lane of element 0 of the halo'd window

    # ---- conv1: fold all 9 taps into the contraction dim -> ONE GEMM (K=9*Cp)
    xs1 = jnp.concatenate(
        [x_ref[:, a0 + di * _HP + dj: a0 + di * _HP + dj + w1w]
         for di in (-1, 0, 1) for dj in (-1, 0, 1)], axis=0)        # (9*Cp, w1w)
    acc1 = jnp.dot(w1_ref[...], xs1, preferred_element_type=f32, precision=_HIGH)
    acc1 = jnp.maximum(acc1 + b1_ref[...], 0.0)                     # (C1, w1w)

    # ---- maxpool 2x2 as in-register shift-max; mask keeps only pooled lanes
    #      (the mask also zero-pads conv2 and isolates images / margins)
    p1 = jnp.maximum(jnp.maximum(acc1[:, 0:wmw], acc1[:, 1:1 + wmw]),
                     jnp.maximum(acc1[:, _HP:_HP + wmw],
                                 acc1[:, _HP + 1:_HP + 1 + wmw]))
    m1 = p1 * mask_ref[:, a0:a0 + wmw]                              # (C1, wmw)

    # ---- conv2 on the pooled (stride-2) grid: ONE GEMM (K=9*C1)
    xs2 = jnp.concatenate(
        [m1[:, 40 + 2 * (di * _HP + dj): 40 + 2 * (di * _HP + dj) + w2w]
         for di in (-1, 0, 1) for dj in (-1, 0, 1)], axis=0)        # (9*C1, w2w)
    acc2 = jnp.dot(w2_ref[...], xs2, preferred_element_type=f32, precision=_HIGH)
    acc2 = jnp.maximum(acc2 + b2_ref[...], 0.0)                     # (C2, w2w)

    # ---- maxpool 2x2 on the pooled grid (stride-4 neighbours in flat lanes)
    pm2 = jnp.maximum(
        jnp.maximum(acc2[:, 0:wblk], acc2[:, 2:2 + wblk]),
        jnp.maximum(acc2[:, 2 * _HP:2 * _HP + wblk],
                    acc2[:, 2 * _HP + 2:2 * _HP + 2 + wblk]))       # (C2, wblk)

    # ---- gather the 4x4 pooled features (block-local 0/1 selection GEMM,
    #      size independent of the total batch)
    feat = jnp.dot(pm2, ssel_ref[...], preferred_element_type=f32,
                   precision=_HIGH)                                 # (C2, 16*nb)

    # ---- fc1: stack per-position blocks -> ONE K=16*C2 GEMM (+ context branch)
    feat2 = jnp.concatenate(
        [feat[:, p * nb:(p + 1) * nb] for p in range(_NPOOL2)], axis=0)  # (16*C2, nb)
    acc = jnp.dot(wfc1_ref[...], feat2, preferred_element_type=f32, precision=_HIGH)
    acc = acc + jnp.dot(wctx_ref[...], ctx_ref[0], preferred_element_type=f32,
                        precision=_HIGH)
    acc = jnp.maximum(acc + bfc1_ref[...], 0.0)                     # (hidden, nb)
    # TODO(synk): dropout from Architecture(dropout_rate, ...) is identity in eval mode.
    out = jnp.dot(wfc2_ref[...], acc, preferred_element_type=f32,
                  precision=_HIGH) + bfc2_ref[...]                  # (1, nb)
    o_ref[0] = out


# -----------------------------------------------------------------------------
# Wrapper: one pallas_call, grid over batch blocks
# -----------------------------------------------------------------------------
def _fused_forward(kp, x, context):
    n, cin, h, w = x.shape
    assert h == _IMG and w == _IMG, "kernel is specialized to 16x16 inputs"
    cp = kp["w1"].shape[1] // 9          # input channels padded to a sublane multiple
    lblk = kp["mask"].shape[1]           # per-block lane buffer length
    wblk = kp["ssel"].shape[0]           # per-block image lanes (NB * 324)
    nb = kp["ssel"].shape[1] // _NPOOL2  # images per block
    ctx_dim = kp["wctx"].shape[1]
    c1 = kp["w1"].shape[0]
    c2 = kp["w2"].shape[0]
    hidden = kp["wfc1"].shape[0]

    # Consistency / margin asserts (per review): prepared constants must match the
    # runtime batch, and margins must cover every shifted slice the kernel makes.
    assert n % nb == 0, "batch must be a multiple of the prepared block_batch"
    assert context.shape == (n, ctx_dim)
    assert wblk == nb * _PFLAT
    assert _B0 >= 59 and lblk >= _B0 + wblk + 123, "lane margins too small for shifted reads"
    g = n // nb

    # TODO(synk): this ~KB-scale relayout could be folded into the kernel via a
    # BlockSpec over the raw NCHW array; negligible at these sizes.
    xp = jnp.pad(x, ((0, 0), (0, cp - cin), (1, 1), (1, 1)))          # (N,Cp,18,18)
    xf = xp.reshape(g, nb, cp, _PFLAT).transpose(0, 2, 1, 3).reshape(g * cp, wblk)
    xbuf = jnp.pad(xf, ((0, 0), (_B0, lblk - _B0 - wblk)))            # (G*Cp, LBLK)
    ctxb = context.reshape(g, nb, ctx_dim).transpose(0, 2, 1)         # (G, ctx, NB)

    args = (xbuf, ctxb, kp["w1"], kp["b1"], kp["w2"], kp["b2"], kp["mask"],
            kp["ssel"], kp["wfc1"], kp["wctx"], kp["bfc1"], kp["wfc2"], kp["bfc2"])
    in_specs = ([pl.BlockSpec((cp, lblk), lambda i: (i, 0)),
                 pl.BlockSpec((1, ctx_dim, nb), lambda i: (i, 0, 0))]
                + [pl.BlockSpec(a.shape, lambda i: (0, 0)) for a in args[2:]])

    flops = 2 * g * (9 * cp * c1 * (wblk + 144) + 9 * c1 * c2 * (wblk + 40)
                     + c2 * wblk * _NPOOL2 * nb + hidden * _NPOOL2 * c2 * nb
                     + hidden * ctx_dim * nb + hidden * nb)
    bytes_accessed = 4 * (xbuf.size + ctxb.size + g * nb
                          + sum(int(np.prod(a.shape)) for a in args[2:]))

    out = pl.pallas_call(
        _net_kernel,
        out_shape=jax.ShapeDtypeStruct((g, 1, nb), jnp.float32),
        grid=(g,),
        in_specs=in_specs,
        out_specs=pl.BlockSpec((1, 1, nb), lambda i: (i, 0, 0)),
        compiler_params=pltpu.CompilerParams(
            dimension_semantics=("parallel",),          # batch blocks are independent
            vmem_limit_bytes=48 * 1024 * 1024),         # headroom under v7x's 64 MiB
        cost_estimate=pl.CostEstimate(flops=int(flops), transcendentals=0,
                                      bytes_accessed=int(bytes_accessed)),
    )(*args)
    return out.reshape(n, 1)


net_forward = jax.jit(_fused_forward)


# -----------------------------------------------------------------------------
# Parameters (deterministic, synthetic) and one-time GEMM-ready packing
# -----------------------------------------------------------------------------
def init_params(key, in_ch=3, ctx_dim=4, hidden=32, c1=8, c2=16):
    k = jax.random.split(key, 9)
    return {
        "conv1_w": jax.random.normal(k[0], (c1, in_ch, 3, 3), jnp.float32) * 0.1,
        "conv1_b": jax.random.normal(k[1], (c1,), jnp.float32) * 0.01,
        "conv2_w": jax.random.normal(k[2], (c2, c1, 3, 3), jnp.float32) * 0.1,
        "conv2_b": jax.random.normal(k[3], (c2,), jnp.float32) * 0.01,
        # fc1 split into image-feature blocks (pos, channel, hidden) + context branch
        "fc1_w_img": jax.random.normal(k[4], (_NPOOL2, c2, hidden), jnp.float32) * 0.05,
        "fc1_w_ctx": jax.random.normal(k[5], (ctx_dim, hidden), jnp.float32) * 0.05,
        "fc1_b": jax.random.normal(k[6], (hidden,), jnp.float32) * 0.01,
        "fc2_w": jax.random.normal(k[7], (hidden, 1), jnp.float32) * 0.05,
        "fc2_b": jax.random.normal(k[8], (1,), jnp.float32) * 0.01,
    }


def prepare_params(params, block_batch=1):
    """One-time packing of weights into kernel (GEMM-ready) layouts.

    `block_batch` fixes the number of images processed per grid step; any
    runtime batch that is a multiple of it is accepted.
    """
    nb = int(block_batch)
    c1, cin = params["conv1_w"].shape[:2]
    c2 = params["conv2_w"].shape[0]
    hidden = params["fc1_b"].shape[0]
    cp = _ceil_to(cin, 8)                       # pad channels to a sublane multiple
    wblk = nb * _PFLAT
    lblk = _ceil_to(wblk + 187, 128)            # image window + halo for every shifted slice
    assert _B0 >= 59 and lblk >= _B0 + wblk + 123

    # conv weights with the 9 taps folded into the contraction dim
    # (cols ordered tap*Cp + cin, taps row-major over (ki, kj)).
    w1 = np.zeros((c1, 9 * cp), np.float32)
    w1_src = np.transpose(np.asarray(params["conv1_w"]), (0, 2, 3, 1))  # (C1,3,3,Cin)
    for t in range(9):
        ki, kj = divmod(t, 3)
        w1[:, t * cp:t * cp + cin] = w1_src[:, ki, kj, :]
    w2 = np.transpose(np.asarray(params["conv2_w"]), (0, 2, 3, 1)).reshape(c2, 9 * c1)

    # fc1 image weights as ONE (hidden, 16*C2) block (cols ordered p*C2 + c)
    wfc1 = np.asarray(params["fc1_w_img"]).reshape(_NPOOL2 * c2, hidden).T

    # 0/1 constants: pooled-position mask (doubles as conv2 zero-padding and
    # image/margin isolation) and the block-local 4x4 selection matrix.
    mask = np.zeros((1, lblk), np.float32)
    ssel = np.zeros((wblk, _NPOOL2 * nb), np.float32)
    for im in range(nb):
        base = im * _PFLAT
        for a in range(_IMG // 2):
            for b in range(_IMG // 2):
                mask[0, _B0 + base + (1 + 2 * a) * _HP + (1 + 2 * b)] = 1.0
        for i in range(4):
            for j in range(4):
                ssel[base + (1 + 4 * i) * _HP + (1 + 4 * j), (i * 4 + j) * nb + im] = 1.0

    asf = lambda v: jnp.asarray(v, jnp.float32)
    return {
        "w1": asf(w1), "b1": asf(np.asarray(params["conv1_b"]).reshape(c1, 1)),
        "w2": asf(w2), "b2": asf(np.asarray(params["conv2_b"]).reshape(c2, 1)),
        "mask": asf(mask), "ssel": asf(ssel),
        "wfc1": asf(wfc1),
        "wctx": asf(np.asarray(params["fc1_w_ctx"]).T),              # (hidden, ctx)
        "bfc1": asf(np.asarray(params["fc1_b"]).reshape(hidden, 1)),
        "wfc2": asf(np.asarray(params["fc2_w"]).T),                  # (1, hidden)
        "bfc2": asf(np.asarray(params["fc2_b"]).reshape(1, 1)),
    }


# -----------------------------------------------------------------------------
# Pure-JAX reference (same math, standard ops) for the correctness check
# -----------------------------------------------------------------------------
def _reference_forward(params, x, context):
    def conv_relu(h, w, b):
        y = jax.lax.conv_general_dilated(
            h, w, window_strides=(1, 1), padding=((1, 1), (1, 1)),
            dimension_numbers=("NCHW", "OIHW", "NCHW"))
        return jax.nn.relu(y + b.reshape(1, -1, 1, 1))

    def pool(h):
        n, c, hh, ww = h.shape
        return h.reshape(n, c, hh // 2, 2, ww // 2, 2).max(axis=(3, 5))

    h = pool(conv_relu(x, params["conv1_w"], params["conv1_b"]))
    h = pool(conv_relu(h, params["conv2_w"], params["conv2_b"]))
    n, c2 = h.shape[0], h.shape[1]
    feat = jnp.transpose(h, (0, 2, 3, 1)).reshape(n, -1)        # index p*C2 + c
    w_img = params["fc1_w_img"].reshape(_NPOOL2 * c2, -1)       # rows  p*C2 + c
    z = jax.nn.relu(feat @ w_img + context @ params["fc1_w_ctx"]
                    + params["fc1_b"][None, :])
    return z @ params["fc2_w"] + params["fc2_b"][None, :]


if __name__ == "__main__":
    # Full-precision f32 matmuls everywhere so the kernel/reference check is tight.
    jax.config.update("jax_default_matmul_precision", "highest")

    key = jax.random.PRNGKey(0)
    kx, kc, kw = jax.random.split(key, 3)

    batch, in_ch, img, ctx_dim, hidden = 2, 3, 16, 4, 32
    x = jax.random.normal(kx, (batch, in_ch, img, img), jnp.float32)
    context = jax.random.normal(kc, (batch, ctx_dim), jnp.float32)

    params = init_params(kw, in_ch=in_ch, ctx_dim=ctx_dim, hidden=hidden)
    ref = _reference_forward(params, x, context)

    # block_batch=1 -> grid=(batch,) with "parallel" semantics (uses both v7x cores).
    kparams = prepare_params(params, block_batch=1)
    out = net_forward(kparams, x, context)
    jax.block_until_ready(out)
    assert out.shape == (batch, 1)
    assert jnp.allclose(out, ref, atol=1e-4, rtol=1e-4), (np.asarray(out), np.asarray(ref))

    # Also exercise a multi-image block (grid=(1,)) to check cross-image isolation.
    kparams2 = prepare_params(params, block_batch=2)
    out2 = net_forward(kparams2, x, context)
    jax.block_until_ready(out2)
    assert jnp.allclose(out2, ref, atol=1e-4, rtol=1e-4), (np.asarray(out2), np.asarray(ref))

    print("KERNEL_OK")
</pallas_src>

<mosaic_0001>
module attributes {stable_mosaic.version = 11 : i64} {
  func.func @_net_kernel(%arg0: i32, %arg1: memref<8x512xf32, #tpu.memory_space<vmem>>, %arg2: memref<1x4x1xf32, #tpu.memory_space<vmem>>, %arg3: memref<8x72xf32, #tpu.memory_space<vmem>>, %arg4: memref<8x1xf32, #tpu.memory_space<vmem>>, %arg5: memref<16x72xf32, #tpu.memory_space<vmem>>, %arg6: memref<16x1xf32, #tpu.memory_space<vmem>>, %arg7: memref<1x512xf32, #tpu.memory_space<vmem>>, %arg8: memref<324x16xf32, #tpu.memory_space<vmem>>, %arg9: memref<32x256xf32, #tpu.memory_space<vmem>>, %arg10: memref<32x4xf32, #tpu.memory_space<vmem>>, %arg11: memref<32x1xf32, #tpu.memory_space<vmem>>, %arg12: memref<1x32xf32, #tpu.memory_space<vmem>>, %arg13: memref<1x1xf32, #tpu.memory_space<vmem>>, %arg14: memref<1x1x1xf32, #tpu.memory_space<vmem>>) attributes {dimension_semantics = [#tpu.dimension_semantics<parallel>], iteration_bounds = array<i64: 2>, scalar_prefetch = 0 : i64, scratch_operands = 0 : i64, tpu.core_type = #tpu.core_type<tc>, window_params = [{transform_indices = @transform_0, window_bounds = array<i64: 8, 512>}, {transform_indices = @transform_1, window_bounds = array<i64: 1, 4, 1>}, {pipeline_mode = #tpu.pipeline_mode<synchronous>, transform_indices = @transform_2, window_bounds = array<i64: 8, 72>}, {pipeline_mode = #tpu.pipeline_mode<synchronous>, transform_indices = @transform_3, window_bounds = array<i64: 8, 1>}, {pipeline_mode = #tpu.pipeline_mode<synchronous>, transform_indices = @transform_4, window_bounds = array<i64: 16, 72>}, {pipeline_mode = #tpu.pipeline_mode<synchronous>, transform_indices = @transform_5, window_bounds = array<i64: 16, 1>}, {pipeline_mode = #tpu.pipeline_mode<synchronous>, transform_indices = @transform_6, window_bounds = array<i64: 1, 512>}, {pipeline_mode = #tpu.pipeline_mode<synchronous>, transform_indices = @transform_7, window_bounds = array<i64: 324, 16>}, {pipeline_mode = #tpu.pipeline_mode<synchronous>, transform_indices = @transform_8, window_bounds = array<i64: 32, 256>}, {pipeline_mode = #tpu.pipeline_mode<synchronous>, transform_indices = @transform_9, window_bounds = array<i64: 32, 4>}, {pipeline_mode = #tpu.pipeline_mode<synchronous>, transform_indices = @transform_10, window_bounds = array<i64: 32, 1>}, {pipeline_mode = #tpu.pipeline_mode<synchronous>, transform_indices = @transform_11, window_bounds = array<i64: 1, 32>}, {pipeline_mode = #tpu.pipeline_mode<synchronous>, transform_indices = @transform_12, window_bounds = array<i64: 1, 1>}, {transform_indices = @transform_13, window_bounds = array<i64: 1, 1, 1>}]} {
    %c0 = arith.constant 0 : index
    %c5 = arith.constant 5 : index
    %0 = vector.load %arg1[%c0, %c5] : memref<8x512xf32, #tpu.memory_space<vmem>>, vector<8x468xf32>
    %c0_0 = arith.constant 0 : index
    %c6 = arith.constant 6 : index
    %1 = vector.load %arg1[%c0_0, %c6] : memref<8x512xf32, #tpu.memory_space<vmem>>, vector<8x468xf32>
    %c0_1 = arith.constant 0 : index
    %c7 = arith.constant 7 : index
    %2 = vector.load %arg1[%c0_1, %c7] : memref<8x512xf32, #tpu.memory_space<vmem>>, vector<8x468xf32>
    %c0_2 = arith.constant 0 : index
    %c23 = arith.constant 23 : index
    %3 = vector.load %arg1[%c0_2, %c23] : memref<8x512xf32, #tpu.memory_space<vmem>>, vector<8x468xf32>
    %c0_3 = arith.constant 0 : index
    %c24 = arith.constant 24 : index
    %4 = vector.load %arg1[%c0_3, %c24] : memref<8x512xf32, #tpu.memory_space<vmem>>, vector<8x468xf32>
    %c0_4 = arith.constant 0 : index
    %c25 = arith.constant 25 : index
    %5 = vector.load %arg1[%c0_4, %c25] : memref<8x512xf32, #tpu.memory_space<vmem>>, vector<8x468xf32>
    %c0_5 = arith.constant 0 : index
    %c41 = arith.constant 41 : index
    %6 = vector.load %arg1[%c0_5, %c41] : memref<8x512xf32, #tpu.memory_space<vmem>>, vector<8x468xf32>
    %c0_6 = arith.constant 0 : index
    %c42 = arith.constant 42 : index
    %7 = vector.load %arg1[%c0_6, %c42] : memref<8x512xf32, #tpu.memory_space<vmem>>, vector<8x468xf32>
    %c0_7 = arith.constant 0 : index
    %c43 = arith.constant 43 : index
    %8 = vector.load %arg1[%c0_7, %c43] : memref<8x512xf32, #tpu.memory_space<vmem>>, vector<8x468xf32>
    %9 = tpu.concatenate %0, %1, %2, %3, %4, %5, %6, %7, %8 in 0 : vector<8x468xf32>, vector<8x468xf32>, vector<8x468xf32>, vector<8x468xf32>, vector<8x468xf32>, vector<8x468xf32>, vector<8x468xf32>, vector<8x468xf32>, vector<8x468xf32> -> vector<72x468xf32>
    %c0_8 = arith.constant 0 : index
    %c0_9 = arith.constant 0 : index
    %10 = vector.load %arg3[%c0_8, %c0_9] : memref<8x72xf32, #tpu.memory_space<vmem>>, vector<8x72xf32>
    %cst = arith.constant dense<0.000000e+00> : vector<8x468xf32>
    %11 = tpu.matmul %10, %9, %cst {dimension_numbers = #tpu.dot_dimension_numbers<[1], [0], [0], [1], [0, 0, 1, 1], [], []>, precision = #tpu.contract_precision<fp32>} : vector<8x72xf32>, vector<72x468xf32>, vector<8x468xf32> -> vector<8x468xf32>
    %c0_10 = arith.constant 0 : index
    %c0_11 = arith.constant 0 : index
    %12 = vector.load %arg4[%c0_10, %c0_11] : memref<8x1xf32, #tpu.memory_space<vmem>>, vector<8x1xf32>
    %13 = vector.broadcast %12 : vector<8x1xf32> to vector<8x468xf32>
    %14 = arith.addf %11, %13 : vector<8x468xf32>
    %cst_12 = arith.constant 0.000000e+00 : f32
    %15 = vector.broadcast %cst_12 : f32 to vector<8x468xf32>
    %16 = arith.maximumf %14, %15 : vector<8x468xf32>
    %17 = vector.extract_strided_slice %16 {offsets = [0, 0], sizes = [8, 444], strides = [1, 1]} : vector<8x468xf32> to vector<8x444xf32>
    %18 = vector.extract_strided_slice %16 {offsets = [0, 1], sizes = [8, 444], strides = [1, 1]} : vector<8x468xf32> to vector<8x444xf32>
    %19 = arith.maximumf %17, %18 : vector<8x444xf32>
    %20 = vector.extract_strided_slice %16 {offsets = [0, 18], sizes = [8, 444], strides = [1, 1]} : vector<8x468xf32> to vector<8x444xf32>
    %21 = vector.extract_strided_slice %16 {offsets = [0, 19], sizes = [8, 444], strides = [1, 1]} : vector<8x468xf32> to vector<8x444xf32>
    %22 = arith.maximumf %20, %21 : vector<8x444xf32>
    %23 = arith.maximumf %19, %22 : vector<8x444xf32>
    %c0_13 = arith.constant 0 : index
    %c24_14 = arith.constant 24 : index
    %24 = vector.load %arg7[%c0_13, %c24_14] : memref<1x512xf32, #tpu.memory_space<vmem>>, vector<1x444xf32>
    %25 = vector.broadcast %24 : vector<1x444xf32> to vector<8x444xf32>
    %26 = arith.mulf %23, %25 : vector<8x444xf32>
    %27 = vector.extract_strided_slice %26 {offsets = [0, 2], sizes = [8, 364], strides = [1, 1]} : vector<8x444xf32> to vector<8x364xf32>
    %28 = vector.extract_strided_slice %26 {offsets = [0, 4], sizes = [8, 364], strides = [1, 1]} : vector<8x444xf32> to vector<8x364xf32>
    %29 = vector.extract_strided_slice %26 {offsets = [0, 6], sizes = [8, 364], strides = [1, 1]} : vector<8x444xf32> to vector<8x364xf32>
    %30 = vector.extract_strided_slice %26 {offsets = [0, 38], sizes = [8, 364], strides = [1, 1]} : vector<8x444xf32> to vector<8x364xf32>
    %31 = vector.extract_strided_slice %26 {offsets = [0, 40], sizes = [8, 364], strides = [1, 1]} : vector<8x444xf32> to vector<8x364xf32>
    %32 = vector.extract_strided_slice %26 {offsets = [0, 42], sizes = [8, 364], strides = [1, 1]} : vector<8x444xf32> to vector<8x364xf32>
    %33 = vector.extract_strided_slice %26 {offsets = [0, 74], sizes = [8, 364], strides = [1, 1]} : vector<8x444xf32> to vector<8x364xf32>
    %34 = vector.extract_strided_slice %26 {offsets = [0, 76], sizes = [8, 364], strides = [1, 1]} : vector<8x444xf32> to vector<8x364xf32>
    %35 = vector.extract_strided_slice %26 {offsets = [0, 78], sizes = [8, 364], strides = [1, 1]} : vector<8x444xf32> to vector<8x364xf32>
    %36 = tpu.concatenate %27, %28, %29, %30, %31, %32, %33, %34, %35 in 0 : vector<8x364xf32>, vector<8x364xf32>, vector<8x364xf32>, vector<8x364xf32>, vector<8x364xf32>, vector<8x364xf32>, vector<8x364xf32>, vector<8x364xf32>, vector<8x364xf32> -> vector<72x364xf32>
    %c0_15 = arith.constant 0 : index
    %c0_16 = arith.constant 0 : index
    %37 = vector.load %arg5[%c0_15, %c0_16] : memref<16x72xf32, #tpu.memory_space<vmem>>, vector<16x72xf32>
    %cst_17 = arith.constant dense<0.000000e+00> : vector<16x364xf32>
    %38 = tpu.matmul %37, %36, %cst_17 {dimension_numbers = #tpu.dot_dimension_numbers<[1], [0], [0], [1], [0, 0, 1, 1], [], []>, precision = #tpu.contract_precision<fp32>} : vector<16x72xf32>, vector<72x364xf32>, vector<16x364xf32> -> vector<16x364xf32>
    %c0_18 = arith.constant 0 : index
    %c0_19 = arith.constant 0 : index
    %39 = vector.load %arg6[%c0_18, %c0_19] : memref<16x1xf32, #tpu.memory_space<vmem>>, vector<16x1xf32>
    %40 = vector.broadcast %39 : vector<16x1xf32> to vector<16x364xf32>
    %41 = arith.addf %38, %40 : vector<16x364xf32>
    %cst_20 = arith.constant 0.000000e+00 : f32
    %42 = vector.broadcast %cst_20 : f32 to vector<16x364xf32>
    %43 = arith.maximumf %41, %42 : vector<16x364xf32>
    %44 = vector.extract_strided_slice %43 {offsets = [0, 0], sizes = [16, 324], strides = [1, 1]} : vector<16x364xf32> to vector<16x324xf32>
    %45 = vector.extract_strided_slice %43 {offsets = [0, 2], sizes = [16, 324], strides = [1, 1]} : vector<16x364xf32> to vector<16x324xf32>
    %46 = arith.maximumf %44, %45 : vector<16x324xf32>
    %47 = vector.extract_strided_slice %43 {offsets = [0, 36], sizes = [16, 324], strides = [1, 1]} : vector<16x364xf32> to vector<16x324xf32>
    %48 = vector.extract_strided_slice %43 {offsets = [0, 38], sizes = [16, 324], strides = [1, 1]} : vector<16x364xf32> to vector<16x324xf32>
    %49 = arith.maximumf %47, %48 : vector<16x324xf32>
    %50 = arith.maximumf %46, %49 : vector<16x324xf32>
    %c0_21 = arith.constant 0 : index
    %c0_22 = arith.constant 0 : index
    %51 = vector.load %arg8[%c0_21, %c0_22] : memref<324x16xf32, #tpu.memory_space<vmem>>, vector<324x16xf32>
    %cst_23 = arith.constant dense<0.000000e+00> : vector<16x16xf32>
    %52 = tpu.matmul %50, %51, %cst_23 {dimension_numbers = #tpu.dot_dimension_numbers<[1], [0], [0], [1], [0, 0, 1, 1], [], []>, precision = #tpu.contract_precision<fp32>} : vector<16x324xf32>, vector<324x16xf32>, vector<16x16xf32> -> vector<16x16xf32>
    %53 = vector.extract_strided_slice %52 {offsets = [0, 0], sizes = [16, 1], strides = [1, 1]} : vector<16x16xf32> to vector<16x1xf32>
    %54 = vector.extract_strided_slice %52 {offsets = [0, 1], sizes = [16, 1], strides = [1, 1]} : vector<16x16xf32> to vector<16x1xf32>
    %55 = vector.extract_strided_slice %52 {offsets = [0, 2], sizes = [16, 1], strides = [1, 1]} : vector<16x16xf32> to vector<16x1xf32>
    %56 = vector.extract_strided_slice %52 {offsets = [0, 3], sizes = [16, 1], strides = [1, 1]} : vector<16x16xf32> to vector<16x1xf32>
    %57 = vector.extract_strided_slice %52 {offsets = [0, 4], sizes = [16, 1], strides = [1, 1]} : vector<16x16xf32> to vector<16x1xf32>
    %58 = vector.extract_strided_slice %52 {offsets = [0, 5], sizes = [16, 1], strides = [1, 1]} : vector<16x16xf32> to vector<16x1xf32>
    %59 = vector.extract_strided_slice %52 {offsets = [0, 6], sizes = [16, 1], strides = [1, 1]} : vector<16x16xf32> to vector<16x1xf32>
    %60 = vector.extract_strided_slice %52 {offsets = [0, 7], sizes = [16, 1], strides = [1, 1]} : vector<16x16xf32> to vector<16x1xf32>
    %61 = vector.extract_strided_slice %52 {offsets = [0, 8], sizes = [16, 1], strides = [1, 1]} : vector<16x16xf32> to vector<16x1xf32>
    %62 = vector.extract_strided_slice %52 {offsets = [0, 9], sizes = [16, 1], strides = [1, 1]} : vector<16x16xf32> to vector<16x1xf32>
    %63 = vector.extract_strided_slice %52 {offsets = [0, 10], sizes = [16, 1], strides = [1, 1]} : vector<16x16xf32> to vector<16x1xf32>
    %64 = vector.extract_strided_slice %52 {offsets = [0, 11], sizes = [16, 1], strides = [1, 1]} : vector<16x16xf32> to vector<16x1xf32>
    %65 = vector.extract_strided_slice %52 {offsets = [0, 12], sizes = [16, 1], strides = [1, 1]} : vector<16x16xf32> to vector<16x1xf32>
    %66 = vector.extract_strided_slice %52 {offsets = [0, 13], sizes = [16, 1], strides = [1, 1]} : vector<16x16xf32> to vector<16x1xf32>
    %67 = vector.extract_strided_slice %52 {offsets = [0, 14], sizes = [16, 1], strides = [1, 1]} : vector<16x16xf32> to vector<16x1xf32>
    %68 = vector.extract_strided_slice %52 {offsets = [0, 15], sizes = [16, 1], strides = [1, 1]} : vector<16x16xf32> to vector<16x1xf32>
    %69 = tpu.concatenate %53, %54, %55, %56, %57, %58, %59, %60, %61, %62, %63, %64, %65, %66, %67, %68 in 0 : vector<16x1xf32>, vector<16x1xf32>, vector<16x1xf32>, vector<16x1xf32>, vector<16x1xf32>, vector<16x1xf32>, vector<16x1xf32>, vector<16x1xf32>, vector<16x1xf32>, vector<16x1xf32>, vector<16x1xf32>, vector<16x1xf32>, vector<16x1xf32>, vector<16x1xf32>, vector<16x1xf32>, vector<16x1xf32> -> vector<256x1xf32>
    %c0_24 = arith.constant 0 : index
    %c0_25 = arith.constant 0 : index
    %70 = vector.load %arg9[%c0_24, %c0_25] : memref<32x256xf32, #tpu.memory_space<vmem>>, vector<32x256xf32>
    %cst_26 = arith.constant dense<0.000000e+00> : vector<32x1xf32>
    %71 = tpu.matmul %70, %69, %cst_26 {dimension_numbers = #tpu.dot_dimension_numbers<[1], [0], [0], [1], [0, 0, 1, 1], [], []>, precision = #tpu.contract_precision<fp32>} : vector<32x256xf32>, vector<256x1xf32>, vector<32x1xf32> -> vector<32x1xf32>
    %c0_27 = arith.constant 0 : index
    %c0_28 = arith.constant 0 : index
    %72 = vector.load %arg10[%c0_27, %c0_28] : memref<32x4xf32, #tpu.memory_space<vmem>>, vector<32x4xf32>
    %c0_29 = arith.constant 0 : index
    %c0_30 = arith.constant 0 : index
    %c0_31 = arith.constant 0 : index
    %73 = vector.load %arg2[%c0_29, %c0_30, %c0_31] : memref<1x4x1xf32, #tpu.memory_space<vmem>>, vector<1x4x1xf32>
    %74 = vector.shape_cast %73 : vector<1x4x1xf32> to vector<4x1xf32>
    %cst_32 = arith.constant dense<0.000000e+00> : vector<32x1xf32>
    %75 = tpu.matmul %72, %74, %cst_32 {dimension_numbers = #tpu.dot_dimension_numbers<[1], [0], [0], [1], [0, 0, 1, 1], [], []>, precision = #tpu.contract_precision<fp32>} : vector<32x4xf32>, vector<4x1xf32>, vector<32x1xf32> -> vector<32x1xf32>
    %76 = arith.addf %71, %75 : vector<32x1xf32>
    %c0_33 = arith.constant 0 : index
    %c0_34 = arith.constant 0 : index
    %77 = vector.load %arg11[%c0_33, %c0_34] : memref<32x1xf32, #tpu.memory_space<vmem>>, vector<32x1xf32>
    %78 = arith.addf %76, %77 : vector<32x1xf32>
    %cst_35 = arith.constant 0.000000e+00 : f32
    %79 = vector.broadcast %cst_35 : f32 to vector<32x1xf32>
    %80 = arith.maximumf %78, %79 : vector<32x1xf32>
    %c0_36 = arith.constant 0 : index
    %c0_37 = arith.constant 0 : index
    %81 = vector.load %arg12[%c0_36, %c0_37] : memref<1x32xf32, #tpu.memory_space<vmem>>, vector<1x32xf32>
    %cst_38 = arith.constant dense<0.000000e+00> : vector<1x1xf32>
    %82 = tpu.matmul %81, %80, %cst_38 {dimension_numbers = #tpu.dot_dimension_numbers<[1], [0], [0], [1], [0, 0, 1, 1], [], []>, precision = #tpu.contract_precision<fp32>} : vector<1x32xf32>, vector<32x1xf32>, vector<1x1xf32> -> vector<1x1xf32>
    %c0_39 = arith.constant 0 : index
    %c0_40 = arith.constant 0 : index
    %83 = vector.load %arg13[%c0_39, %c0_40] : memref<1x1xf32, #tpu.memory_space<vmem>>, vector<1x1xf32>
    %84 = arith.addf %82, %83 : vector<1x1xf32>
    %c0_41 = arith.constant 0 : index
    %c0_42 = arith.constant 0 : index
    %c0_43 = arith.constant 0 : index
    %85 = vector.load %arg14[%c0_41, %c0_42, %c0_43] : memref<1x1x1xf32, #tpu.memory_space<vmem>>, vector<1x1x1xf32>
    %86 = vector.shape_cast %85 : vector<1x1x1xf32> to vector<1x1xf32>
    %87 = vector.shape_cast %84 : vector<1x1xf32> to vector<1x1x1xf32>
    tpu.vector_store %arg14[%c0_41, %c0_42, %c0_43], %87 {strides = array<i32>} : memref<1x1x1xf32, #tpu.memory_space<vmem>>, vector<1x1x1xf32>,
    return
  }
  func.func @transform_0(%arg0: i32) -> (i32, i32) {
    %c0_i32 = arith.constant 0 : i32
    %c0_i32_0 = arith.constant 0 : i32
    return %arg0, %c0_i32 : i32, i32
  }
  func.func @transform_1(%arg0: i32) -> (i32, i32, i32) {
    %c0_i32 = arith.constant 0 : i32
    %c0_i32_0 = arith.constant 0 : i32
    %c0_i32_1 = arith.constant 0 : i32
    return %arg0, %c0_i32, %c0_i32_0 : i32, i32, i32
  }
  func.func @transform_2(%arg0: i32) -> (i32, i32) {
    %c0_i32 = arith.constant 0 : i32
    %c0_i32_0 = arith.constant 0 : i32
    %c0_i32_1 = arith.constant 0 : i32
    return %c0_i32, %c0_i32_0 : i32, i32
  }
  func.func @transform_3(%arg0: i32) -> (i32, i32) {
    %c0_i32 = arith.constant 0 : i32
    %c0_i32_0 = arith.constant 0 : i32
    %c0_i32_1 = arith.constant 0 : i32
    return %c0_i32, %c0_i32_0 : i32, i32
  }
  func.func @transform_4(%arg0: i32) -> (i32, i32) {
    %c0_i32 = arith.constant 0 : i32
    %c0_i32_0 = arith.constant 0 : i32
    %c0_i32_1 = arith.constant 0 : i32
    return %c0_i32, %c0_i32_0 : i32, i32
  }
  func.func @transform_5(%arg0: i32) -> (i32, i32) {
    %c0_i32 = arith.constant 0 : i32
    %c0_i32_0 = arith.constant 0 : i32
    %c0_i32_1 = arith.constant 0 : i32
    return %c0_i32, %c0_i32_0 : i32, i32
  }
  func.func @transform_6(%arg0: i32) -> (i32, i32) {
    %c0_i32 = arith.constant 0 : i32
    %c0_i32_0 = arith.constant 0 : i32
    %c0_i32_1 = arith.constant 0 : i32
    return %c0_i32, %c0_i32_0 : i32, i32
  }
  func.func @transform_7(%arg0: i32) -> (i32, i32) {
    %c0_i32 = arith.constant 0 : i32
    %c0_i32_0 = arith.constant 0 : i32
    %c0_i32_1 = arith.constant 0 : i32
    return %c0_i32, %c0_i32_0 : i32, i32
  }
  func.func @transform_8(%arg0: i32) -> (i32, i32) {
    %c0_i32 = arith.constant 0 : i32
    %c0_i32_0 = arith.constant 0 : i32
    %c0_i32_1 = arith.constant 0 : i32
    return %c0_i32, %c0_i32_0 : i32, i32
  }
  func.func @transform_9(%arg0: i32) -> (i32, i32) {
    %c0_i32 = arith.constant 0 : i32
    %c0_i32_0 = arith.constant 0 : i32
    %c0_i32_1 = arith.constant 0 : i32
    return %c0_i32, %c0_i32_0 : i32, i32
  }
  func.func @transform_10(%arg0: i32) -> (i32, i32) {
    %c0_i32 = arith.constant 0 : i32
    %c0_i32_0 = arith.constant 0 : i32
    %c0_i32_1 = arith.constant 0 : i32
    return %c0_i32, %c0_i32_0 : i32, i32
  }
  func.func @transform_11(%arg0: i32) -> (i32, i32) {
    %c0_i32 = arith.constant 0 : i32
    %c0_i32_0 = arith.constant 0 : i32
    %c0_i32_1 = arith.constant 0 : i32
    return %c0_i32, %c0_i32_0 : i32, i32
  }
  func.func @transform_12(%arg0: i32) -> (i32, i32) {
    %c0_i32 = arith.constant 0 : i32
    %c0_i32_0 = arith.constant 0 : i32
    %c0_i32_1 = arith.constant 0 : i32
    return %c0_i32, %c0_i32_0 : i32, i32
  }
  func.func @transform_13(%arg0: i32) -> (i32, i32, i32) {
    %c0_i32 = arith.constant 0 : i32
    %c0_i32_0 = arith.constant 0 : i32
    %c0_i32_1 = arith.constant 0 : i32
    return %arg0, %c0_i32, %c0_i32_0 : i32, i32, i32
  }
}

</mosaic_0001>

<bundles_post_ra>
// kernel: _fused_forward.1
= control target key start
LH: loop header
LB: loop body
LE: loop exit
PB: predicated region body
PF: predicated region fallthrough
CT: control target
= control target key end

     0   :  { %s9800_s27 = smov 0   ;;  %s12561_s0 = inlined_call_operand.vmem [shape: f32[16,512], index: 0, kind: input, shape index: {}]   ;;  %s12562_s1 = inlined_call_operand.vmem [shape: f32[2,4,1], index: 1, kind: input, shape index: {}]   ;;  %s12563_s2 = inlined_call_operand.vmem [shape: f32[8,72], index: 2, kind: input, shape index: {}]   ;;  %s12564_s3 = inlined_call_operand.vmem [shape: f32[8,1], index: 3, kind: input, shape index: {}]   ;;  %s12565_s4 = inlined_call_operand.vmem [shape: f32[16,72], index: 4, kind: input, shape index: {}]   ;;  %s12566_s5 = inlined_call_operand.vmem [shape: f32[16,1], index: 5, kind: input, shape index: {}]   ;;  %s12567_s6 = inlined_call_operand.vmem [shape: f32[1,512], index: 6, kind: input, shape index: {}]   ;;  %s12568_s7 = inlined_call_operand.vmem [shape: f32[324,16], index: 7, kind: input, shape index: {}]   ;;  %s12569_s8 = inlined_call_operand.vmem [shape: f32[32,256], index: 8, kind: input, shape index: {}]   ;;  %s12570_s9 = inlined_call_operand.vmem [shape: f32[32,4], index: 9, kind: input, shape index: {}]   ;;  %s12571_s10 = inlined_call_operand.vmem [shape: f32[32,1], index: 10, kind: input, shape index: {}]   ;;  %s12572_s11 = inlined_call_operand.vmem [shape: f32[1,32], index: 11, kind: input, shape index: {}]   ;;  %s12573_s12 = inlined_call_operand.<no memory space> [shape: f32[1,1], index: 12, kind: input, shape index: {}]   ;;  %s12574_s13 = inlined_call_operand.vmem [shape: f32[2,1,1], index: 13, kind: output, shape index: {}]  }
   0x1   :  { %v18_v0 = vstv %s12573_s12 }
   0x2   :  { %19 = vst [vmem:[#allocation2] sm:$0x1] %v18_v0 }
   0x3 LB: > { %s7585_s28 = sadd.s32 4294967295, %s9695_s27   ;;  %p7589_p0 = scmp.ge.s32.totalorder %s9695_s27, 1  ;;  %s9695_s27 = sphi %s9800_s27, %s25_s27  }
   0x4   : > { %p398_p1 = scmp.lt.s32.totalorder %s9695_s27, 3 }
   0x6   : > { %p399_p2 = pnand %p7589_p0, %p398_p1 }
   0x8   : > { %402 = sbr.rel (%p399_p2) target bundleno = 2914 (0xb62), region = 72 }
   0xf   : > { %p444_p3 = scmp.lt.s32.totalorder %s7585_s28, 1  ;;  %s9697_s15 = smov 127   ;;  %vm472_vm0 = vcmask 1039360   ;;  %vm484_vm1 = vcmask 1031168   ;;  %vm496_vm2 = vcmask 900096   ;;  %vm508_vm3 = vcmask 891904  }
  0x10   : > { %s9698_s16 = smov 126   ;;  %s9699_s17 = smov 110   ;;  %vm520_vm4 = vcmask 883712   ;;  %vm532_vm5 = vcmask 752640   ;;  %vm544_vm6 = vcmask 744448   ;;  %vm556_vm7 = vcmask 736256  }
  0x11   : > { %s13052_s28 = smov (!%p444_p3, %s7585_s28), 1  ;;  %s9700_s18 = smov 109   ;;  %v12575_v56 = vmov 0.0   ;;  %vm639_vm8 = vcmask 1006592   ;;  %vm703_vm9 = vcmask 588800   ;;  %vm2129_vm10 = vcmask 850944  }
  0x12   : > { %s7595_s12 = sshll.u32 %s13052_s28, 5  ;;  %s9701_s19 = smov 108   ;;  %789 = vmatprep.mubr.f32.mxu1 %v12575_v56  ;;  %955 = vmatprep.mubr.f32.mxu0 %v12575_v56  ;;  %vm2158_vm11 = vcmask 1014784   ;;  %vm2192_vm12 = vcmask 719872   ;;  %vm2204_vm13 = vcmask 457728   ;;  %vm2216_vm14 = vcmask 441344  }
  0x13   : > { %s448_s14 = scalar_lea.vmem %s12561_s0, %s7595_s12  ;;  %s9702_s20 = smov 92   ;;  %vm2228_vm15 = vcmask 424960  }
  0x14   : > { %v459_v1 = vld [vmem:[%s448_s14 + $0x18] sm:$0xff]  ;;  %v457_v2 = vld [vmem:[%s448_s14 + $0x8] sm:$0xff]  ;;  %v458_v3 = vld [vmem:[%s448_s14 + $0x10] sm:$0xff]  ;;  %s9703_s21 = smov 91   ;;  %s9704_s22 = smov 90  }
  0x15   : > { %470 = vrot.lane.b32.xlu1 %v459_v1, %s9697_s15  ;;  %466 = vrot.lane.b32.xlu0 %v457_v2, %s9697_s15  ;;  %v456_v4 = vld [vmem:[%s448_s14] sm:$0xff]  ;;  %s9705_s23 = smov 123   ;;  %s9708_s14 = smov 104  }
  0x16   : > { %s9713_s24 = smov 52   ;;  %s9715_s25 = smov 119  }
  0x17   : > { %s9716_s26 = smov 118   ;;  %s9717_s12 = smov 117  }
  0x18   : > { %s9718_s29 = smov 125   ;;  %s9719_s30 = smov 116  }
  0x19   : > { %468 = vrot.lane.b32.xlu0 %v458_v3, %s9697_s15  ;;  %464 = vrot.lane.b32.xlu1 %v456_v4, %s9697_s15 }
  0x1d   : > { %478 = vrot.lane.b32.xlu0 %v457_v2, %s9698_s16  ;;  %480 = vrot.lane.b32.xlu1 %v458_v3, %s9698_s16 }
  0x21   : > { %482 = vrot.lane.b32.xlu0 %v459_v1, %s9698_s16  ;;  %490 = vrot.lane.b32.xlu1 %v457_v2, %s9699_s17 }
  0x25   : > { %492 = vrot.lane.b32.xlu0 %v458_v3, %s9699_s17  ;;  %494 = vrot.lane.b32.xlu1 %v459_v1, %s9699_s17 }
  0x29   : > { %476 = vrot.lane.b32.xlu0 %v456_v4, %s9698_s16  ;;  %488 = vrot.lane.b32.xlu1 %v456_v4, %s9699_s17 }
  0x2d   : > { %502 = vrot.lane.b32.xlu0 %v457_v2, %s9700_s18  ;;  %504 = vrot.lane.b32.xlu1 %v458_v3, %s9700_s18 }
  0x31   : > { %506 = vrot.lane.b32.xlu0 %v459_v1, %s9700_s18  ;;  %514 = vrot.lane.b32.xlu1 %v457_v2, %s9701_s19 }
  0x35   : > { %516 = vrot.lane.b32.xlu0 %v458_v3, %s9701_s19  ;;  %518 = vrot.lane.b32.xlu1 %v459_v1, %s9701_s19 }
  0x39   : > { %500 = vrot.lane.b32.xlu0 %v456_v4, %s9700_s18  ;;  %512 = vrot.lane.b32.xlu1 %v456_v4, %s9701_s19  ;;  %s9710_s18 = smov 88   ;;  %s9711_s19 = smov 54  }
  0x3d   : > { %526 = vrot.lane.b32.xlu0 %v457_v2, %s9702_s20  ;;  %528 = vrot.lane.b32.xlu1 %v458_v3, %s9702_s20 }
  0x41   : > { %530 = vrot.lane.b32.xlu0 %v459_v1, %s9702_s20  ;;  %538 = vrot.lane.b32.xlu1 %v457_v2, %s9703_s21 }
  0x45   : > { %540 = vrot.lane.b32.xlu0 %v458_v3, %s9703_s21  ;;  %542 = vrot.lane.b32.xlu1 %v459_v1, %s9703_s21 }
  0x49   : > { %524 = vrot.lane.b32.xlu0 %v456_v4, %s9702_s20  ;;  %536 = vrot.lane.b32.xlu1 %v456_v4, %s9703_s21  ;;  %s9712_s21 = smov 124  }
  0x4d   : > { %550 = vrot.lane.b32.xlu0 %v457_v2, %s9704_s22  ;;  %552 = vrot.lane.b32.xlu1 %v458_v3, %s9704_s22 }
  0x51   : > { %554 = vrot.lane.b32.xlu0 %v459_v1, %s9704_s22  ;;  %548 = vrot.lane.b32.xlu1 %v456_v4, %s9704_s22 }
  0x55   : > { %569 = vrot.lane.b32.xlu0 %v457_v2, %s9705_s23  ;;  %571 = vrot.lane.b32.xlu1 %v458_v3, %s9705_s23 }
  0x59   : > { %567 = vrot.lane.b32.xlu0 %v456_v4, %s9705_s23 }
  0x5d   : > { %573 = vrot.lane.b32.xlu0 %v459_v1, %s9705_s23 }
  0x87   : > { %v9838_v5 = vpop.permute.xlu1 %470  ;;  %v467_v6 = vpop.permute.xlu0 %466 }
  0x8b   : > { %v469_v7 = vpop.permute.xlu0 %468  ;;  %v465_v8 = vpop.permute.xlu1 %464 }
  0x8c   : > { %v474_v9 = vsel %vm472_vm0, %v467_v6, %v469_v7  ;;  %v475_v10 = vsel %vm472_vm0, %v469_v7, %v9838_v5  ;;  %v473_v13 = vsel %vm472_vm0, %v465_v8, %v467_v6 }
  0x8d   : > { %577 = vrot.lane.b32.xlu0 %v474_v9, %s9705_s23  ;;  %579 = vrot.lane.b32.xlu1 %v475_v10, %s9705_s23 }
  0x8f   : > { %v479_v11 = vpop.permute.xlu0 %478  ;;  %v481_v12 = vpop.permute.xlu1 %480 }
  0x90   : > { %v486_v14 = vsel %vm484_vm1, %v479_v11, %v481_v12 }
  0x91   : > { %575 = vrot.lane.b32.xlu1 %v473_v13, %s9705_s23  ;;  %585 = vrot.lane.b32.xlu0 %v486_v14, %s9705_s23 }
  0x93   : > { %v9849_v15 = vpop.permute.xlu0 %482  ;;  %v491_v16 = vpop.permute.xlu1 %490 }
  0x94   : > { %v487_v17 = vsel %vm484_vm1, %v481_v12, %v9849_v15 }
  0x95   : > { %587 = vrot.lane.b32.xlu1 %v487_v17, %s9705_s23 }
  0x97   : > { %v493_v18 = vpop.permute.xlu0 %492  ;;  %v9854_v19 = vpop.permute.xlu1 %494 }
  0x98   : > { %v498_v20 = vsel %vm496_vm2, %v491_v16, %v493_v18  ;;  %v499_v21 = vsel %vm496_vm2, %v493_v18, %v9854_v19 }
  0x99   : > { %593 = vrot.lane.b32.xlu0 %v498_v20, %s9705_s23  ;;  %595 = vrot.lane.b32.xlu1 %v499_v21, %s9705_s23 }
  0x9b   : > { %v477_v22 = vpop.permute.xlu0 %476  ;;  %v489_v23 = vpop.permute.xlu1 %488 }
  0x9c   : > { %v485_v24 = vsel %vm484_vm1, %v477_v22, %v479_v11  ;;  %v497_v25 = vsel %vm496_vm2, %v489_v23, %v491_v16 }
  0x9d   : > { %583 = vrot.lane.b32.xlu0 %v485_v24, %s9705_s23  ;;  %591 = vrot.lane.b32.xlu1 %v497_v25, %s9705_s23 }
  0x9f   : > { %v503_v26 = vpop.permute.xlu0 %502  ;;  %v505_v27 = vpop.permute.xlu1 %504 }
  0xa0   : > { %v510_v28 = vsel %vm508_vm3, %v503_v26, %v505_v27 }
  0xa1   : > { %601 = vrot.lane.b32.xlu0 %v510_v28, %s9705_s23 }
  0xa3   : > { %v507_v29 = vpop.permute.xlu0 %506  ;;  %v515_v30 = vpop.permute.xlu1 %514 }
  0xa4   : > { %v511_v31 = vsel %vm508_vm3, %v505_v27, %v507_v29 }
  0xa5   : > { %603 = vrot.lane.b32.xlu1 %v511_v31, %s9705_s23 }
  0xa7   : > { %v517_v32 = vpop.permute.xlu0 %516  ;;  %v519_v33 = vpop.permute.xlu1 %518 }
  0xa8   : > { %v522_v34 = vsel %vm520_vm4, %v515_v30, %v517_v32  ;;  %v523_v35 = vsel %vm520_vm4, %v517_v32, %v519_v33 }
  0xa9   : > { %609 = vrot.lane.b32.xlu0 %v522_v34, %s9705_s23  ;;  %611 = vrot.lane.b32.xlu1 %v523_v35, %s9705_s23 }
  0xab   : > { %v501_v36 = vpop.permute.xlu0 %500  ;;  %v513_v37 = vpop.permute.xlu1 %512 }
  0xac   : > { %v509_v38 = vsel %vm508_vm3, %v501_v36, %v503_v26  ;;  %v521_v39 = vsel %vm520_vm4, %v513_v37, %v515_v30  ;;  %vm9726_vm3 = vmmov 0   ;;  %vm7035_vm4 = vcmask 261120  }
  0xad   : > { %599 = vrot.lane.b32.xlu0 %v509_v38, %s9705_s23  ;;  %607 = vrot.lane.b32.xlu1 %v521_v39, %s9705_s23 }
  0xaf   : > { %v527_v40 = vpop.permute.xlu0 %526  ;;  %v529_v41 = vpop.permute.xlu1 %528 }
  0xb0   : > { %v534_v42 = vsel %vm532_vm5, %v527_v40, %v529_v41 }
  0xb1   : > { %617 = vrot.lane.b32.xlu0 %v534_v42, %s9705_s23 }
  0xb3   : > { %v531_v43 = vpop.permute.xlu0 %530  ;;  %v539_v44 = vpop.permute.xlu1 %538 }
  0xb4   : > { %v535_v45 = vsel %vm532_vm5, %v529_v41, %v531_v43 }
  0xb5   : > { %619 = vrot.lane.b32.xlu1 %v535_v45, %s9705_s23 }
  0xb7   : > { %v541_v46 = vpop.permute.xlu0 %540  ;;  %v543_v47 = vpop.permute.xlu1 %542 }
  0xb8   : > { %v546_v48 = vsel %vm544_vm6, %v539_v44, %v541_v46  ;;  %v547_v49 = vsel %vm544_vm6, %v541_v46, %v543_v47 }
  0xb9   : > { %625 = vrot.lane.b32.xlu0 %v546_v48, %s9705_s23  ;;  %627 = vrot.lane.b32.xlu1 %v547_v49, %s9705_s23 }
  0xbb   : > { %v525_v50 = vpop.permute.xlu0 %524  ;;  %v537_v51 = vpop.permute.xlu1 %536 }
  0xbc   : > { %v533_v52 = vsel %vm532_vm5, %v525_v50, %v527_v40  ;;  %v545_v53 = vsel %vm544_vm6, %v537_v51, %v539_v44 }
  0xbd   : > { %615 = vrot.lane.b32.xlu0 %v533_v52, %s9705_s23  ;;  %623 = vrot.lane.b32.xlu1 %v545_v53, %s9705_s23 }
  0xbf   : > { %v551_v54 = vpop.permute.xlu0 %550  ;;  %v553_v55 = vpop.permute.xlu1 %552 }
  0xc0   : > { %v558_v57 = vsel %vm556_vm7, %v551_v54, %v553_v55 }
  0xc1   : > { %633 = vrot.lane.b32.xlu0 %v558_v57, %s9705_s23 }
  0xc3   : > { %v555_v58 = vpop.permute.xlu0 %554  ;;  %v549_v59 = vpop.permute.xlu1 %548 }
  0xc4   : > { %v559_v60 = vsel %vm556_vm7, %v553_v55, %v555_v58  ;;  %v557_v61 = vsel %vm556_vm7, %v549_v59, %v551_v54 }
  0xc5   : > { %635 = vrot.lane.b32.xlu1 %v559_v60, %s9705_s23  ;;  %631 = vrot.lane.b32.xlu0 %v557_v61, %s9705_s23 }
  0xc7   : > { %v570_v62 = vpop.permute.xlu0 %569  ;;  %v9902_v63 = vpop.permute.xlu1 %571 }
  0xc8   : > { %v641_v1 = vsel %vm639_vm8, %v570_v62, %v9902_v63 }
  0xc9   : > { %581 = vrot.lane.b32.xlu1 %v9838_v5, %s9705_s23  ;;  %597 = vrot.lane.b32.xlu0 %v9854_v19, %s9705_s23  ;;  %v707_v2 = vand.u32 4294901760, %v641_v1 }
  0xcb   : > { %v568_v0 = vpop.permute.xlu0 %567  ;;  %v9909_v5 = vsub.f32 %v641_v1, %v707_v2 }
  0xcc   : > { %v640_v3 = vsel %vm639_vm8, %v568_v0, %v570_v62  ;;  %v561_v0 = vld [vmem:[%s12564_s3] sm:$0xff] }
  0xcd   : > { %589 = vrot.lane.b32.xlu1 %v9849_v15, %s9705_s23  ;;  %613 = vrot.lane.b32.xlu0 %v519_v33, %s9705_s23  ;;  %v709_v6 = vand.u32 4294901760, %v640_v3  ;;  %v803_v7 = vand.u32 4294901760, %v9909_v5 }
  0xcf   : > { %v9907_v4 = vpop.permute.xlu0 %573  ;;  %v9914_v10 = vsub.f32 %v640_v3, %v709_v6  ;;  %v804_v13 = vsub.f32 %v9909_v5, %v803_v7 }
  0xd1   : > { %605 = vrot.lane.b32.xlu1 %v507_v29, %s9705_s23  ;;  %629 = vrot.lane.b32.xlu0 %v543_v47, %s9705_s23  ;;  %v809_v18 = vand.u32 4294901760, %v9914_v10  ;;  %v805_v22 = vand.u32 4294901760, %v804_v13 }
  0xd3   : > { %v810_v30 = vsub.f32 %v9914_v10, %v809_v18 }
  0xd5   : > { %621 = vrot.lane.b32.xlu1 %v531_v43, %s9705_s23  ;;  %v811_v43 = vand.u32 4294901760, %v810_v30 }
  0xd9   : > { %637 = vrot.lane.b32.xlu1 %v555_v58, %s9705_s23 }
  0xff   : > { %v578_v8 = vpop.permute.xlu0 %577  ;;  %v9912_v9 = vpop.permute.xlu1 %579 }
 0x100   : > { %v644_v11 = vsel %vm639_vm8, %v578_v8, %v9912_v9 }
 0x101   : > { %v711_v12 = vand.u32 4294901760, %v644_v11 }
 0x103   : > { %v9919_v14 = vsub.f32 %v644_v11, %v711_v12  ;;  %v576_v15 = vpop.permute.xlu1 %575  ;;  %v9921_v16 = vpack.c.bf16 %v711_v12, %v707_v2  ;;  %v586_v23 = vpop.permute.xlu0 %585 }
 0x104   : > { %v643_v17 = vsel %vm639_vm8, %v576_v15, %v578_v8 }
 0x105   : > { %v713_v19 = vand.u32 4294901760, %v643_v17  ;;  %8647 = vmatprep.subr.bf16.mxu1 %v9921_v16  ;;  %v815_v20 = vand.u32 4294901760, %v9919_v14 }
 0x107   : > { %v9929_v24 = vsub.f32 %v643_v17, %v713_v19  ;;  %v9931_v25 = vpop.permute.xlu1 %587  ;;  %v9933_v26 = vpack.c.bf16 %v713_v19, %v709_v6  ;;  %v816_v27 = vsub.f32 %v9919_v14, %v815_v20  ;;  %v9936_v28 = vpack.c.bf16 %v815_v20, %v803_v7 }
 0x108   : > { %v647_v29 = vsel %vm639_vm8, %v586_v23, %v9931_v25  ;;  %v9707_v7 = vmov 0  }
 0x109   : > { %12760 = vst [vmem:[#allocation3_spill] sm:$0xff] %v9936_v28  ;;  %v715_v32 = vand.u32 4294901760, %v647_v29  ;;  %8649 = vmatpush1.bf16.msra.mxu1 %v9933_v26  ;;  %v817_v33 = vand.u32 4294901760, %v816_v27  ;;  %v821_v34 = vand.u32 4294901760, %v9929_v24  ;;  %9687 = vset.pattern.permute.xlu0 %v9707_v7 }
 0x10a   : > { %564 = vperm.xlu0 %9687, %v561_v0   ;;  %9688 = vset.pattern.permute.xlu1 %v9707_v7 }
 0x10b   : > { %v9945_v35 = vsub.f32 %v647_v29, %v715_v32  ;;  %v594_v36 = vpop.permute.xlu0 %593  ;;  %v9947_v37 = vpop.permute.xlu1 %595  ;;  %v8662_v38 = vpack.c.bf16 %v817_v33, %v805_v22  ;;  %v822_v39 = vsub.f32 %v9929_v24, %v821_v34  ;;  %v9950_v40 = vpack.c.bf16 %v821_v34, %v809_v18 }
 0x10c   : > { %v650_v41 = vsel %vm639_vm8, %v594_v36, %v9947_v37 }
 0x10d   : > { %12761 = vst [vmem:[#allocation4_spill] sm:$0xff] %v9950_v40  ;;  %v719_v42 = vand.u32 4294901760, %v650_v41  ;;  %8663 = vmatprep.subr.bf16.mxu0 %v8662_v38  ;;  %v823_v44 = vand.u32 4294901760, %v822_v39  ;;  %v827_v45 = vand.u32 4294901760, %v9945_v35 }
 0x10f   : > { %v9955_v46 = vsub.f32 %v650_v41, %v719_v42  ;;  %v584_v47 = vpop.permute.xlu0 %583  ;;  %v592_v48 = vpop.permute.xlu1 %591  ;;  %v9957_v49 = vpack.c.bf16 %v719_v42, %v715_v32  ;;  %v8664_v50 = vpack.c.bf16 %v823_v44, %v811_v43  ;;  %v828_v55 = vsub.f32 %v9945_v35, %v827_v45 }
 0x110   : > { %v646_v51 = vsel %vm639_vm8, %v584_v47, %v586_v23  ;;  %v649_v52 = vsel %vm639_vm8, %v592_v48, %v594_v36 }
 0x111   : > { %v717_v53 = vand.u32 4294901760, %v646_v51  ;;  %v721_v54 = vand.u32 4294901760, %v649_v52  ;;  %8651 = vmatprep.subr.bf16.mxu1 %v9957_v49  ;;  %8665 = vmatpush1.bf16.msra.mxu0 %v8664_v50  ;;  %v839_v57 = vand.u32 4294901760, %v9955_v46  ;;  %v829_v3 = vand.u32 4294901760, %v828_v55  ;;  %v560_v50 = vld [vmem:[%s12563_s2] sm:$0xff] }
 0x112   : > { %v705_v55 = vsel %vm703_vm9, %v560_v50, 0  ;;  %v1380_v50 = vand.u32 4294901760, %v9907_v4 }
 0x113   : > { %v9964_v58 = vsub.f32 %v646_v51, %v717_v53  ;;  %v9966_v59 = vsub.f32 %v649_v52, %v721_v54  ;;  %v9968_v60 = vpack.c.bf16 %v721_v54, %v717_v53  ;;  %v840_v61 = vsub.f32 %v9955_v46, %v839_v57  ;;  %v602_v8 = vpop.permute.xlu0 %601 }
 0x114   : > { %v9971_v62 = vpack.c.bf16 %v839_v57, %v827_v45 }
 0x115   : > { %v833_v1 = vand.u32 4294901760, %v9964_v58  ;;  %v845_v2 = vand.u32 4294901760, %v9966_v59  ;;  %8653 = vmatpush1.bf16.msra.mxu1 %v9968_v60  ;;  %v841_v6 = vand.u32 4294901760, %v840_v61 }
 0x116   : > { %12762 = vst [vmem:[#allocation5_spill] sm:$0xff] %v9971_v62 }
 0x117   : > { %v9979_v11 = vpop.permute.xlu1 %603  ;;  %v8666_v12 = vpack.c.bf16 %v841_v6, %v829_v3  ;;  %v834_v13 = vsub.f32 %v9964_v58, %v833_v1  ;;  %v846_v15 = vsub.f32 %v9966_v59, %v845_v2  ;;  %v9983_v17 = vpack.c.bf16 %v845_v2, %v833_v1 }
 0x118   : > { %v653_v18 = vsel %vm639_vm8, %v602_v8, %v9979_v11 }
 0x119   : > { %12763 = vst [vmem:[#allocation6_spill] sm:$0xff] %v9983_v17  ;;  %v723_v19 = vand.u32 4294901760, %v653_v18  ;;  %8667 = vmatprep.subr.bf16.mxu0 %v8666_v12  ;;  %v835_v20 = vand.u32 4294901760, %v834_v13  ;;  %v847_v22 = vand.u32 4294901760, %v846_v15 }
 0x11b   : > { %v9987_v23 = vsub.f32 %v653_v18, %v723_v19  ;;  %v610_v27 = vpop.permute.xlu0 %609  ;;  %v9989_v29 = vpop.permute.xlu1 %611  ;;  %v8668_v30 = vpack.c.bf16 %v847_v22, %v835_v20  ;;  %v10027_v18 = vand.u32 4294901760, %v705_v55 }
 0x11c   : > { %v656_v32 = vsel %vm639_vm8, %v610_v27, %v9989_v29 }
 0x11d   : > { %v727_v33 = vand.u32 4294901760, %v656_v32  ;;  %8669 = vmatpush1.bf16.msra.mxu0 %v8668_v30  ;;  %v851_v34 = vand.u32 4294901760, %v9987_v23 }
 0x11f   : > { %v9994_v36 = vsub.f32 %v656_v32, %v727_v33  ;;  %v600_v38 = vpop.permute.xlu0 %599  ;;  %v608_v39 = vpop.permute.xlu1 %607  ;;  %v9996_v41 = vpack.c.bf16 %v727_v33, %v723_v19  ;;  %v852_v47 = vsub.f32 %v9987_v23, %v851_v34 }
 0x120   : > { %v652_v42 = vsel %vm639_vm8, %v600_v38, %v602_v8  ;;  %v655_v43 = vsel %vm639_vm8, %v608_v39, %v610_v27  ;;  %v10036_v38 = vsub.f32 %v705_v55, %v10027_v18 }
 0x121   : > { %v725_v44 = vand.u32 4294901760, %v652_v42  ;;  %v729_v45 = vand.u32 4294901760, %v655_v43  ;;  %8655 = vmatprep.subr.bf16.mxu1 %v9996_v41  ;;  %v863_v48 = vand.u32 4294901760, %v9994_v36  ;;  %v853_v1 = vand.u32 4294901760, %v852_v47 }
 0x123   : > { %v10006_v51 = vsub.f32 %v652_v42, %v725_v44  ;;  %v10008_v52 = vsub.f32 %v655_v43, %v729_v45  ;;  %v10010_v53 = vpack.c.bf16 %v729_v45, %v725_v44  ;;  %v864_v54 = vsub.f32 %v9994_v36, %v863_v48  ;;  %v618_v3 = vpop.permute.xlu0 %617 }
 0x124   : > { %v10014_v57 = vpack.c.bf16 %v863_v48, %v851_v34  ;;  %v10042_v43 = vsel %vm639_vm8, %v9902_v63, %v9907_v4 }
 0x125   : > { %v857_v61 = vand.u32 4294901760, %v10006_v51  ;;  %v869_v0 = vand.u32 4294901760, %v10008_v52  ;;  %8657 = vmatpush1.bf16.msra.mxu1 %v10010_v53  ;;  %v865_v2 = vand.u32 4294901760, %v864_v54 }
 0x126   : > { %12764 = vst [vmem:[#allocation7_spill] sm:$0xff] %v10014_v57 }
 0x127   : > { %v10019_v6 = vpop.permute.xlu1 %619  ;;  %v8670_v7 = vpack.c.bf16 %v865_v2, %v853_v1  ;;  %v858_v8 = vsub.f32 %v10006_v51, %v857_v61  ;;  %v870_v12 = vsub.f32 %v10008_v52, %v869_v0  ;;  %v10023_v13 = vpack.c.bf16 %v869_v0, %v857_v61 }
 0x128   : > { %v659_v15 = vsel %vm639_vm8, %v618_v3, %v10019_v6  ;;  %v10052_v61 = vand.u32 4294901760, %v10036_v38 }
 0x129   : > { %12765 = vst [vmem:[#allocation8_spill] sm:$0xff] %v10023_v13  ;;  %v731_v19 = vand.u32 4294901760, %v659_v15  ;;  %8671 = vmatprep.subr.bf16.mxu0 %v8670_v7  ;;  %v859_v20 = vand.u32 4294901760, %v858_v8  ;;  %v871_v22 = vand.u32 4294901760, %v870_v12  ;;  %v1382_v7 = vand.u32 4294901760, %v10042_v43 }
 0x12a   : > { %12766 = vst [vmem:[#allocation9_spill] sm:$0xff] %v10052_v61 }
 0x12b   : > { %v10029_v27 = vsub.f32 %v659_v15, %v731_v19  ;;  %v626_v30 = vpop.permute.xlu0 %625  ;;  %v10031_v32 = vpop.permute.xlu1 %627  ;;  %v8672_v33 = vpack.c.bf16 %v871_v22, %v859_v20  ;;  %v10066_v20 = vsub.f32 %v9907_v4, %v1380_v50  ;;  %v793_v22 = vsub.f32 %v10036_v38, %v10052_v61 }
 0x12c   : > { %v662_v34 = vsel %vm639_vm8, %v626_v30, %v10031_v32 }
 0x12d   : > { %v735_v39 = vand.u32 4294901760, %v662_v34  ;;  %8673 = vmatpush1.bf16.msra.mxu0 %v8672_v33  ;;  %v875_v42 = vand.u32 4294901760, %v10029_v27 }
 0x12f   : > { %v10044_v44 = vsub.f32 %v662_v34, %v735_v39  ;;  %v616_v45 = vpop.permute.xlu0 %615  ;;  %v624_v47 = vpop.permute.xlu1 %623  ;;  %v10046_v48 = vpack.c.bf16 %v735_v39, %v731_v19  ;;  %v876_v63 = vsub.f32 %v10029_v27, %v875_v42 }
 0x130   : > { %v658_v54 = vsel %vm639_vm8, %v616_v45, %v618_v3  ;;  %v661_v55 = vsel %vm639_vm8, %v624_v47, %v626_v30  ;;  %v10076_v47 = vsub.f32 %v10042_v43, %v1382_v7 }
 0x131   : > { %v733_v0 = vand.u32 4294901760, %v658_v54  ;;  %v737_v1 = vand.u32 4294901760, %v661_v55  ;;  %8659 = vmatprep.subr.bf16.mxu1 %v10046_v48  ;;  %v887_v2 = vand.u32 4294901760, %v10044_v44  ;;  %v877_v39 = vand.u32 4294901760, %v876_v63 }
 0x132   : > { %v10087_v63 = vand.u32 4294901760, %v793_v22  ;;  %v12577_v56 = vand.u32 4294901760, %v10076_v47 }
 0x133   : > { %v10058_v8 = vsub.f32 %v658_v54, %v733_v0  ;;  %v10060_v12 = vsub.f32 %v661_v55, %v737_v1  ;;  %v634_v3 = vpop.permute.xlu0 %633  ;;  %v10062_v15 = vpack.c.bf16 %v737_v1, %v733_v0  ;;  %v888_v19 = vsub.f32 %v10044_v44, %v887_v2 }
 0x134   : > { %v10070_v30 = vpack.c.bf16 %v887_v2, %v875_v42 }
 0x135   : > { %12767 = vst [vmem:[#allocation10_spill] sm:$0xff] %v10062_v15  ;;  %v881_v33 = vand.u32 4294901760, %v10058_v8  ;;  %v893_v34 = vand.u32 4294901760, %v10060_v12  ;;  %8661 = vmatpush1.bf16.msra.mxu1 %v10062_v15  ;;  %v889_v45 = vand.u32 4294901760, %v888_v19 }
 0x136   : > { %12768 = vst [vmem:[#allocation11_spill] sm:$0xff] %v10070_v30 }
 0x137   : > { %v632_v54 = vpop.permute.xlu0 %631  ;;  %v10078_v55 = vpop.permute.xlu1 %635  ;;  %v8674_v4 = vpack.c.bf16 %v889_v45, %v877_v39  ;;  %v882_v0 = vsub.f32 %v10058_v8, %v881_v33  ;;  %v894_v42 = vsub.f32 %v10060_v12, %v893_v34  ;;  %v10082_v1 = vpack.c.bf16 %v893_v34, %v881_v33 }
 0x138   : > { %v664_v2 = vsel %vm639_vm8, %v632_v54, %v634_v3  ;;  %v665_v31 = vsel %vm639_vm8, %v634_v3, %v10078_v55 }
 0x139   : > { %12769 = vst [vmem:[#allocation12_spill] sm:$0xff] %v10082_v1  ;;  %v10090_v19 = vand.u32 4294901760, %v664_v2  ;;  %v10092_v21 = vand.u32 4294901760, %v665_v31  ;;  %8675 = vmatprep.subr.bf16.mxu0 %v8674_v4  ;;  %v883_v39 = vand.u32 4294901760, %v882_v0  ;;  %v895_v45 = vand.u32 4294901760, %v894_v42 }
 0x13a   : > { %v12772_v4 = vand.u32 4294901760, %v10066_v20 }
 0x13b   : > { %12770 = vst [vmem:[#allocation13_spill] sm:$0xff] %v10090_v19  ;;  %12771 = vst [vmem:[#allocation14_spill] sm:$0xff] %v10092_v21  ;;  %v10096_v33 = vsub.f32 %v664_v2, %v10090_v19  ;;  %v10099_v34 = vsub.f32 %v665_v31, %v10092_v21  ;;  %v598_v3 = vpop.permute.xlu0 %597  ;;  %740 = vmatprep.subr.mxu1 %v10092_v21  ;;  %v582_v22 = vpop.permute.xlu1 %581  ;;  %v8676_v54 = vpack.c.bf16 %v895_v45, %v883_v39  ;;  %v12774_v45 = vmov 0.0  }
 0x13c   : > { %v645_v43 = vsel %vm639_vm8, %v9912_v9, %v582_v22  ;;  %v1384_v1 = vand.u32 4294901760, %v582_v22  ;;  %742 = vmatpush1.msra.mxu1 %v10090_v19  ;;  %v10108_v0 = vsub.f32 %v10066_v20, %v12772_v4  ;;  %v651_v2 = vsel %vm639_vm8, %v9947_v37, %v598_v3 }
 0x13d   : > { %v1386_v42 = vand.u32 4294901760, %v645_v43  ;;  %8677 = vmatpush1.bf16.msra.mxu0 %v8676_v54  ;;  %795 = vmatmul.mubr.f32.vlgmr.msra.gmra.mrb[0].mxu1 %v10087_v63  ;;  %v12578_v31 = vand.u32 4294901760, %v10099_v34  ;;  %v10121_v4 = vsub.f32 %v10076_v47, %v12577_v56  ;;  %v8682_v9 = vpack.c.bf16 %v9955_v46, %v9945_v35 }
 0x13e   : > { %v10114_v39 = vpack.c.bf16 %v1384_v1, %v1380_v50  ;;  %1462 = vmatprep.mubr.f32.mxu1 %v12774_v45  ;;  %v1394_v62 = vand.u32 4294901760, %v651_v2  ;;  %v12776_v61 = vand.u32 4294901760, %v10096_v33  ;;  %v10144_v46 = vsub.f32 %v582_v22, %v1384_v1 }
 0x13f   : > { %v614_v30 = vpop.permute.xlu0 %613  ;;  %v590_v54 = vpop.permute.xlu1 %589  ;;  %v10123_v13 = vpack.c.bf16 %v1386_v42, %v1382_v7  ;;  %v900_v57 = vsub.f32 %v10099_v34, %v12578_v31  ;;  %v1392_v7 = vand.u32 4294901760, %v598_v3  ;;  %v10146_v56 = vsub.f32 %v645_v43, %v1386_v42 }
 0x140   : > { %12773 = vst [vmem:[#allocation15_spill] sm:$0xff] %v10114_v39  ;;  %v648_v37 = vsel %vm639_vm8, %v9931_v25, %v590_v54  ;;  %v1388_v50 = vand.u32 4294901760, %v590_v54  ;;  %8743 = vmatprep.subr.bf16.mxu1 %v10114_v39  ;;  %v657_v31 = vsel %vm639_vm8, %v9989_v29, %v614_v30  ;;  %v906_v39 = vsub.f32 %v10096_v33, %v12776_v61 }
 0x141   : > { %12775 = vst [vmem:[#allocation16_spill] sm:$0xff] %v10123_v13  ;;  %v1390_v40 = vand.u32 4294901760, %v648_v37  ;;  %8745 = vmatpush1.bf16.msra.mxu1 %v10123_v13  ;;  %v901_v25 = vand.u32 4294901760, %v900_v57  ;;  %v1400_v21 = vand.u32 4294901760, %v614_v30  ;;  %v10158_v22 = vsub.f32 %v598_v3, %v1392_v7 }
 0x142   : > { %v10148_v19 = vpack.c.bf16 %v1392_v7, %v1388_v50  ;;  %v10152_v29 = vsub.f32 %v590_v54, %v1388_v50  ;;  %v1402_v43 = vand.u32 4294901760, %v657_v31  ;;  %v10161_v35 = vsub.f32 %v651_v2, %v1394_v62 }
 0x143   : > { %v630_v17 = vpop.permute.xlu0 %629  ;;  %v606_v28 = vpop.permute.xlu1 %605  ;;  %v10150_v13 = vpack.c.bf16 %v1394_v62, %v1390_v40  ;;  %902 = vmatprep.subr.mxu0 %v901_v25  ;;  %v907_v50 = vand.u32 4294901760, %v906_v39  ;;  %v10169_v15 = vsub.f32 %v648_v37, %v1390_v40  ;;  %v12595_v1 = vand.u32 4294901760, %v10144_v46 }
 0x144   : > { %12777 = vst [vmem:[#allocation17_spill] sm:$0xff] %v10148_v19  ;;  %v654_v57 = vsel %vm639_vm8, %v9979_v11, %v606_v28  ;;  %v1396_v61 = vand.u32 4294901760, %v606_v28  ;;  %8747 = vmatprep.subr.bf16.mxu1 %v10148_v19  ;;  %v663_v54 = vsel %vm639_vm8, %v10031_v32, %v630_v17  ;;  %v1408_v19 = vand.u32 4294901760, %v630_v17 }
 0x145   : > { %12778 = vst [vmem:[#allocation18_spill] sm:$0xff] %v10150_v13  ;;  %v1398_v42 = vand.u32 4294901760, %v654_v57  ;;  %8749 = vmatpush1.bf16.msra.mxu1 %v10150_v13  ;;  %908 = vmatpush1.msra.mxu0 %v907_v50  ;;  %v10178_v39 = vsub.f32 %v614_v30, %v1400_v21  ;;  %v1410_v11 = vand.u32 4294901760, %v663_v54  ;;  %v12779_v40 = vpack.c.bf16 %v9919_v14, %v9909_v5 }
 0x146   : > { %v10166_v25 = vpack.c.bf16 %v1400_v21, %v1396_v61  ;;  %957 = vmatmul.mubr.f32.vlgmr.msra.gmra.mrb[0].mxu0 %v10027_v18  ;;  %v1489_v50 = vsub.f32 %v10144_v46, %v12595_v1  ;;  %v12780_v21 = vpack.c.bf16 %v9929_v24, %v9914_v10  ;;  %v1484_v5 = vand.u32 4294901760, %v10121_v4 }
 0x147   : > { %v622_v3 = vpop.permute.xlu1 %621  ;;  %v10171_v7 = vpack.c.bf16 %v1402_v43, %v1398_v42  ;;  %8679 = vmatprep.subr.bf16.mxu0 %v12779_v40  ;;  %v10189_v13 = vsub.f32 %v654_v57, %v1398_v42  ;;  %1063 = vmatprep.mubr.f32.mxu0 %v12774_v45  ;;  %v10206_v10 = vsub.f32 %v657_v31, %v1402_v43  ;;  %v12782_v4 = vand.u32 4294901760, %v10152_v29 }
 0x148   : > { %v660_v62 = vsel %vm639_vm8, %v10019_v6, %v622_v3  ;;  %v1404_v32 = vand.u32 4294901760, %v622_v3  ;;  %8751 = vmatprep.subr.bf16.mxu1 %v10166_v25  ;;  %v10187_v6 = vsub.f32 %v606_v28, %v1396_v61  ;;  %8681 = vmatpush1.bf16.msra.mxu0 %v12780_v21  ;;  %v12781_v28 = vand.u32 4294901760, %v10146_v56 }
 0x149   : > { %v1406_v37 = vand.u32 4294901760, %v660_v62  ;;  %8753 = vmatpush1.bf16.msra.mxu1 %v10171_v7  ;;  %8683 = vmatprep.subr.bf16.mxu0 %v8682_v9  ;;  %v8690_v9 = vpack.c.bf16 %v10044_v44, %v10029_v27  ;;  %v1501_v42 = vsub.f32 %v10152_v29, %v12782_v4  ;;  %v1518_v21 = vand.u32 4294901760, %v10161_v35 }
 0x14a   : > { %v10195_v30 = vpack.c.bf16 %v1408_v19, %v1404_v32  ;;  %v1495_v57 = vsub.f32 %v10146_v56, %v12781_v28  ;;  %v10217_v28 = vsub.f32 %v622_v3, %v1404_v32  ;;  %v1490_v31 = vand.u32 4294901760, %v1489_v50 }
 0x14b   : > { %v638_v40 = vpop.permute.xlu1 %637  ;;  %v10199_v2 = vpack.c.bf16 %v1410_v11, %v1406_v37  ;;  %v10221_v43 = vsub.f32 %v630_v17, %v1408_v19  ;;  %v1530_v14 = vand.u32 4294901760, %v10189_v13  ;;  %v12783_v61 = vpack.c.bf16 %v9966_v59, %v9964_v58 }
 0x14c   : > { %v10208_v24 = vand.u32 4294901760, %v638_v40  ;;  %8755 = vmatprep.subr.bf16.mxu1 %v10195_v30  ;;  %v666_v1 = vsel %vm639_vm8, %v10078_v55, %v638_v40  ;;  %v12784_v27 = vand.u32 4294901760, %v10158_v22  ;;  %v1524_v3 = vand.u32 4294901760, %v10187_v6 }
 0x14d   : > { %8685 = vmatpush1.bf16.msra.mxu0 %v12783_v61  ;;  %8757 = vmatpush1.bf16.msra.mxu1 %v10199_v2  ;;  %v10232_v32 = vsub.f32 %v660_v62, %v1406_v37  ;;  %v12785_v17 = vpack.c.bf16 %v9994_v36, %v9987_v23  ;;  %v1496_v55 = vand.u32 4294901760, %v1495_v57  ;;  %v12786_v58 = vand.u32 4294901760, %v10169_v15 }
 0x14e   : > { %v1513_v44 = vsub.f32 %v10158_v22, %v12784_v27  ;;  %1413 = vmatprep.subr.mxu1 %v10208_v24  ;;  %v1536_v19 = vand.u32 4294901760, %v10178_v39  ;;  %v1542_v50 = vand.u32 4294901760, %v10206_v10  ;;  %v10243_v61 = vand.u32 4294901760, %v666_v1 }
 0x14f   : > { %8687 = vmatprep.subr.bf16.mxu0 %v12785_v17  ;;  %v1507_v59 = vsub.f32 %v10169_v15, %v12786_v58  ;;  %v1502_v4 = vand.u32 4294901760, %v1501_v42  ;;  %v1525_v62 = vsub.f32 %v10187_v6, %v1524_v3  ;;  %v10248_v23 = vsub.f32 %v663_v54, %v1410_v11 }
 0x150   : > { %v12787_v36 = vand.u32 4294901760, %v10108_v0  ;;  %v1519_v57 = vsub.f32 %v10161_v35, %v1518_v21  ;;  %v1548_v27 = vand.u32 4294901760, %v10217_v28  ;;  %v8692_v17 = vpack.c.bf16 %v10060_v12, %v10058_v8 }
 0x151   : > { %v12788_v42 = vpack.c.bf16 %v10008_v52, %v10006_v51  ;;  %1415 = vmatpush1.msra.mxu1 %v10243_v61  ;;  %v1514_v54 = vand.u32 4294901760, %v1513_v44  ;;  %v1537_v0 = vsub.f32 %v10178_v39, %v1536_v19  ;;  %v1560_v11 = vand.u32 4294901760, %v10221_v43 }
 0x152   : > { %v8758_v37 = vpack.c.bf16 %v1490_v31, %v12787_v36  ;;  %v1554_v31 = vand.u32 4294901760, %v10232_v32  ;;  %v8760_v58 = vpack.c.bf16 %v1496_v55, %v1484_v5  ;;  %v1508_v36 = vand.u32 4294901760, %v1507_v59  ;;  %1468 = vmatmul.mubr.f32.vlgmr.msra.gmra.mrb[2].mxu1 %v10087_v63 }
 0x153   : > { %8689 = vmatpush1.bf16.msra.mxu0 %v12788_v42  ;;  %v1531_v51 = vsub.f32 %v10189_v13, %v1530_v14  ;;  %v10271_v52 = vsub.f32 %v638_v40, %v10208_v24  ;;  %v8762_v8 = vpack.c.bf16 %v1514_v54, %v1502_v4  ;;  %v1526_v12 = vand.u32 4294901760, %v1525_v62  ;;  %1628 = vmatprep.mubr.f32.mxu1 %v12774_v45 }
 0x154   : > { %8691 = vmatprep.subr.bf16.mxu0 %v8690_v9  ;;  %8759 = vmatprep.subr.bf16.mxu1 %v8758_v37  ;;  %v1549_v44 = vsub.f32 %v10217_v28, %v1548_v27  ;;  %v1566_v9 = vand.u32 4294901760, %v10248_v23  ;;  %v1520_v5 = vand.u32 4294901760, %v1519_v57  ;;  %v1543_v55 = vsub.f32 %v10206_v10, %v1542_v50 }
 0x155   : > { %8761 = vmatpush1.bf16.msra.mxu1 %v8760_v58  ;;  %v1538_v40 = vand.u32 4294901760, %v1537_v0  ;;  %v1561_v63 = vsub.f32 %v10221_v43, %v1560_v11  ;;  %v10286_v59 = vsub.f32 %v666_v1, %v10243_v61  ;;  %v1532_v62 = vand.u32 4294901760, %v1531_v51 }
 0x156   : > { %8763 = vmatprep.subr.bf16.mxu1 %v8762_v8  ;;  %v8764_v4 = vpack.c.bf16 %v1520_v5, %v1508_v36  ;;  %v1555_v37 = vsub.f32 %v10232_v32, %v1554_v31  ;;  %v1550_v42 = vand.u32 4294901760, %v1549_v44  ;;  %v1544_v54 = vand.u32 4294901760, %v1543_v55 }
 0x157   : > { %8693 = vmatpush1.bf16.msra.mxu0 %v8692_v17  ;;  %v8766_v57 = vpack.c.bf16 %v1538_v40, %v1526_v12  ;;  %v1572_v17 = vand.u32 4294901760, %v10271_v52  ;;  %v1567_v0 = vsub.f32 %v10248_v23, %v1566_v9  ;;  %v1562_v1 = vand.u32 4294901760, %v1561_v63 }
 0x158   : > { %1013 = vmatprep.subr.mxu0 %v10099_v34  ;;  %v8768_v58 = vpack.c.bf16 %v1544_v54, %v1532_v62  ;;  %v1556_v36 = vand.u32 4294901760, %v1555_v37  ;;  %v1578_v51 = vand.u32 4294901760, %v10286_v59  ;;  %v8776_v62 = vpack.c.bf16 %v10146_v56, %v10076_v47 }
 0x159   : > { %8765 = vmatpush1.bf16.msra.mxu1 %v8764_v4  ;;  %v8770_v8 = vpack.c.bf16 %v1562_v1, %v1550_v42  ;;  %v1573_v12 = vsub.f32 %v10271_v52, %v1572_v17  ;;  %v1568_v44 = vand.u32 4294901760, %v1567_v0  ;;  %v8774_v4 = vpack.c.bf16 %v10144_v46, %v10066_v20  ;;  %v12790_v42 = vld [vmem:[#allocation14_spill] sm:$0xff]  ;;  %v12791_v1 = vld [vmem:[#allocation13_spill] sm:$0xff] }
 0x15a   : > { %8767 = vmatprep.subr.bf16.mxu1 %v8766_v57  ;;  %v1579_v55 = vsub.f32 %v10286_v59, %v1578_v51  ;;  %v8778_v37 = vpack.c.bf16 %v10158_v22, %v10152_v29  ;;  %v12789_v57 = vld [vmem:[#allocation10_spill] sm:$0xff]  ;;  %v8780_v54 = vpack.c.bf16 %v10161_v35, %v10169_v15  ;;  %v8782_v0 = vpack.c.bf16 %v10178_v39, %v10187_v6 }
 0x15b   : > { %1016 = vmatpush1.msra.mxu0 %v10096_v33  ;;  %v8772_v5 = vpack.c.bf16 %v1568_v44, %v1556_v36  ;;  %v1574_v40 = vand.u32 4294901760, %v1573_v12  ;;  %v12793_v36 = vld [vmem:[#allocation9_spill] sm:$0xff]  ;;  %v12794_v12 = vld [vmem:[#allocation4_spill] sm:$0xff]  ;;  %v8786_v44 = vpack.c.bf16 %v10221_v43, %v10217_v28  ;;  %v8820_v35 = vpack.c.bf16 %v1566_v9, %v1554_v31 }
 0x15c   : > { %8695 = vmatprep.subr.bf16.mxu0 %v9921_v16  ;;  %1066 = vmatmul.mubr.f32.vlgmr.msra.gmra.mrb[0].mxu0 %v10036_v38  ;;  %v1580_v63 = vand.u32 4294901760, %v1579_v55  ;;  %v8788_v55 = vpack.c.bf16 %v10248_v23, %v10232_v32 }
 0x15d   : > { %8697 = vmatpush1.bf16.msra.mxu0 %v9933_v26  ;;  %1154 = vmatprep.mubr.f32.mxu0 %v12774_v45 }
 0x15e   : > { %8699 = vmatprep.subr.bf16.mxu0 %v9957_v49  ;;  %8769 = vmatpush1.bf16.msra.mxu1 %v8768_v58  ;;  %v12792_v58 = vld [vmem:[#allocation3_spill] sm:$0xff] }
 0x15f   : > { %8771 = vmatprep.subr.bf16.mxu1 %v8770_v8  ;;  %v8784_v8 = vpack.c.bf16 %v10206_v10, %v10189_v13 }
 0x161   : > { %8701 = vmatpush1.bf16.msra.mxu0 %v9968_v60 }
 0x162   : > { %8703 = vmatprep.subr.bf16.mxu0 %v9996_v41  ;;  %8773 = vmatpush1.bf16.msra.mxu1 %v8772_v5  ;;  %v12795_v5 = vld [vmem:[#allocation5_spill] sm:$0xff] }
 0x163   : > { %1575 = vmatprep.subr.mxu1 %v1574_v40  ;;  %v12796_v40 = vld [vmem:[#allocation6_spill] sm:$0xff] }
 0x165   : > { %8705 = vmatpush1.bf16.msra.mxu0 %v10010_v53 }
 0x166   : > { %8707 = vmatprep.subr.bf16.mxu0 %v10046_v48  ;;  %1581 = vmatpush1.msra.mxu1 %v1580_v63  ;;  %v12797_v63 = vld [vmem:[#allocation7_spill] sm:$0xff] }
 0x167   : > { %8775 = vmatprep.subr.bf16.mxu1 %v8774_v4  ;;  %1630 = vmatmul.mubr.f32.vlgmr.msra.gmra.mrb[2].mxu1 %v10027_v18  ;;  %v12798_v4 = vld [vmem:[#allocation8_spill] sm:$0xff] }
 0x168   : > { %8777 = vmatpush1.bf16.msra.mxu1 %v8776_v62  ;;  %1736 = vmatprep.mubr.f32.mxu1 %v12774_v45  ;;  %v12799_v62 = vld [vmem:[#allocation11_spill] sm:$0xff] }
 0x169   : > { %8709 = vmatpush1.bf16.msra.mxu0 %v12789_v57  ;;  %8779 = vmatprep.subr.bf16.mxu1 %v8778_v37  ;;  %v12800_v37 = vld [vmem:[#allocation15_spill] sm:$0xff] }
 0x16a   : > { %1105 = vmatprep.subr.mxu0 %v12790_v42 }
 0x16c   : > { %8781 = vmatpush1.bf16.msra.mxu1 %v8780_v54  ;;  %v12801_v54 = vld [vmem:[#allocation16_spill] sm:$0xff] }
 0x16d   : > { %1107 = vmatpush1.msra.mxu0 %v12791_v1  ;;  %8783 = vmatprep.subr.bf16.mxu1 %v8782_v0  ;;  %v12802_v0 = vld [vmem:[#allocation12_spill] sm:$0xff] }
 0x16e   : > { %8711 = vmatprep.subr.bf16.mxu0 %v12792_v58  ;;  %1158 = vmatmul.mubr.f32.vlgmr.msra.gmra.mrb[0].mxu0 %v12793_v36  ;;  %v12803_v58 = vld [vmem:[#allocation17_spill] sm:$0xff] }
 0x16f   : > { %8713 = vmatpush1.bf16.msra.mxu0 %v12794_v12  ;;  %1282 = vmatprep.mubr.f32.mxu0 %v12774_v45  ;;  %v12805_v12 = vld [vmem:[#allocation18_spill] sm:$0xff] }
 0x170   : > { %8715 = vmatprep.subr.bf16.mxu0 %v12795_v5  ;;  %8785 = vmatpush1.bf16.msra.mxu1 %v8784_v8  ;;  %v12804_v8 = vand.u32 4294901760, %v10099_v34  ;;  %v8816_v34 = vpack.c.bf16 %v1542_v50, %v1530_v14 }
 0x171   : > { %8787 = vmatprep.subr.bf16.mxu1 %v8786_v44  ;;  %v12806_v44 = vand.u32 4294901760, %v10096_v33  ;;  %v12811_v33 = vand.u32 4294901760, %v10152_v29 }
 0x173   : > { %8717 = vmatpush1.bf16.msra.mxu0 %v12796_v40 }
 0x174   : > { %8719 = vmatprep.subr.bf16.mxu0 %v12797_v63  ;;  %8789 = vmatpush1.bf16.msra.mxu1 %v8788_v55 }
 0x175   : > { %1686 = vmatprep.subr.mxu1 %v10271_v52 }
 0x177   : > { %8721 = vmatpush1.bf16.msra.mxu0 %v12798_v4 }
 0x178   : > { %8723 = vmatprep.subr.bf16.mxu0 %v12799_v62  ;;  %1689 = vmatpush1.msra.mxu1 %v10286_v59 }
 0x179   : > { %8791 = vmatprep.subr.bf16.mxu1 %v12800_v37  ;;  %1739 = vmatmul.mubr.f32.vlgmr.msra.gmra.mrb[2].mxu1 %v10036_v38 }
 0x17a   : > { %8793 = vmatpush1.bf16.msra.mxu1 %v12801_v54  ;;  %1827 = vmatprep.mubr.f32.mxu1 %v12774_v45 }
 0x17b   : > { %8725 = vmatpush1.bf16.msra.mxu0 %v12802_v0  ;;  %8795 = vmatprep.subr.bf16.mxu1 %v12803_v58 }
 0x17c   : > { %1231 = vmatprep.subr.mxu0 %v12804_v8 }
 0x17e   : > { %8797 = vmatpush1.bf16.msra.mxu1 %v12805_v12 }
 0x17f   : > { %1235 = vmatpush1.msra.mxu0 %v12806_v44  ;;  %8799 = vmatprep.subr.bf16.mxu1 %v10166_v25 }
 0x180   : > { %8727 = vmatprep.subr.bf16.mxu0 %v9921_v16  ;;  %1284 = vmatmul.mubr.f32.vlgmr.msra.gmra.mrb[0].mxu0 %v10027_v18  ;;  %v12807_v16 = vand.u32 4294901760, %v10066_v20 }
 0x181   : > { %8729 = vmatpush1.bf16.msra.mxu0 %v9933_v26  ;;  %1372 = vmatprep.mubr.f32.mxu0 %v12774_v45  ;;  %v12808_v26 = vand.u32 4294901760, %v10144_v46 }
 0x182   : > { %8731 = vmatprep.subr.bf16.mxu0 %v9957_v49  ;;  %8801 = vmatpush1.bf16.msra.mxu1 %v10171_v7  ;;  %v12809_v49 = vand.u32 4294901760, %v10076_v47  ;;  %v8814_v47 = vpack.c.bf16 %v1536_v19, %v1524_v3 }
 0x183   : > { %8803 = vmatprep.subr.bf16.mxu1 %v10195_v30  ;;  %v8806_v38 = vpack.c.bf16 %v12808_v26, %v12807_v16 }
 0x185   : > { %8733 = vmatpush1.bf16.msra.mxu0 %v9968_v60  ;;  %v12810_v60 = vand.u32 4294901760, %v10146_v56 }
 0x186   : > { %8735 = vmatprep.subr.bf16.mxu0 %v9996_v41  ;;  %8805 = vmatpush1.bf16.msra.mxu1 %v10199_v2 }
 0x187   : > { %1778 = vmatprep.subr.mxu1 %v10208_v24  ;;  %v8808_v41 = vpack.c.bf16 %v12810_v60, %v12809_v49 }
 0x189   : > { %8737 = vmatpush1.bf16.msra.mxu0 %v10010_v53  ;;  %v12812_v53 = vand.u32 4294901760, %v10158_v22  ;;  %v565_v29 = vpop.permute.xlu0 %564 }
 0x18a   : > { %8739 = vmatprep.subr.bf16.mxu0 %v10046_v48  ;;  %1780 = vmatpush1.msra.mxu1 %v10243_v61  ;;  %v12813_v48 = vand.u32 4294901760, %v10169_v15  ;;  %v8818_v15 = vpack.c.bf16 %v1560_v11, %v1548_v27 }
 0x18b   : > { %8807 = vmatprep.subr.bf16.mxu1 %v8806_v38  ;;  %1831 = vmatmul.mubr.f32.vlgmr.msra.gmra.mrb[2].mxu1 %v12793_v36  ;;  %v8810_v20 = vpack.c.bf16 %v12812_v53, %v12811_v33 }
 0x18c   : > { %8809 = vmatpush1.bf16.msra.mxu1 %v8808_v41  ;;  %1955 = vmatprep.mubr.f32.mxu1 %v12774_v45  ;;  %v8812_v56 = vpack.c.bf16 %v1518_v21, %v12813_v48 }
 0x18d   : > { %8741 = vmatpush1.bf16.msra.mxu0 %v12789_v57  ;;  %8811 = vmatprep.subr.bf16.mxu1 %v8810_v20 }
 0x18e   : > { %1323 = vmatprep.subr.mxu0 %v12790_v42 }
 0x190   : > { %8813 = vmatpush1.bf16.msra.mxu1 %v8812_v56 }
 0x191   : > { %1325 = vmatpush1.msra.mxu0 %v12791_v1  ;;  %8815 = vmatprep.subr.bf16.mxu1 %v8814_v47 }
 0x192   : > { %1374 = vmatmul.mubr.f32.vlgmr.msra.gmra.mrb[0].mxu0 %v10027_v18 }
 0x193   : > { %2425 = vmatprep.mubr.f32.mxu0 %v12774_v45 }
 0x194   : > { %8817 = vmatpush1.bf16.msra.mxu1 %v8816_v34 }
 0x195   : > { %8819 = vmatprep.subr.bf16.mxu1 %v8818_v15 }
 0x198   : > { %8821 = vmatpush1.bf16.msra.mxu1 %v8820_v35 }
 0x199   : > { %1904 = vmatprep.subr.mxu1 %v1572_v17 }
 0x19c   : > { %1908 = vmatpush1.msra.mxu1 %v1578_v51 }
 0x19d   : > { %8823 = vmatprep.subr.bf16.mxu1 %v12800_v37  ;;  %1957 = vmatmul.mubr.f32.vlgmr.msra.gmra.mrb[2].mxu1 %v10027_v18 }
 0x19e   : > { %8825 = vmatpush1.bf16.msra.mxu1 %v12801_v54  ;;  %2045 = vmatprep.mubr.f32.mxu1 %v12774_v45 }
 0x19f   : > { %8827 = vmatprep.subr.bf16.mxu1 %v12803_v58 }
 0x1a2   : > { %8829 = vmatpush1.bf16.msra.mxu1 %v12805_v12 }
 0x1a3   : > { %8831 = vmatprep.subr.bf16.mxu1 %v10166_v25 }
 0x1a6   : > { %8833 = vmatpush1.bf16.msra.mxu1 %v10171_v7 }
 0x1a7   : > { %8835 = vmatprep.subr.bf16.mxu1 %v10195_v30  ;;  %v2105_v30 = vlaneseq }
 0x1aa   : > { %8837 = vmatpush1.bf16.msra.mxu1 %v10199_v2  ;;  %v2106_v2 = vshrl.u32 %v2105_v30, 7 }
 0x1ab   : > { %1996 = vmatprep.subr.mxu1 %v10208_v24 }
 0x1ac   : > { %v2119_v21 = vsub.s32 3, %v2106_v2  ;;  %v2111_v19 = vsub.s32 1, %v2106_v2  ;;  %v2115_v27 = vsub.s32 2, %v2106_v2 }
 0x1ae   : > { %1998 = vmatpush1.msra.mxu1 %v10243_v61  ;;  %v2107_v61 = vsub.s32 0, %v2106_v2 }
 0x1af   : > { %2047 = vmatmul.mubr.f32.vlgmr.msra.gmra.mrb[2].mxu1 %v10027_v18  ;;  %v2103_v18 = vld [vmem:[%s12567_s6] sm:$0xf] }
 0x1b0   : > { %v2120_v3 = vrot.slane %v2103_v18, %v2119_v21  ;;  %v2108_v11 = vrot.slane %v2103_v18, %v2107_v61  ;;  %v2112_v31 = vrot.slane %v2103_v18, %v2111_v19  ;;  %v2116_v9 = vrot.slane %v2103_v18, %v2115_v27 }
 0x210   : > { %v796_v13 = vpop.f32.mrb[0].mxu1 }
 0x211   : > { %v798_v46 = vpop.f32.mrb[1].mxu1  ;;  %v797_v22 = vadd.f32 %v796_v13, %v565_v29 }
 0x212   : > { %v799_v39 = vadd.f32 %v798_v46, %v565_v29 }
 0x265   : > { %v1375_v6 = vpop.f32.mrb[0].mxu0 }
 0x266   : > { %v9547_v14 = vadd.f32 %v1375_v6, %v797_v22  ;;  %v1377_v25 = vpop.f32.mrb[1].mxu0 }
 0x267   : > { %v9549_v10 = vadd.f32 %v1377_v25, %v799_v39 }
 0x268   : > { %v2053_v52 = vmax.f32 %v9547_v14, 0.0 }
 0x269   : > { %v2054_v7 = vmax.f32 %v9549_v10, 0.0 }
 0x26b   : > { %2063 = vrot.lane.b32.xlu1 %v2054_v7, %s9697_s15 }
 0x282   : > { %v2048_v24 = vpop.f32.mrb[2].mxu1 }
 0x283   : > { %v9550_v28 = vadd.f32 %v2048_v24, %v565_v29  ;;  %v2050_v43 = vpop.f32.mrb[3].mxu1 }
 0x284   : > { %v9551_v32 = vadd.f32 %v2050_v43, %v565_v29 }
 0x285   : > { %v2055_v50 = vmax.f32 %v9550_v28, 0.0 }
 0x286   : > { %v2056_v23 = vmax.f32 %v9551_v32, 0.0 }
 0x287   : > { %2065 = vrot.lane.b32.xlu1 %v2055_v50, %s9697_s15 }
 0x288   : > { %2067 = vrot.lane.b32.xlu0 %v2056_v23, %s9697_s15 }
 0x28b   : > { %2061 = vrot.lane.b32.xlu1 %v2053_v52, %s9697_s15 }
 0x28c   : > { %2123 = vrot.lane.b32.xlu0 %v2112_v31, %s9708_s14 }
 0x28f   : > { %2125 = vrot.lane.b32.xlu1 %v2116_v9, %s9708_s14 }
 0x2dd   : > { %v2064_v59 = vpop.permute.xlu1 %2063 }
 0x2f9   : > { %v2066_v17 = vpop.permute.xlu1 %2065 }
 0x2fa   : > { %v2070_v51 = vsel %vm472_vm0, %v2064_v59, %v2066_v17  ;;  %v2068_v42 = vpop.permute.xlu0 %2067 }
 0x2fb   : > { %v2077_v57 = vmax.f32 %v2054_v7, %v2070_v51  ;;  %v2079_v5 = vmax.f32 %v2056_v23, %v2068_v42  ;;  %v2071_v40 = vsel %vm472_vm0, %v2066_v17, %v2068_v42 }
 0x2fc   : > { %v2078_v63 = vmax.f32 %v2055_v50, %v2071_v40 }
 0x2fd   : > { %2086 = vrot.lane.b32.xlu0 %v2077_v57, %s9699_s17  ;;  %v2062_v1 = vpop.permute.xlu1 %2061 }
 0x2fe   : > { %v2069_v36 = vsel %vm472_vm0, %v2062_v1, %v2064_v59  ;;  %v2124_v4 = vpop.permute.xlu0 %2123  ;;  %vm3773_vm0 = vcmask 556032  }
 0x2ff   : > { %v2076_v55 = vmax.f32 %v2053_v52, %v2069_v36 }
 0x301   : > { %2090 = vrot.lane.b32.xlu0 %v2079_v5, %s9699_s17  ;;  %2084 = vrot.lane.b32.xlu1 %v2076_v55, %s9699_s17  ;;  %v2126_v62 = vpop.permute.xlu1 %2125 }
 0x302   : > { %v2131_v48 = vsel %vm2129_vm10, %v2124_v4, %v2126_v62 }
 0x305   : > { %2127 = vrot.lane.b32.xlu0 %v2120_v3, %s9708_s14  ;;  %2088 = vrot.lane.b32.xlu1 %v2078_v63, %s9699_s17  ;;  %s9709_s17 = smov 56  }
 0x309   : > { %2121 = vrot.lane.b32.xlu1 %v2108_v11, %s9708_s14  ;;  %s9723_s14 = smov 113  }
 0x36f   : > { %v2087_v37 = vpop.permute.xlu0 %2086 }
 0x373   : > { %v2091_v54 = vpop.permute.xlu0 %2090  ;;  %v2085_v0 = vpop.permute.xlu1 %2084 }
 0x374   : > { %v2102_v58 = vmax.f32 %v2079_v5, %v2091_v54  ;;  %v2092_v16 = vsel %vm496_vm2, %v2085_v0, %v2087_v37 }
 0x375   : > { %v2099_v49 = vmax.f32 %v2076_v55, %v2092_v16 }
 0x377   : > { %v2128_v8 = vpop.permute.xlu0 %2127  ;;  %v2089_v12 = vpop.permute.xlu1 %2088 }
 0x378   : > { %v2140_v44 = vmul.f32 %v2128_v8, %v2102_v58  ;;  %v2093_v41 = vsel %vm496_vm2, %v2087_v37, %v2089_v12  ;;  %v2094_v33 = vsel %vm496_vm2, %v2089_v12, %v2091_v54  ;;  %v2132_v56 = vsel %vm2129_vm10, %v2126_v62, %v2128_v8  ;;  %v2232_v8 = vld [vmem:[%s12565_s4] sm:$0xff] }
 0x379   : > { %v2100_v53 = vmax.f32 %v2077_v57, %v2093_v41  ;;  %v2101_v20 = vmax.f32 %v2078_v63, %v2094_v33  ;;  %vm5400_vm2 = vcmask 31744  }
 0x37a   : > { %2179 = vrot.lane.b32.xlu0 %v2140_v44, %s9704_s22  ;;  %2168 = vrot.lane.b32.xlu1 %v2140_v44, %s9702_s20 }
 0x37b   : > { %v2122_v26 = vpop.permute.xlu1 %2121  ;;  %v2138_v47 = vmul.f32 %v2131_v48, %v2100_v53  ;;  %v2139_v34 = vmul.f32 %v2132_v56, %v2101_v20  ;;  %v2234_v20 = vld [vmem:[%s12566_s5] sm:$0xff] }
 0x37c   : > { %v2130_v38 = vsel %vm2129_vm10, %v2122_v26, %v2124_v4 }
 0x37d   : > { %v2137_v60 = vmul.f32 %v2130_v38, %v2099_v49 }
 0x37e   : > { %2202 = vrot.lane.b32.xlu0 %v2140_v44, %s9709_s17  ;;  %2190 = vrot.lane.b32.xlu1 %v2140_v44, %s9710_s18 }
 0x382   : > { %2214 = vrot.lane.b32.xlu1 %v2140_v44, %s9711_s19  ;;  %2144 = vrot.lane.b32.xlu0 %v2137_v60, %s9698_s16 }
 0x386   : > { %2162 = vrot.lane.b32.xlu1 %v2137_v60, %s9702_s20  ;;  %2152 = vrot.lane.b32.xlu0 %v2137_v60, %s9712_s21 }
 0x38a   : > { %2184 = vrot.lane.b32.xlu1 %v2137_v60, %s9710_s18  ;;  %2173 = vrot.lane.b32.xlu0 %v2137_v60, %s9704_s22 }
 0x38e   : > { %2208 = vrot.lane.b32.xlu1 %v2137_v60, %s9711_s19  ;;  %2196 = vrot.lane.b32.xlu0 %v2137_v60, %s9709_s17 }
 0x392   : > { %2148 = vrot.lane.b32.xlu1 %v2139_v34, %s9698_s16  ;;  %2146 = vrot.lane.b32.xlu0 %v2138_v47, %s9698_s16 }
 0x396   : > { %2154 = vrot.lane.b32.xlu1 %v2138_v47, %s9712_s21  ;;  %2156 = vrot.lane.b32.xlu0 %v2139_v34, %s9712_s21 }
 0x39a   : > { %2164 = vrot.lane.b32.xlu1 %v2138_v47, %s9702_s20  ;;  %2166 = vrot.lane.b32.xlu0 %v2139_v34, %s9702_s20 }
 0x39e   : > { %2177 = vrot.lane.b32.xlu1 %v2139_v34, %s9704_s22  ;;  %2175 = vrot.lane.b32.xlu0 %v2138_v47, %s9704_s22  ;;  %s7592_s22 = sshll.u32 %s13052_s28, 2 }
 0x3a2   : > { %2186 = vrot.lane.b32.xlu1 %v2138_v47, %s9710_s18  ;;  %2188 = vrot.lane.b32.xlu0 %v2139_v34, %s9710_s18  ;;  %s452_s18 = scalar_lea.vmem %s12562_s1, %s7592_s22  ;;  %s9714_s22 = smov 120  }
 0x3a6   : > { %2200 = vrot.lane.b32.xlu1 %v2139_v34, %s9709_s17  ;;  %2198 = vrot.lane.b32.xlu0 %v2138_v47, %s9709_s17 }
 0x3aa   : > { %2210 = vrot.lane.b32.xlu1 %v2138_v47, %s9711_s19  ;;  %2212 = vrot.lane.b32.xlu0 %v2139_v34, %s9711_s19 }
 0x3ae   : > { %2224 = vrot.lane.b32.xlu1 %v2139_v34, %s9713_s24  ;;  %2222 = vrot.lane.b32.xlu0 %v2138_v47, %s9713_s24 }
 0x3b2   : > { %2220 = vrot.lane.b32.xlu1 %v2137_v60, %s9713_s24  ;;  %2226 = vrot.lane.b32.xlu0 %v2140_v44, %s9713_s24  ;;  %v2338_v44 = vsel %vm703_vm9, %v2232_v8, 0 }
 0x3b3   : > { %v10523_v16 = vand.u32 4294901760, %v2338_v44 }
 0x3b5   : > { %v10530_v60 = vsub.f32 %v2338_v44, %v10523_v16 }
 0x3b7   : > { %v10534_v41 = vand.u32 4294901760, %v10530_v60 }
 0x3b9   : > { %v2429_v53 = vsub.f32 %v10530_v60, %v10534_v41 }
 0x3bb   : > { %v10543_v48 = vand.u32 4294901760, %v2429_v53 }
 0x3bd   : > { %8298 = vmatprep.mubr.f32.mxu1 %v10543_v48 }
 0x3ec   : > { %v2180_v15 = vpop.permute.xlu0 %2179  ;;  %v2169_v35 = vpop.permute.xlu1 %2168 }
 0x3f0   : > { %v2203_v13 = vpop.permute.xlu0 %2202  ;;  %v2191_v46 = vpop.permute.xlu1 %2190 }
 0x3f4   : > { %v2145_v29 = vpop.permute.xlu0 %2144  ;;  %v10469_v22 = vpop.permute.xlu1 %2214 }
 0x3f8   : > { %v2153_v39 = vpop.permute.xlu0 %2152  ;;  %v2163_v6 = vpop.permute.xlu1 %2162 }
 0x3fc   : > { %v2174_v14 = vpop.permute.xlu0 %2173  ;;  %v2185_v25 = vpop.permute.xlu1 %2184 }
 0x400   : > { %v2197_v10 = vpop.permute.xlu0 %2196  ;;  %v10471_v7 = vpop.permute.xlu1 %2208 }
 0x404   : > { %v2147_v30 = vpop.permute.xlu0 %2146  ;;  %v10473_v2 = vpop.permute.xlu1 %2148 }
 0x405   : > { %2250 = vrot.lane.b32.xlu1 %v10473_v2, %s9698_s16  ;;  %v10481_v3 = vsel %vm484_vm1, %v2147_v30, %v10473_v2  ;;  %v10488_v19 = vsel %vm484_vm1, %v2145_v29, %v2147_v30  ;;  %v3066_v47 = vand.u32 4294901760, %v10473_v2 }
 0x406   : > { %v2345_v30 = vand.u32 4294901760, %v10488_v19 }
 0x408   : > { %v2157_v21 = vpop.permute.xlu0 %2156  ;;  %v2155_v24 = vpop.permute.xlu1 %2154 }
 0x409   : > { %v2160_v18 = vsel %vm2158_vm11, %v2155_v24, %v2157_v21  ;;  %2256 = vrot.lane.b32.xlu0 %v2157_v21, %s9698_s16  ;;  %v2159_v23 = vsel %vm2158_vm11, %v2153_v39, %v2155_v24  ;;  %v2343_v39 = vand.u32 4294901760, %v10481_v3  ;;  %v2233_v24 = vld [vmem:[%s12565_s4 + $0x8] sm:$0xff] }
 0x40a   : > { %2254 = vrot.lane.b32.xlu1 %v2160_v18, %s9698_s16 }
 0x40c   : > { %v2167_v28 = vpop.permute.xlu0 %2166  ;;  %v2165_v43 = vpop.permute.xlu1 %2164 }
 0x40d   : > { %v2171_v32 = vsel %vm532_vm5, %v2165_v43, %v2167_v28  ;;  %2248 = vrot.lane.b32.xlu0 %v10481_v3, %s9698_s16  ;;  %v2172_v27 = vsel %vm532_vm5, %v2167_v28, %v2169_v35  ;;  %v2170_v9 = vsel %vm532_vm5, %v2163_v6, %v2165_v43 }
 0x40e   : > { %2260 = vrot.lane.b32.xlu1 %v2171_v32, %s9698_s16 }
 0x410   : > { %v2176_v50 = vpop.permute.xlu0 %2175  ;;  %v2178_v61 = vpop.permute.xlu1 %2177 }
 0x411   : > { %2246 = vrot.lane.b32.xlu0 %v10488_v19, %s9698_s16  ;;  %v2182_v11 = vsel %vm556_vm7, %v2176_v50, %v2178_v61  ;;  %v2183_v17 = vsel %vm556_vm7, %v2178_v61, %v2180_v15  ;;  %v2181_v42 = vsel %vm556_vm7, %v2174_v14, %v2176_v50 }
 0x412   : > { %2252 = vrot.lane.b32.xlu1 %v2159_v23, %s9698_s16 }
 0x414   : > { %v2189_v31 = vpop.permute.xlu0 %2188  ;;  %v2187_v52 = vpop.permute.xlu1 %2186 }
 0x415   : > { %2262 = vrot.lane.b32.xlu0 %v2172_v27, %s9698_s16  ;;  %v2194_v59 = vsel %vm2192_vm12, %v2187_v52, %v2189_v31  ;;  %v2195_v1 = vsel %vm2192_vm12, %v2189_v31, %v2191_v46  ;;  %v2193_v40 = vsel %vm2192_vm12, %v2185_v25, %v2187_v52  ;;  %v2341_v27 = vsel %vm703_vm9, %v2233_v24, 0 }
 0x416   : > { %2266 = vrot.lane.b32.xlu1 %v2182_v11, %s9698_s16 }
 0x418   : > { %v2199_v51 = vpop.permute.xlu0 %2198  ;;  %v2201_v57 = vpop.permute.xlu1 %2200 }
 0x419   : > { %2258 = vrot.lane.b32.xlu0 %v2170_v9, %s9698_s16  ;;  %v2206_v36 = vsel %vm2204_vm13, %v2199_v51, %v2201_v57  ;;  %v2207_v4 = vsel %vm2204_vm13, %v2201_v57, %v2203_v13  ;;  %v2205_v37 = vsel %vm2204_vm13, %v2197_v10, %v2199_v51  ;;  %v10578_v57 = vand.u32 4294901760, %v2341_v27 }
 0x41a   : > { %2272 = vrot.lane.b32.xlu1 %v2194_v59, %s9698_s16  ;;  %v10574_v59 = vsub.f32 %v10473_v2, %v3066_v47  ;;  %v2235_v2 = vld [vmem:[%s12566_s5 + $0x8] sm:$0xff] }
 0x41c   : > { %v2213_v5 = vpop.permute.xlu0 %2212  ;;  %v2211_v55 = vpop.permute.xlu1 %2210 }
 0x41d   : > { %2268 = vrot.lane.b32.xlu0 %v2183_v17, %s9698_s16  ;;  %v2218_v63 = vsel %vm2216_vm14, %v2211_v55, %v2213_v5  ;;  %v2219_v0 = vsel %vm2216_vm14, %v2213_v5, %v10469_v22  ;;  %v2217_v26 = vsel %vm2216_vm14, %v10471_v7, %v2211_v55 }
 0x41e   : > { %2264 = vrot.lane.b32.xlu1 %v2181_v42, %s9698_s16 }
 0x420   : > { %v2225_v62 = vpop.permute.xlu1 %2224  ;;  %v2223_v54 = vpop.permute.xlu0 %2222 }
 0x421   : > { %2274 = vrot.lane.b32.xlu0 %v2195_v1, %s9698_s16  ;;  %v2230_v58 = vsel %vm2228_vm15, %v2223_v54, %v2225_v62 }
 0x422   : > { %2278 = vrot.lane.b32.xlu1 %v2206_v36, %s9698_s16 }
 0x424   : > { %v2221_v12 = vpop.permute.xlu1 %2220  ;;  %v2227_v38 = vpop.permute.xlu0 %2226 }
 0x425   : > { %2270 = vrot.lane.b32.xlu0 %v2193_v40, %s9698_s16  ;;  %v2229_v49 = vsel %vm2228_vm15, %v2221_v12, %v2223_v54  ;;  %v2231_v33 = vsel %vm2228_vm15, %v2225_v62, %v2227_v38  ;;  %v10593_v40 = vsub.f32 %v10488_v19, %v2345_v30  ;;  %v10606_v54 = vsub.f32 %v2341_v27, %v10578_v57 }
 0x426   : > { %2284 = vrot.lane.b32.xlu1 %v2218_v63, %s9698_s16  ;;  %v10596_v63 = vsub.f32 %v10481_v3, %v2343_v39 }
 0x427   : > { %v12596_v3 = vand.u32 4294901760, %v10593_v40  ;;  %v10628_v53 = vand.u32 4294901760, %v10606_v54 }
 0x428   : > { %v12598_v44 = vand.u32 4294901760, %v10596_v63 }
 0x429   : > { %2280 = vrot.lane.b32.xlu0 %v2207_v4, %s9698_s16  ;;  %12817 = vst [vmem:[#allocation3_spill] sm:$0xff] %v10628_v53 }
 0x42a   : > { %2276 = vrot.lane.b32.xlu1 %v2205_v37, %s9698_s16  ;;  %v12602_v37 = vand.u32 4294901760, %v10574_v59  ;;  %v2451_v27 = vsub.f32 %v10596_v63, %v12598_v44 }
 0x42d   : > { %2286 = vrot.lane.b32.xlu0 %v2219_v0, %s9698_s16 }
 0x42e   : > { %2290 = vrot.lane.b32.xlu1 %v2230_v58, %s9698_s16 }
 0x431   : > { %2282 = vrot.lane.b32.xlu0 %v2217_v26, %s9698_s16 }
 0x432   : > { %2288 = vrot.lane.b32.xlu1 %v2229_v49, %s9698_s16 }
 0x435   : > { %2292 = vrot.lane.b32.xlu0 %v2231_v33, %s9698_s16  ;;  %v3163_v33 = vsub.f32 %v10574_v59, %v12602_v37 }
 0x436   : > { %2243 = vperm.xlu1 %9688, %v2235_v2  }
 0x439   : > { %2238 = vperm.xlu0 %9687, %v2234_v20  }
 0x477   : > { %v2251_v56 = vpop.permute.xlu1 %2250 }
 0x478   : > { %v3069_v34 = vand.u32 4294901760, %v2251_v56 }
 0x47a   : > { %v10547_v15 = vpack.c.bf16 %v3069_v34, %v3066_v47  ;;  %v10584_v36 = vsub.f32 %v2251_v56, %v3069_v34 }
 0x47b   : > { %v2257_v35 = vpop.permute.xlu0 %2256 }
 0x47c   : > { %8935 = vmatprep.subr.bf16.mxu1 %v10547_v15  ;;  %v2255_v13 = vpop.permute.xlu1 %2254  ;;  %v3072_v32 = vand.u32 4294901760, %v2257_v35  ;;  %v12599_v58 = vand.u32 4294901760, %v10584_v36 }
 0x47d   : > { %8937 = vmatpush3.bf16.msra.mxu1 %v10547_v15  ;;  %v2297_v18 = vsel %vm484_vm1, %v2255_v13, %v2257_v35 }
 0x47e   : > { %v2351_v11 = vand.u32 4294901760, %v2297_v18  ;;  %v10613_v8 = vsub.f32 %v2257_v35, %v3072_v32 }
 0x47f   : > { %v2249_v46 = vpop.permute.xlu0 %2248 }
 0x480   : > { %v2295_v29 = vsel %vm484_vm1, %v2249_v46, %v2251_v56  ;;  %v2261_v22 = vpop.permute.xlu1 %2260  ;;  %v10620_v26 = vsub.f32 %v2297_v18, %v2351_v11 }
 0x481   : > { %v2347_v6 = vand.u32 4294901760, %v2295_v29 }
 0x483   : > { %v2247_v14 = vpop.permute.xlu0 %2246  ;;  %v10553_v25 = vpack.c.bf16 %v2347_v6, %v2343_v39  ;;  %v10609_v19 = vsub.f32 %v2295_v29, %v2347_v6  ;;  %v12600_v39 = vand.u32 4294901760, %v10613_v8 }
 0x484   : > { %v2294_v10 = vsel %vm484_vm1, %v2247_v14, %v2249_v46  ;;  %v2253_v7 = vpop.permute.xlu1 %2252 }
 0x485   : > { %v2349_v21 = vand.u32 4294901760, %v2294_v10  ;;  %8839 = vmatprep.subr.bf16.mxu0 %v10553_v25  ;;  %v2296_v52 = vsel %vm484_vm1, %v2253_v7, %v2255_v13  ;;  %v12597_v13 = vand.u32 4294901760, %v10609_v19  ;;  %v2457_v7 = vsub.f32 %v10593_v40, %v12596_v3 }
 0x486   : > { %v2353_v5 = vand.u32 4294901760, %v2296_v52 }
 0x487   : > { %v10562_v28 = vpack.c.bf16 %v2349_v21, %v2345_v30  ;;  %v2263_v43 = vpop.permute.xlu0 %2262  ;;  %v10622_v38 = vsub.f32 %v2294_v10, %v2349_v21  ;;  %v12604_v30 = vand.u32 4294901760, %v10620_v26 }
 0x488   : > { %v10565_v50 = vsel %vm484_vm1, %v2261_v22, %v2263_v43  ;;  %v3075_v61 = vand.u32 4294901760, %v2263_v43  ;;  %v2267_v23 = vpop.permute.xlu1 %2266  ;;  %v10645_v6 = vsub.f32 %v2296_v52, %v2353_v5 }
 0x489   : > { %12814 = vst [vmem:[#allocation10_spill] sm:$0xff] %v10562_v28  ;;  %v2355_v31 = vand.u32 4294901760, %v10565_v50  ;;  %8841 = vmatpush1.bf16.msra.mxu0 %v10562_v28  ;;  %v12601_v21 = vand.u32 4294901760, %v10622_v38  ;;  %v10695_v3 = vsub.f32 %v10620_v26, %v12604_v30 }
 0x48a   : > { %v10571_v9 = vpack.c.bf16 %v3075_v61, %v3072_v32  ;;  %v10630_v20 = vsub.f32 %v2263_v43, %v3075_v61 }
 0x48b   : > { %v2259_v17 = vpop.permute.xlu0 %2258  ;;  %v10576_v51 = vpack.c.bf16 %v2355_v31, %v2351_v11  ;;  %v10674_v11 = vsub.f32 %v10565_v50, %v2355_v31  ;;  %v3177_v50 = vsub.f32 %v10613_v8, %v12600_v39  ;;  %v2469_v31 = vsub.f32 %v10622_v38, %v12601_v21 }
 0x48c   : > { %v10581_v42 = vsel %vm484_vm1, %v2259_v17, %v2261_v22  ;;  %8939 = vmatprep.subr.bf16.mxu1 %v10571_v9  ;;  %v2273_v1 = vpop.permute.xlu1 %2272  ;;  %v3170_v22 = vsub.f32 %v10584_v36, %v12599_v58  ;;  %v12606_v43 = vand.u32 4294901760, %v10630_v20  ;;  %v3164_v58 = vand.u32 4294901760, %v3163_v33 }
 0x48d   : > { %12815 = vst [vmem:[#allocation14_spill] sm:$0xff] %v10576_v51  ;;  %v2357_v55 = vand.u32 4294901760, %v10581_v42  ;;  %8843 = vmatprep.subr.bf16.mxu0 %v10576_v51  ;;  %8941 = vmatpush3.bf16.msra.mxu1 %v10571_v9  ;;  %v2452_v21 = vand.u32 4294901760, %v2451_v27 }
 0x48e   : > { %v3171_v2 = vand.u32 4294901760, %v3170_v22  ;;  %v3184_v22 = vsub.f32 %v10630_v20, %v12606_v43  ;;  %v2470_v43 = vand.u32 4294901760, %v2469_v31  ;;  %v12821_v31 = vand.u32 4294901760, %v10674_v11 }
 0x48f   : > { %v10600_v4 = vpack.c.bf16 %v2357_v55, %v2353_v5  ;;  %v10602_v62 = vpop.permute.xlu0 %2268  ;;  %v12609_v5 = vand.u32 4294901760, %v10645_v6 }
 0x490   : > { %v2265_v0 = vpop.permute.xlu1 %2264  ;;  %v10617_v12 = vsel %vm484_vm1, %v2267_v23, %v10602_v62  ;;  %v12605_v56 = vand.u32 4294901760, %v10602_v62 }
 0x491   : > { %12816 = vst [vmem:[#allocation13_spill] sm:$0xff] %v10600_v4  ;;  %8845 = vmatpush1.bf16.msra.mxu0 %v10600_v4  ;;  %v12603_v46 = vand.u32 4294901760, %v10617_v12  ;;  %v10648_v14 = vsel %vm484_vm1, %v2265_v0, %v2267_v23  ;;  %v2440_v23 = vsub.f32 %v10606_v54, %v10628_v53  ;;  %v10707_v30 = vsub.f32 %v10645_v6, %v12609_v5 }
 0x492   : > { %v2361_v52 = vand.u32 4294901760, %v10648_v14  ;;  %v3185_v4 = vand.u32 4294901760, %v3184_v22 }
 0x493   : > { %v2275_v49 = vpop.permute.xlu0 %2274  ;;  %v10701_v39 = vand.u32 4294901760, %v2440_v23  ;;  %v10716_v23 = vsub.f32 %v10581_v42, %v2357_v55  ;;  %v2487_v42 = vsub.f32 %v10674_v11, %v12821_v31 }
 0x494   : > { %v10634_v47 = vsel %vm484_vm1, %v2273_v1, %v2275_v49  ;;  %v3081_v34 = vand.u32 4294901760, %v2275_v49  ;;  %v10636_v35 = vpop.permute.xlu1 %2278 }
 0x495   : > { %v2363_v29 = vand.u32 4294901760, %v10634_v47  ;;  %v12622_v55 = vand.u32 4294901760, %v10716_v23 }
 0x496   : > { %v10652_v10 = vpack.c.bf16 %v3081_v34, %v12605_v56  ;;  %v3178_v56 = vand.u32 4294901760, %v3177_v50  ;;  %v10718_v27 = vsub.f32 %v2275_v49, %v3081_v34  ;;  %v12822_v49 = vand.u32 4294901760, %v10602_v62 }
 0x497   : > { %v2271_v24 = vpop.permute.xlu0 %2270  ;;  %v10661_v18 = vpack.c.bf16 %v2363_v29, %v12603_v46  ;;  %v10738_v22 = vsub.f32 %v10634_v47, %v2363_v29  ;;  %v12823_v47 = vand.u32 4294901760, %v10617_v12 }
 0x498   : > { %12818 = vst [vmem:[#allocation9_spill] sm:$0xff] %v10652_v10  ;;  %v10665_v32 = vsel %vm484_vm1, %v2271_v24, %v2273_v1  ;;  %8943 = vmatprep.subr.bf16.mxu1 %v10652_v10  ;;  %v2285_v61 = vpop.permute.xlu1 %2284  ;;  %v2463_v1 = vsub.f32 %v10609_v19, %v12597_v13  ;;  %v2458_v13 = vand.u32 4294901760, %v2457_v7  ;;  %v10711_v7 = vpack.c.bf16 %v3171_v2, %v3164_v58 }
 0x499   : > { %12819 = vst [vmem:[#allocation4_spill] sm:$0xff] %v10661_v18  ;;  %v2365_v17 = vand.u32 4294901760, %v10665_v32  ;;  %8847 = vmatprep.subr.bf16.mxu0 %v10661_v18  ;;  %8945 = vmatpush3.bf16.msra.mxu1 %v10652_v10  ;;  %v10731_v34 = vsub.f32 %v10602_v62, %v12822_v49 }
 0x49a   : > { %v2464_v37 = vand.u32 4294901760, %v2463_v1  ;;  %v10743_v31 = vpack.c.bf16 %v2470_v43, %v2458_v13  ;;  %v2488_v13 = vand.u32 4294901760, %v2487_v42  ;;  %v12623_v42 = vand.u32 4294901760, %v10738_v22 }
 0x49b   : > { %v10690_v0 = vpack.c.bf16 %v2365_v17, %v2361_v52  ;;  %v2281_v24 = vpop.permute.xlu0 %2280 }
 0x49c   : > { %v2277_v44 = vpop.permute.xlu1 %2276  ;;  %v2305_v33 = vsel %vm484_vm1, %v10636_v35, %v2281_v24  ;;  %v3084_v53 = vand.u32 4294901760, %v2281_v24  ;;  %v10722_v50 = vpack.c.bf16 %v2464_v37, %v2452_v21 }
 0x49d   : > { %12820 = vst [vmem:[#allocation5_spill] sm:$0xff] %v10690_v0  ;;  %8849 = vmatpush1.bf16.msra.mxu0 %v10690_v0  ;;  %v2367_v58 = vand.u32 4294901760, %v2305_v33  ;;  %v2304_v46 = vsel %vm484_vm1, %v2277_v44, %v10636_v35  ;;  %v10750_v44 = vpack.c.bf16 %v3185_v4, %v3178_v56  ;;  %v10755_v35 = vsub.f32 %v10617_v12, %v12823_v47 }
 0x49e   : > { %v2369_v29 = vand.u32 4294901760, %v2304_v46  ;;  %v10764_v4 = vsub.f32 %v10665_v32, %v2365_v17  ;;  %v10766_v56 = vsub.f32 %v2281_v24, %v3084_v53 }
 0x49f   : > { %v2287_v1 = vpop.permute.xlu0 %2286  ;;  %v10784_v17 = vsub.f32 %v2305_v33, %v2367_v58 }
 0x4a0   : > { %v2307_v5 = vsel %vm484_vm1, %v2285_v61, %v2287_v1  ;;  %v3087_v0 = vand.u32 4294901760, %v2287_v1  ;;  %v2291_v18 = vpop.permute.xlu1 %2290 }
 0x4a1   : > { %v2371_v2 = vand.u32 4294901760, %v2307_v5 }
 0x4a2   : > { %v10735_v10 = vpack.c.bf16 %v3087_v0, %v3084_v53  ;;  %v10746_v28 = vsub.f32 %v2287_v1, %v3087_v0  ;;  %v2493_v53 = vsub.f32 %v10716_v23, %v12622_v55 }
 0x4a3   : > { %v2283_v21 = vpop.permute.xlu0 %2282  ;;  %v10741_v51 = vpack.c.bf16 %v2371_v2, %v2367_v58  ;;  %v10768_v12 = vsub.f32 %v2307_v5, %v2371_v2 }
 0x4a4   : > { %v2306_v62 = vsel %vm484_vm1, %v2283_v21, %v2285_v61  ;;  %8947 = vmatprep.subr.bf16.mxu1 %v10735_v10  ;;  %v2289_v37 = vpop.permute.xlu1 %2288  ;;  %v10761_v61 = vsub.f32 %v10648_v14, %v2361_v52  ;;  %v12825_v21 = vand.u32 4294901760, %v10718_v27  ;;  %v12626_v43 = vand.u32 4294901760, %v10746_v28 }
 0x4a5   : > { %v2373_v49 = vand.u32 4294901760, %v2306_v62  ;;  %8851 = vmatprep.subr.bf16.mxu0 %v10741_v51  ;;  %8949 = vmatpush3.bf16.msra.mxu1 %v10735_v10  ;;  %v2308_v14 = vsel %vm484_vm1, %v2289_v37, %v2291_v18  ;;  %v2511_v37 = vsub.f32 %v10738_v22, %v12623_v42  ;;  %v2494_v24 = vand.u32 4294901760, %v2493_v53 }
 0x4a6   : > { %v3198_v47 = vsub.f32 %v10718_v27, %v12825_v21  ;;  %v10799_v58 = vand.u32 4294901760, %v2308_v14  ;;  %v3212_v33 = vsub.f32 %v10746_v28, %v12626_v43  ;;  %v12832_v53 = vand.u32 4294901760, %v10761_v61 }
 0x4a7   : > { %v10770_v0 = vpack.c.bf16 %v2373_v49, %v2369_v29  ;;  %v2293_v1 = vpop.permute.xlu0 %2292  ;;  %v10792_v21 = vsub.f32 %v2306_v62, %v2373_v49  ;;  %v10807_v49 = vsub.f32 %v2304_v46, %v2369_v29  ;;  %v12828_v46 = vand.u32 4294901760, %v10695_v3 }
 0x4a8   : > { %v2309_v32 = vsel %vm484_vm1, %v2291_v18, %v2293_v1  ;;  %v10779_v52 = vand.u32 4294901760, %v2293_v1  ;;  %v12827_v18 = vand.u32 4294901760, %v10731_v34  ;;  %v12831_v3 = vand.u32 4294901760, %v10766_v56 }
 0x4a9   : > { %12824 = vst [vmem:[#allocation6_spill] sm:$0xff] %v10770_v0  ;;  %v10786_v5 = vand.u32 4294901760, %v2309_v32  ;;  %8853 = vmatpush1.bf16.msra.mxu0 %v10770_v0  ;;  %v8858_v29 = vpack.c.bf16 %v2488_v13, %v12828_v46  ;;  %v2505_v46 = vsub.f32 %v10761_v61, %v12832_v53  ;;  %v12833_v43 = vand.u32 4294901760, %v10768_v12 }
 0x4aa   : > { %8296 = vmatprep.subr.mxu1 %v10779_v52  ;;  %v3191_v55 = vsub.f32 %v10731_v34, %v12827_v18  ;;  %v10810_v2 = vsub.f32 %v2293_v1, %v10779_v52  ;;  %v3199_v18 = vand.u32 4294901760, %v3198_v47  ;;  %v12829_v1 = vand.u32 4294901760, %v10755_v35 }
 0x4ab   : > { %12826 = vst [vmem:[#allocation7_spill] sm:$0xff] %v10786_v5  ;;  %2376 = vmatprep.subr.mxu0 %v10786_v5  ;;  %8297 = vmatpush3.msra.mxu1 %v10779_v52  ;;  %v12830_v47 = vand.u32 4294901760, %v10764_v4  ;;  %v3205_v13 = vsub.f32 %v10766_v56, %v12831_v3  ;;  %v3213_v62 = vand.u32 4294901760, %v3212_v33 }
 0x4ac   : > { %8951 = vmatprep.subr.bf16.mxu1 %v10711_v7  ;;  %8299 = vmatmul.mubr.f32.vlgmr.msra.gmra.mrb[4].mxu1 %v10701_v39  ;;  %v2499_v42 = vsub.f32 %v10755_v35, %v12829_v1  ;;  %v10838_v1 = vsub.f32 %v2309_v32, %v10786_v5  ;;  %v10848_v53 = vand.u32 4294901760, %v10810_v2 }
 0x4ad   : > { %2378 = vmatpush1.msra.mxu0 %v10799_v58  ;;  %8953 = vmatpush3.bf16.msra.mxu1 %v10711_v7  ;;  %v2517_v0 = vsub.f32 %v10764_v4, %v12830_v47  ;;  %v3192_v7 = vand.u32 4294901760, %v3191_v55  ;;  %v2512_v47 = vand.u32 4294901760, %v2511_v37  ;;  %v12835_v37 = vand.u32 4294901760, %v10784_v17 }
 0x4ae   : > { %8855 = vmatprep.subr.bf16.mxu0 %v10722_v50  ;;  %8955 = vmatprep.subr.bf16.mxu1 %v10750_v44  ;;  %v2535_v50 = vsub.f32 %v10768_v12, %v12833_v43  ;;  %v2500_v43 = vand.u32 4294901760, %v2499_v42  ;;  %v2506_v42 = vand.u32 4294901760, %v2505_v46 }
 0x4af   : > { %2431 = vmatmul.mubr.f32.vlgmr.msra.gmra.mrb[2].mxu0 %v10543_v48  ;;  %8319 = vmatprep.mubr.f32.mxu1 %v10523_v16  ;;  %v8958_v3 = vpack.c.bf16 %v3199_v18, %v3192_v7  ;;  %v12834_v48 = vand.u32 4294901760, %v10707_v30  ;;  %v2523_v55 = vsub.f32 %v10784_v17, %v12835_v37  ;;  %v2518_v5 = vand.u32 4294901760, %v2517_v0 }
 0x4b0   : > { %8857 = vmatpush1.bf16.msra.mxu0 %v10743_v31  ;;  %2436 = vmatprep.mubr.f32.mxu0 %v12774_v45  ;;  %v12836_v31 = vand.u32 4294901760, %v10792_v21  ;;  %v10861_v18 = vsub.f32 %v2308_v14, %v10799_v58  ;;  %v8862_v7 = vpack.c.bf16 %v2512_v47, %v2500_v43  ;;  %v2546_v30 = vand.u32 4294901760, %v10838_v1 }
 0x4b1   : > { %8859 = vmatprep.subr.bf16.mxu0 %v8858_v29  ;;  %8957 = vmatpush3.bf16.msra.mxu1 %v10750_v44  ;;  %v8860_v32 = vpack.c.bf16 %v2494_v24, %v12834_v48  ;;  %v3206_v29 = vand.u32 4294901760, %v3205_v13  ;;  %v2536_v44 = vand.u32 4294901760, %v2535_v50  ;;  %v12837_v24 = vand.u32 4294901760, %v10807_v49 }
 0x4b2   : > { %v2541_v33 = vsub.f32 %v10792_v21, %v12836_v31  ;;  %8959 = vmatprep.subr.bf16.mxu1 %v8958_v3  ;;  %v3219_v37 = vsub.f32 %v10810_v2, %v10848_v53  ;;  %v2524_v14 = vand.u32 4294901760, %v2523_v55  ;;  %v2552_v47 = vand.u32 4294901760, %v10861_v18 }
 0x4b3   : > { %2442 = vmatmul.mubr.f32.gmra.mrb[4].mxu0 %v10701_v39  ;;  %v2529_v0 = vsub.f32 %v10807_v49, %v12837_v24  ;;  %v8962_v48 = vpack.c.bf16 %v3213_v62, %v3206_v29  ;;  %v8864_v39 = vpack.c.bf16 %v2518_v5, %v2506_v42  ;;  %v2547_v50 = vsub.f32 %v10838_v1, %v2546_v30 }
 0x4b4   : > { %8861 = vmatpush1.bf16.msra.mxu0 %v8860_v32  ;;  %2602 = vmatprep.mubr.f32.mxu0 %v12774_v45  ;;  %v2542_v13 = vand.u32 4294901760, %v2541_v33  ;;  %v8866_v46 = vpack.c.bf16 %v2536_v44, %v2524_v14  ;;  %v3220_v62 = vand.u32 4294901760, %v3219_v37  ;;  %v8966_v5 = vpack.c.bf16 %v10584_v36, %v10574_v59 }
 0x4b5   : > { %8863 = vmatprep.subr.bf16.mxu0 %v8862_v7  ;;  %8961 = vmatpush3.bf16.msra.mxu1 %v8958_v3  ;;  %v2530_v32 = vand.u32 4294901760, %v2529_v0  ;;  %v2553_v3 = vsub.f32 %v10861_v18, %v2552_v47  ;;  %v2548_v43 = vand.u32 4294901760, %v2547_v50  ;;  %v8970_v33 = vpack.c.bf16 %v10630_v20, %v10613_v8  ;;  %v12841_v50 = vld [vmem:[#allocation13_spill] sm:$0xff] }
 0x4b6   : > { %8963 = vmatprep.subr.bf16.mxu1 %v8962_v48  ;;  %v8870_v29 = vpack.c.bf16 %v10609_v19, %v10596_v63  ;;  %v8872_v7 = vpack.c.bf16 %v10622_v38, %v10593_v40  ;;  %v8874_v44 = vpack.c.bf16 %v10674_v11, %v10620_v26  ;;  %v8974_v42 = vpack.c.bf16 %v10718_v27, %v10731_v34 }
 0x4b7   : > { %v8868_v55 = vpack.c.bf16 %v2542_v13, %v2530_v32  ;;  %v2554_v31 = vand.u32 4294901760, %v2553_v3  ;;  %v8876_v24 = vpack.c.bf16 %v10716_v23, %v10645_v6  ;;  %v8878_v0 = vpack.c.bf16 %v10738_v22, %v10755_v35  ;;  %v12842_v32 = vld [vmem:[#allocation4_spill] sm:$0xff] }
 0x4b8   : > { %8865 = vmatpush1.bf16.msra.mxu0 %v8864_v39  ;;  %v8880_v37 = vpack.c.bf16 %v10764_v4, %v10761_v61  ;;  %v8882_v14 = vpack.c.bf16 %v10768_v12, %v10784_v17  ;;  %v8884_v13 = vpack.c.bf16 %v10792_v21, %v10807_v49  ;;  %v12838_v39 = vld [vmem:[#allocation10_spill] sm:$0xff]  ;;  %v12846_v3 = vand.u32 4294901760, %v10584_v36 }
 0x4b9   : > { %8867 = vmatprep.subr.bf16.mxu0 %v8866_v46  ;;  %8965 = vmatpush3.bf16.msra.mxu1 %v8962_v48  ;;  %v8978_v48 = vpack.c.bf16 %v10746_v28, %v10766_v56  ;;  %v12840_v46 = vld [vmem:[#allocation9_spill] sm:$0xff]  ;;  %v12853_v36 = vand.u32 4294901760, %v10593_v40  ;;  %v12859_v40 = vand.u32 4294901760, %v10645_v6  ;;  %v12865_v6 = vand.u32 4294901760, %v10761_v61  ;;  %v2244_v61 = vpop.permute.xlu1 %2243 }
 0x4ba   : > { %8317 = vmatprep.subr.mxu1 %v3220_v62 }
 0x4bc   : > { %8869 = vmatpush1.bf16.msra.mxu0 %v8868_v55 }
 0x4bd   : > { %2549 = vmatprep.subr.mxu0 %v2548_v43  ;;  %8318 = vmatpush3.msra.mxu1 %v3220_v62  ;;  %v12844_v62 = vld [vmem:[#allocation6_spill] sm:$0xff]  ;;  %v12847_v43 = vld [vmem:[#allocation7_spill] sm:$0xff] }
 0x4be   : > { %8967 = vmatprep.subr.bf16.mxu1 %v8966_v5  ;;  %8320 = vmatmul.mubr.f32.vlgmr.msra.gmra.mrb[4].mxu1 %v10578_v57 }
 0x4bf   : > { %8969 = vmatpush3.bf16.msra.mxu1 %v8966_v5  ;;  %8340 = vmatprep.mubr.f32.mxu1 %v10530_v60  ;;  %v12848_v5 = vld [vmem:[#allocation3_spill] sm:$0xff] }
 0x4c0   : > { %2555 = vmatpush1.msra.mxu0 %v2554_v31  ;;  %8971 = vmatprep.subr.bf16.mxu1 %v8970_v33  ;;  %v12849_v31 = vand.u32 4294901760, %v10613_v8  ;;  %v12855_v8 = vand.u32 4294901760, %v10620_v26  ;;  %v12861_v26 = vand.u32 4294901760, %v10755_v35 }
 0x4c1   : > { %8871 = vmatprep.subr.bf16.mxu0 %v8870_v29  ;;  %2604 = vmatmul.mubr.f32.vlgmr.msra.gmra.mrb[2].mxu0 %v10523_v16 }
 0x4c2   : > { %8873 = vmatpush1.bf16.msra.mxu0 %v8872_v7  ;;  %2609 = vmatprep.mubr.f32.mxu0 %v12774_v45  ;;  %v12851_v7 = vand.u32 4294901760, %v10596_v63  ;;  %v12856_v63 = vand.u32 4294901760, %v10674_v11  ;;  %v12862_v11 = vand.u32 4294901760, %v10738_v22  ;;  %v12867_v22 = vand.u32 4294901760, %v10784_v17 }
 0x4c3   : > { %8875 = vmatprep.subr.bf16.mxu0 %v8874_v44  ;;  %8973 = vmatpush3.bf16.msra.mxu1 %v8970_v33  ;;  %v12850_v33 = vand.u32 4294901760, %v10630_v20 }
 0x4c4   : > { %8975 = vmatprep.subr.bf16.mxu1 %v8974_v42  ;;  %v8906_v20 = vpack.c.bf16 %v12856_v63, %v12855_v8 }
 0x4c5   : > { %2611 = vmatmul.mubr.f32.gmra.mrb[4].mxu0 %v10578_v57  ;;  %v9002_v29 = vpack.c.bf16 %v12850_v33, %v12849_v31 }
 0x4c6   : > { %8877 = vmatpush1.bf16.msra.mxu0 %v8876_v24  ;;  %2717 = vmatprep.mubr.f32.mxu0 %v12774_v45 }
 0x4c7   : > { %8879 = vmatprep.subr.bf16.mxu0 %v8878_v0  ;;  %8977 = vmatpush3.bf16.msra.mxu1 %v8974_v42  ;;  %v12854_v42 = vand.u32 4294901760, %v10622_v38  ;;  %v12858_v0 = vand.u32 4294901760, %v10718_v27  ;;  %v12863_v27 = vand.u32 4294901760, %v10766_v56  ;;  %v12870_v56 = vand.u32 4294901760, %v10792_v21 }
 0x4c8   : > { %8979 = vmatprep.subr.bf16.mxu1 %v8978_v48 }
 0x4c9   : > { %v8904_v24 = vpack.c.bf16 %v12854_v42, %v12853_v36 }
 0x4ca   : > { %8881 = vmatpush1.bf16.msra.mxu0 %v8880_v37  ;;  %v8910_v37 = vpack.c.bf16 %v12862_v11, %v12861_v26 }
 0x4cb   : > { %8883 = vmatprep.subr.bf16.mxu0 %v8882_v14  ;;  %8981 = vmatpush3.bf16.msra.mxu1 %v8978_v48 }
 0x4cc   : > { %8338 = vmatprep.subr.mxu1 %v10810_v2 }
 0x4ce   : > { %8885 = vmatpush1.bf16.msra.mxu0 %v8884_v13  ;;  %v12868_v13 = vand.u32 4294901760, %v10768_v12 }
 0x4cf   : > { %2667 = vmatprep.subr.mxu0 %v10838_v1  ;;  %8339 = vmatpush3.msra.mxu1 %v10810_v2  ;;  %v12839_v2 = vld [vmem:[#allocation14_spill] sm:$0xff] }
 0x4d0   : > { %8983 = vmatprep.subr.bf16.mxu1 %v10547_v15  ;;  %8341 = vmatmul.mubr.f32.vlgmr.msra.gmra.mrb[4].mxu1 %v10606_v54 }
 0x4d1   : > { %8985 = vmatpush3.bf16.msra.mxu1 %v10547_v15  ;;  %8361 = vmatprep.mubr.f32.mxu1 %v10534_v41 }
 0x4d2   : > { %2670 = vmatpush1.msra.mxu0 %v10861_v18  ;;  %8987 = vmatprep.subr.bf16.mxu1 %v10571_v9 }
 0x4d3   : > { %8887 = vmatprep.subr.bf16.mxu0 %v10553_v25  ;;  %2720 = vmatmul.mubr.f32.vlgmr.msra.gmra.mrb[2].mxu0 %v10530_v60  ;;  %v12843_v60 = vld [vmem:[#allocation5_spill] sm:$0xff] }
 0x4d4   : > { %8889 = vmatpush1.bf16.msra.mxu0 %v12838_v39  ;;  %2725 = vmatprep.mubr.f32.mxu0 %v12774_v45 }
 0x4d5   : > { %8891 = vmatprep.subr.bf16.mxu0 %v12839_v2  ;;  %8989 = vmatpush3.bf16.msra.mxu1 %v10571_v9 }
 0x4d6   : > { %8991 = vmatprep.subr.bf16.mxu1 %v12840_v46 }
 0x4d7   : > { %2728 = vmatmul.mubr.f32.gmra.mrb[4].mxu0 %v10606_v54  ;;  %v12845_v54 = vand.u32 4294901760, %v10574_v59  ;;  %v12852_v59 = vand.u32 4294901760, %v10609_v19  ;;  %v12857_v19 = vand.u32 4294901760, %v10731_v34  ;;  %v12864_v34 = vand.u32 4294901760, %v10746_v28 }
 0x4d8   : > { %8893 = vmatpush1.bf16.msra.mxu0 %v12841_v50  ;;  %2816 = vmatprep.mubr.f32.mxu0 %v12774_v45  ;;  %v12869_v28 = vand.u32 4294901760, %v10807_v49 }
 0x4d9   : > { %8895 = vmatprep.subr.bf16.mxu0 %v12842_v32  ;;  %8993 = vmatpush3.bf16.msra.mxu1 %v12840_v46  ;;  %v8998_v55 = vpack.c.bf16 %v12846_v3, %v12845_v54  ;;  %v8902_v44 = vpack.c.bf16 %v12852_v59, %v12851_v7  ;;  %v9006_v48 = vpack.c.bf16 %v12858_v0, %v12857_v19  ;;  %v11096_v7 = vld [vmem:[%s12568_s7 + $0x18] sm:$0xff] }
 0x4da   : > { %8995 = vmatprep.subr.bf16.mxu1 %v10735_v10  ;;  %v9010_v14 = vpack.c.bf16 %v12864_v34, %v12863_v27  ;;  %v8914_v54 = vpack.c.bf16 %v12868_v13, %v12867_v22  ;;  %v8916_v3 = vpack.c.bf16 %v12870_v56, %v12869_v28  ;;  %v11161_v13 = vld [vmem:[%s12568_s7 + $0xa0] sm:$0xff] }
 0x4dc   : > { %8897 = vmatpush1.bf16.msra.mxu0 %v12843_v60 }
 0x4dd   : > { %8899 = vmatprep.subr.bf16.mxu0 %v10741_v51  ;;  %8997 = vmatpush3.bf16.msra.mxu1 %v10735_v10 }
 0x4de   : > { %8359 = vmatprep.subr.mxu1 %v10779_v52 }
 0x4e0   : > { %8901 = vmatpush1.bf16.msra.mxu0 %v12844_v62 }
 0x4e1   : > { %2767 = vmatprep.subr.mxu0 %v12847_v43  ;;  %8360 = vmatpush3.msra.mxu1 %v10779_v52 }
 0x4e2   : > { %8999 = vmatprep.subr.bf16.mxu1 %v8998_v55  ;;  %8362 = vmatmul.mubr.f32.vlgmr.msra.gmra.mrb[4].mxu1 %v12848_v5 }
 0x4e3   : > { %9001 = vmatpush3.bf16.msra.mxu1 %v8998_v55  ;;  %8382 = vmatprep.mubr.f32.mxu1 %v10523_v16  ;;  %v11076_v55 = vld [vmem:[%s12568_s7 + $0x98] sm:$0xff] }
 0x4e4   : > { %2769 = vmatpush1.msra.mxu0 %v10799_v58  ;;  %9003 = vmatprep.subr.bf16.mxu1 %v9002_v29  ;;  %v3842_v33 = vand.u32 4294901760, %v11076_v55 }
 0x4e5   : > { %8903 = vmatprep.subr.bf16.mxu0 %v8902_v44  ;;  %2820 = vmatmul.mubr.f32.vlgmr.msra.gmra.mrb[2].mxu0 %v10534_v41  ;;  %v12860_v41 = vand.u32 4294901760, %v10716_v23  ;;  %v12866_v23 = vand.u32 4294901760, %v10764_v4 }
 0x4e6   : > { %8905 = vmatpush1.bf16.msra.mxu0 %v8904_v24  ;;  %2825 = vmatprep.mubr.f32.mxu0 %v12774_v45  ;;  %v11113_v63 = vsub.f32 %v11076_v55, %v3842_v33 }
 0x4e7   : > { %8907 = vmatprep.subr.bf16.mxu0 %v8906_v20  ;;  %9005 = vmatpush3.bf16.msra.mxu1 %v9002_v29  ;;  %v8908_v38 = vpack.c.bf16 %v12860_v41, %v12859_v40  ;;  %v8912_v35 = vpack.c.bf16 %v12866_v23, %v12865_v6  ;;  %v11091_v29 = vld [vmem:[%s12568_s7 + $0x10] sm:$0xff]  ;;  %v3794_v20 = vand.u32 4294901760, %v11096_v7 }
 0x4e8   : > { %9007 = vmatprep.subr.bf16.mxu1 %v9006_v48  ;;  %v3791_v42 = vand.u32 4294901760, %v11091_v29  ;;  %v12636_v26 = vand.u32 4294901760, %v11113_v63 }
 0x4e9   : > { %2829 = vmatmul.mubr.f32.gmra.mrb[4].mxu0 %v12848_v5  ;;  %v11136_v11 = vsub.f32 %v11096_v7, %v3794_v20 }
 0x4ea   : > { %8909 = vmatpush1.bf16.msra.mxu0 %v8908_v38  ;;  %2953 = vmatprep.mubr.f32.mxu0 %v12774_v45  ;;  %v11122_v40 = vsub.f32 %v11091_v29, %v3791_v42 }
 0x4eb   : > { %8911 = vmatprep.subr.bf16.mxu0 %v8910_v37  ;;  %9009 = vmatpush3.bf16.msra.mxu1 %v9006_v48  ;;  %v12634_v22 = vand.u32 4294901760, %v11136_v11 }
 0x4ec   : > { %9011 = vmatprep.subr.bf16.mxu1 %v9010_v14 }
 0x4ee   : > { %8913 = vmatpush1.bf16.msra.mxu0 %v8912_v35  ;;  %v4048_v35 = vsub.f32 %v11113_v63, %v12636_v26 }
 0x4ef   : > { %8915 = vmatprep.subr.bf16.mxu0 %v8914_v54  ;;  %9013 = vmatpush3.bf16.msra.mxu1 %v9010_v14  ;;  %v12635_v14 = vand.u32 4294901760, %v11122_v40 }
 0x4f0   : > { %8380 = vmatprep.subr.mxu1 %v10848_v53 }
 0x4f2   : > { %8917 = vmatpush1.bf16.msra.mxu0 %v8916_v3  ;;  %v3929_v3 = vsub.f32 %v11122_v40, %v12635_v14  ;;  %v11298_v14 = vld [vmem:[%s12568_s7 + $0x40] sm:$0xff] }
 0x4f3   : > { %2902 = vmatprep.subr.mxu0 %v2546_v30  ;;  %8381 = vmatpush3.msra.mxu1 %v10848_v53 }
 0x4f4   : > { %9015 = vmatprep.subr.bf16.mxu1 %v10547_v15  ;;  %8383 = vmatmul.mubr.f32.vlgmr.msra.gmra.mrb[4].mxu1 %v10578_v57 }
 0x4f5   : > { %9017 = vmatpush3.bf16.msra.mxu1 %v10547_v15  ;;  %8403 = vmatprep.mubr.f32.mxu1 %v10523_v16 }
 0x4f6   : > { %2906 = vmatpush1.msra.mxu0 %v2552_v47  ;;  %9019 = vmatprep.subr.bf16.mxu1 %v10571_v9  ;;  %v3748_v47 = vld [vmem:[%s12568_s7 + $0x80] sm:$0xff] }
 0x4f7   : > { %8919 = vmatprep.subr.bf16.mxu0 %v10553_v25  ;;  %2955 = vmatmul.mubr.f32.vlgmr.msra.gmra.mrb[2].mxu0 %v10523_v16  ;;  %v2239_v25 = vpop.permute.xlu0 %2238 }
 0x4f8   : > { %8921 = vmatpush1.bf16.msra.mxu0 %v12838_v39  ;;  %2960 = vmatprep.mubr.f32.mxu0 %v12774_v45  ;;  %v3749_v39 = vld [vmem:[%s12568_s7 + $0x88] sm:$0xff] }
 0x4f9   : > { %8923 = vmatprep.subr.bf16.mxu0 %v12839_v2  ;;  %9021 = vmatpush3.bf16.msra.mxu1 %v10571_v9  ;;  %v11060_v2 = vld [vmem:[%s12568_s7] sm:$0xff] }
 0x4fa   : > { %9023 = vmatprep.subr.bf16.mxu1 %v12840_v46 }
 0x4fb   : > { %2962 = vmatmul.mubr.f32.gmra.mrb[4].mxu0 %v10578_v57 }
 0x4fc   : > { %8925 = vmatpush1.bf16.msra.mxu0 %v12841_v50  ;;  %3050 = vmatprep.mubr.f32.mxu0 %v12774_v45  ;;  %v3836_v50 = vand.u32 4294901760, %v3749_v39 }
 0x4fd   : > { %8927 = vmatprep.subr.bf16.mxu0 %v12842_v32  ;;  %9025 = vmatpush3.bf16.msra.mxu1 %v12840_v46  ;;  %v3833_v46 = vand.u32 4294901760, %v3748_v47  ;;  %v11065_v32 = vld [vmem:[%s12568_s7 + $0x8] sm:$0xff] }
 0x4fe   : > { %9027 = vmatprep.subr.bf16.mxu1 %v10735_v10  ;;  %v3788_v5 = vand.u32 4294901760, %v11065_v32  ;;  %v11100_v44 = vsub.f32 %v3749_v39, %v3836_v50 }
 0x4ff   : > { %v11098_v59 = vsub.f32 %v3748_v47, %v3833_v46  ;;  %v3930_v47 = vand.u32 4294901760, %v3929_v3  ;;  %v11184_v39 = vpack.c.bf16 %v3836_v50, %v3833_v46 }
 0x500   : > { %8929 = vmatpush1.bf16.msra.mxu0 %v12843_v60  ;;  %v3785_v60 = vand.u32 4294901760, %v11060_v2  ;;  %v11107_v24 = vsub.f32 %v11065_v32, %v3788_v5  ;;  %v12642_v0 = vand.u32 4294901760, %v11100_v44  ;;  %v11190_v32 = vld [vmem:[%s12568_s7 + $0xb0] sm:$0xff] }
 0x501   : > { %8931 = vmatprep.subr.bf16.mxu0 %v10741_v51  ;;  %9029 = vmatpush3.bf16.msra.mxu1 %v10735_v10  ;;  %v12644_v19 = vand.u32 4294901760, %v11098_v59 }
 0x502   : > { %8401 = vmatprep.subr.mxu1 %v10779_v52  ;;  %v11103_v36 = vsub.f32 %v11060_v2, %v3785_v60  ;;  %v12638_v41 = vand.u32 4294901760, %v11107_v24  ;;  %v4034_v27 = vsub.f32 %v11100_v44, %v12642_v0  ;;  %v3845_v2 = vand.u32 4294901760, %v11161_v13 }
 0x503   : > { %v4027_v37 = vsub.f32 %v11098_v59, %v12644_v19  ;;  %v11202_v50 = vpack.c.bf16 %v3788_v5, %v3785_v60 }
 0x504   : > { %8933 = vmatpush1.bf16.msra.mxu0 %v12844_v62  ;;  %v11071_v62 = vld [vmem:[%s12568_s7 + $0x90] sm:$0xff]  ;;  %v12641_v48 = vand.u32 4294901760, %v11103_v36  ;;  %v3922_v6 = vsub.f32 %v11107_v24, %v12638_v41  ;;  %v4035_v28 = vand.u32 4294901760, %v4034_v27  ;;  %v11200_v46 = vsub.f32 %v11161_v13, %v3845_v2 }
 0x505   : > { %3001 = vmatprep.subr.mxu0 %v12847_v43  ;;  %8402 = vmatpush3.msra.mxu1 %v10779_v52  ;;  %v3839_v31 = vand.u32 4294901760, %v11071_v62  ;;  %v4028_v54 = vand.u32 4294901760, %v4027_v37  ;;  %v3851_v13 = vand.u32 4294901760, %v11190_v32 }
 0x506   : > { %8404 = vmatmul.mubr.f32.vlgmr.msra.gmra.mrb[4].mxu1 %v10578_v57  ;;  %v3915_v34 = vsub.f32 %v11103_v36, %v12641_v48  ;;  %v12632_v60 = vand.u32 4294901760, %v11200_v46 }
 0x507   : > { %v11110_v8 = vsub.f32 %v11071_v62, %v3839_v31 }
 0x508   : > { %3003 = vmatpush1.msra.mxu0 %v10799_v58  ;;  %v3916_v56 = vand.u32 4294901760, %v3915_v34  ;;  %v11196_v34 = vld [vmem:[%s12568_s7 + $0xb8] sm:$0xff] }
 0x509   : > { %3052 = vmatmul.mubr.f32.vlgmr.msra.gmra.mrb[2].mxu0 %v10523_v16  ;;  %v12637_v38 = vand.u32 4294901760, %v11110_v8  ;;  %9031 = vmatprep.subr.bf16.mxu0 %v11184_v39 }
 0x50a   : > { %3057 = vmatprep.mubr.f32.mxu0 %v12774_v45  ;;  %9033 = vmatpush3.bf16.msra.mxu0 %v11202_v50 }
 0x50b   : > { %v4041_v23 = vsub.f32 %v11110_v8, %v12637_v38 }
 0x50d   : > { %3059 = vmatmul.mubr.f32.gmra.mrb[4].mxu0 %v10578_v57 }
 0x5d9   : > { %v8405_v15 = vpop.f32.mrb[4].mxu1 }
 0x5da   : > { %v3648_v9 = vpop.f32.mrb[5].mxu1  ;;  %v11036_v16 = vadd.f32 %v8405_v15, %v2244_v61  ;;  %v11169_v15 = vld [vmem:[%s12568_s7 + $0xa8] sm:$0xff] }
 0x5db   : > { %v11028_v51 = vadd.f32 %v3648_v9, %v2239_v25  ;;  %v4042_v9 = vand.u32 4294901760, %v4041_v23  ;;  %v3848_v27 = vand.u32 4294901760, %v11169_v15 }
 0x5dc   : > { %v3053_v10 = vpop.f32.mrb[2].mxu0  ;;  %v12649_v53 = vmax.f32 %v11036_v16, 0.0 }
 0x5dd   : > { %v3660_v4 = vmax.f32 %v11028_v51, 0.0  ;;  %v3055_v12 = vpop.f32.mrb[3].mxu0  ;;  %v11038_v17 = vadd.f32 %v3053_v10, %v2239_v25  ;;  %v4049_v10 = vand.u32 4294901760, %v4048_v35  ;;  %v11209_v35 = vld [vmem:[%s12568_s7 + $0x30] sm:$0xff] }
 0x5de   : > { %v11031_v52 = vadd.f32 %v3055_v12, %v2239_v25  ;;  %v3923_v25 = vand.u32 4294901760, %v3922_v6  ;;  %v11177_v12 = vld [vmem:[%s12568_s7 + $0x20] sm:$0xff] }
 0x5df   : > { %3674 = vrot.lane.b32.xlu1 %v3660_v4, %s9698_s16  ;;  %v12653_v18 = vmax.f32 %v11038_v17, 0.0  ;;  %v9066_v55 = vpack.c.bf16 %v4049_v10, %v4042_v9  ;;  %v3797_v6 = vand.u32 4294901760, %v11177_v12  ;;  %v11242_v9 = vpack.c.bf16 %v3794_v20, %v3791_v42 }
 0x5e0   : > { %v3659_v57 = vmax.f32 %v11031_v52, 0.0  ;;  %v3060_v21 = vpop.f32.mrb[4].mxu0  ;;  %v9064_v62 = vpack.c.bf16 %v3923_v25, %v3916_v56  ;;  %v11214_v56 = vpack.c.bf16 %v3842_v33, %v3839_v31  ;;  %v3854_v25 = vand.u32 4294901760, %v11196_v34  ;;  %v11229_v31 = vld [vmem:[%s12568_s7 + $0x38] sm:$0xff] }
 0x5e1   : > { %v3062_v58 = vpop.f32.mrb[5].mxu0  ;;  %v11041_v49 = vadd.f32 %v3060_v21, %v2244_v61  ;;  %v11182_v21 = vld [vmem:[%s12568_s7 + $0x28] sm:$0xff]  ;;  %v11220_v5 = vsub.f32 %v11177_v12, %v3797_v6  ;;  %v3803_v10 = vand.u32 4294901760, %v11209_v35  ;;  %v3806_v42 = vand.u32 4294901760, %v11229_v31 }
 0x5e2   : > { %v11043_v1 = vadd.f32 %v3062_v58, %v2244_v61  ;;  %3672 = vrot.lane.b32.xlu0 %v3659_v57, %s9698_s16  ;;  %v3936_v61 = vsub.f32 %v11136_v11, %v12634_v22  ;;  %v9062_v58 = vpack.c.bf16 %v4035_v28, %v4028_v54  ;;  %v3800_v23 = vand.u32 4294901760, %v11182_v21  ;;  %9035 = vmatprep.subr.bf16.mxu0 %v11214_v56 }
 0x5e3   : > { %v12647_v43 = vmax.f32 %v11041_v49, 0.0  ;;  %v11212_v28 = vsub.f32 %v11169_v15, %v3848_v27  ;;  %v11236_v15 = vsub.f32 %v11190_v32, %v3851_v13  ;;  %v12631_v12 = vand.u32 4294901760, %v11220_v5  ;;  %9037 = vmatpush3.bf16.msra.mxu0 %v11242_v9 }
 0x5e4   : > { %v12648_v30 = vmax.f32 %v11043_v1, 0.0  ;;  %v3937_v37 = vand.u32 4294901760, %v3936_v61  ;;  %9063 = vmatprep.subr.bf16.mxu1 %v9062_v58  ;;  %v11223_v3 = vsub.f32 %v11182_v21, %v3800_v23  ;;  %v4055_v61 = vsub.f32 %v11200_v46, %v12632_v60 }
 0x5e5   : > { %9065 = vmatpush3.bf16.msra.mxu1 %v9064_v62  ;;  %v12629_v33 = vand.u32 4294901760, %v11212_v28  ;;  %12871 = vst [vmem:[#allocation8_spill] sm:$0xff] %v11236_v15  ;;  %v11251_v58 = vsub.f32 %v11196_v34, %v3854_v25  ;;  %v12633_v7 = vand.u32 4294901760, %v11236_v15  ;;  %v11261_v20 = vsub.f32 %v11209_v35, %v3803_v10 }
 0x5e6   : > { %3670 = vrot.lane.b32.xlu0 %v12653_v18, %s9698_s16  ;;  %3678 = vrot.lane.b32.xlu1 %v12648_v30, %s9698_s16  ;;  %v9068_v54 = vpack.c.bf16 %v3937_v37, %v3930_v47  ;;  %v12630_v21 = vand.u32 4294901760, %v11223_v3  ;;  %v4056_v47 = vand.u32 4294901760, %v4055_v61  ;;  %v3943_v62 = vsub.f32 %v11220_v5, %v12631_v12 }
 0x5e7   : > { %9067 = vmatprep.subr.bf16.mxu1 %v9066_v55  ;;  %12872 = vst [vmem:[#allocation11_spill] sm:$0xff] %v11251_v58  ;;  %v4062_v29 = vsub.f32 %v11212_v28, %v12629_v33  ;;  %12873 = vst [vmem:[#allocation15_spill] sm:$0xff] %v11261_v20  ;;  %v12639_v37 = vand.u32 4294901760, %v11251_v58  ;;  %v12640_v33 = vand.u32 4294901760, %v11261_v20  ;;  %v11278_v61 = vsub.f32 %v11229_v31, %v3806_v42 }
 0x5e8   : > { %v3950_v55 = vsub.f32 %v11223_v3, %v12630_v21  ;;  %v11283_v21 = vld [vmem:[%s12568_s7 + $0xc0] sm:$0xff]  ;;  %v3944_v12 = vand.u32 4294901760, %v3943_v62  ;;  %v11293_v22 = vpack.c.bf16 %v3848_v27, %v3845_v2  ;;  %v11320_v48 = vpack.c.bf16 %v3800_v23, %v3797_v6 }
 0x5e9   : > { %9069 = vmatpush3.bf16.msra.mxu1 %v9068_v54  ;;  %v4063_v34 = vand.u32 4294901760, %v4062_v29  ;;  %v4069_v54 = vsub.f32 %v11236_v15, %v12633_v7  ;;  %12874 = vst [vmem:[#allocation16_spill] sm:$0xff] %v11278_v61  ;;  %v11288_v29 = vld [vmem:[%s12568_s7 + $0xc8] sm:$0xff]  ;;  %v4076_v7 = vsub.f32 %v11251_v58, %v12639_v37  ;;  %v3957_v41 = vsub.f32 %v11261_v20, %v12640_v33 }
 0x5ea   : > { %3680 = vrot.lane.b32.xlu0 %v12649_v53, %s9698_s16  ;;  %3676 = vrot.lane.b32.xlu1 %v12647_v43, %s9698_s16  ;;  %v3951_v60 = vand.u32 4294901760, %v3950_v55  ;;  %v12643_v62 = vand.u32 4294901760, %v11278_v61  ;;  %v11307_v55 = vld [vmem:[%s12568_s7 + $0x48] sm:$0xff]  ;;  %v3857_v37 = vand.u32 4294901760, %v11283_v21  ;;  %v11341_v23 = vpack.c.bf16 %v3854_v25, %v3851_v13 }
 0x5eb   : > { %v9070_v26 = vpack.c.bf16 %v4063_v34, %v4056_v47  ;;  %v4070_v38 = vand.u32 4294901760, %v4069_v54  ;;  %v4077_v27 = vand.u32 4294901760, %v4076_v7  ;;  %9039 = vmatprep.subr.bf16.mxu0 %v11293_v22  ;;  %v3860_v47 = vand.u32 4294901760, %v11288_v29  ;;  %v11315_v34 = vld [vmem:[%s12568_s7 + $0xd0] sm:$0xff] }
 0x5ec   : > { %v9072_v2 = vpack.c.bf16 %v3951_v60, %v3944_v12  ;;  %v3958_v54 = vand.u32 4294901760, %v3957_v41  ;;  %v3964_v33 = vsub.f32 %v11278_v61, %v12643_v62  ;;  %v3809_v60 = vand.u32 4294901760, %v11298_v14  ;;  %v11326_v12 = vld [vmem:[%s12568_s7 + $0xd8] sm:$0xff]  ;;  %9041 = vmatpush3.bf16.msra.mxu0 %v11320_v48 }
 0x5ed   : > { %9071 = vmatprep.subr.bf16.mxu1 %v9070_v26  ;;  %v9074_v7 = vpack.c.bf16 %v4077_v27, %v4070_v38  ;;  %v11329_v0 = vsub.f32 %v11283_v21, %v3857_v37  ;;  %v11332_v41 = vsub.f32 %v11288_v29, %v3860_v47  ;;  %v3812_v26 = vand.u32 4294901760, %v11307_v55  ;;  %9043 = vmatprep.subr.bf16.mxu0 %v11341_v23 }
 0x5ee   : > { %9073 = vmatpush3.bf16.msra.mxu1 %v9072_v2  ;;  %v3965_v62 = vand.u32 4294901760, %v3964_v33  ;;  %v11337_v6 = vsub.f32 %v11298_v14, %v3809_v60  ;;  %v12652_v38 = vand.u32 4294901760, %v11315_v34  ;;  %v12650_v33 = vand.u32 4294901760, %v11326_v12 }
 0x5ef   : > { %12875 = vst [vmem:[#allocation12_spill] sm:$0xff] %v11329_v0  ;;  %12876 = vst [vmem:[#allocation17_spill] sm:$0xff] %v11332_v41  ;;  %9075 = vmatprep.subr.bf16.mxu1 %v9074_v7  ;;  %v12645_v21 = vand.u32 4294901760, %v11329_v0  ;;  %v12646_v29 = vand.u32 4294901760, %v11332_v41  ;;  %v11347_v2 = vsub.f32 %v11307_v55, %v3812_v26 }
 0x5f0   : > { %12877 = vst [vmem:[#allocation18_spill] sm:$0xff] %v11337_v6  ;;  %v9076_v27 = vpack.c.bf16 %v3965_v62, %v3958_v54  ;;  %v12651_v14 = vand.u32 4294901760, %v11337_v6  ;;  %v11355_v32 = vsub.f32 %v11315_v34, %v12652_v38  ;;  %v11367_v62 = vsub.f32 %v11326_v12, %v12650_v33 }
 0x5f1   : > { %12878 = vst [vmem:[#allocation10_spill] sm:$0xff] %v11347_v2  ;;  %v4083_v13 = vsub.f32 %v11329_v0, %v12645_v21  ;;  %v4090_v25 = vsub.f32 %v11332_v41, %v12646_v29  ;;  %v12656_v55 = vand.u32 4294901760, %v11347_v2 }
 0x5f2   : > { %12879 = vst [vmem:[#allocation14_spill] sm:$0xff] %v11355_v32  ;;  %12880 = vst [vmem:[#allocation9_spill] sm:$0xff] %v11367_v62  ;;  %9077 = vmatpush3.bf16.msra.mxu1 %v9076_v27  ;;  %v3971_v54 = vsub.f32 %v11337_v6, %v12651_v14  ;;  %v12655_v7 = vand.u32 4294901760, %v11355_v32  ;;  %v12654_v43 = vand.u32 4294901760, %v11367_v62 }
 0x5f3   : > { %v4084_v19 = vand.u32 4294901760, %v4083_v13  ;;  %v4091_v21 = vand.u32 4294901760, %v4090_v25  ;;  %v3978_v29 = vsub.f32 %v11347_v2, %v12656_v55 }
 0x5f4   : > { %v3972_v30 = vand.u32 4294901760, %v3971_v54  ;;  %v4097_v53 = vsub.f32 %v11355_v32, %v12655_v7  ;;  %v4104_v14 = vsub.f32 %v11367_v62, %v12654_v43  ;;  %v11387_v54 = vpack.c.bf16 %v3806_v42, %v3803_v10  ;;  %v11417_v42 = vld [vmem:[%s12568_s7 + $0xe0] sm:$0xff] }
 0x5f5   : > { %v9078_v27 = vpack.c.bf16 %v4091_v21, %v4084_v19  ;;  %v3979_v33 = vand.u32 4294901760, %v3978_v29  ;;  %v11392_v19 = vld [vmem:[%s12568_s7 + $0x50] sm:$0xff]  ;;  %v11412_v10 = vpack.c.bf16 %v3860_v47, %v3857_v37  ;;  %v11424_v21 = vpack.c.bf16 %v3812_v26, %v3809_v60  ;;  %v11429_v29 = vld [vmem:[%s12568_s7 + $0x60] sm:$0xff] }
 0x5f6   : > { %v4098_v38 = vand.u32 4294901760, %v4097_v53  ;;  %v4105_v25 = vand.u32 4294901760, %v4104_v14  ;;  %v11397_v53 = vld [vmem:[%s12568_s7 + $0x58] sm:$0xff]  ;;  %9045 = vmatpush3.bf16.msra.mxu0 %v11387_v54  ;;  %v12659_v14 = vand.u32 4294901760, %v11417_v42  ;;  %v12665_v26 = vand.u32 4294901760, %v11429_v29 }
 0x5f7   : > { %9079 = vmatprep.subr.bf16.mxu1 %v9078_v27  ;;  %v9080_v13 = vpack.c.bf16 %v3979_v33, %v3972_v30  ;;  %v12662_v30 = vand.u32 4294901760, %v11392_v19  ;;  %12881 = vst [vmem:[#allocation13_spill] sm:$0xff] %v11412_v10  ;;  %12882 = vst [vmem:[#allocation4_spill] sm:$0xff] %v11424_v21  ;;  %9047 = vmatprep.subr.bf16.mxu0 %v11412_v10  ;;  %v12887_v10 = vand.u32 4294901760, %v11315_v34 }
 0x5f8   : > { %v9082_v18 = vpack.c.bf16 %v4105_v25, %v4098_v38  ;;  %v11422_v38 = vld [vmem:[%s12568_s7 + $0xe8] sm:$0xff]  ;;  %v11456_v51 = vsub.f32 %v11417_v42, %v12659_v14 }
 0x5f9   : > { %9081 = vmatpush3.bf16.msra.mxu1 %v9080_v13  ;;  %v11405_v35 = vsub.f32 %v11392_v19, %v12662_v30  ;;  %v12660_v27 = vand.u32 4294901760, %v11422_v38  ;;  %v11438_v13 = vld [vmem:[%s12568_s7 + $0x68] sm:$0xff] }
 0x5fa   : > { %9083 = vmatprep.subr.bf16.mxu1 %v9082_v18  ;;  %v12661_v18 = vand.u32 4294901760, %v11397_v53  ;;  %v12668_v25 = vand.u32 4294901760, %v11438_v13  ;;  %9049 = vmatpush3.bf16.msra.mxu0 %v11424_v21  ;;  %v12671_v30 = vand.u32 4294901760, %v11456_v51  ;;  %v12886_v21 = vmax.f32 %v11038_v17, 0.0 }
 0x5fb   : > { %v12658_v37 = vand.u32 4294901760, %v11405_v35 }
 0x5fc   : > { %v11410_v31 = vsub.f32 %v11397_v53, %v12661_v18  ;;  %v4111_v52 = vsub.f32 %v11456_v51, %v12671_v30 }
 0x5fd   : > { %v3985_v43 = vsub.f32 %v11405_v35, %v12658_v37  ;;  %v11474_v37 = vsub.f32 %v11438_v13, %v12668_v25  ;;  %v3762_v25 = vld [vmem:[%s12568_s7 + $0xf0] sm:$0xff] }
 0x5fe   : > { %v12657_v47 = vand.u32 4294901760, %v11410_v31  ;;  %v4112_v0 = vand.u32 4294901760, %v4111_v52  ;;  %v12890_v52 = vand.u32 4294901760, %v11397_v53  ;;  %v12893_v53 = vmax.f32 %v11043_v1, 0.0 }
 0x5ff   : > { %v12885_v30 = vand.u32 4294901760, %v11474_v37  ;;  %v12896_v1 = vand.u32 4294901760, %v11429_v29 }
 0x600   : > { %v3992_v7 = vsub.f32 %v11410_v31, %v12657_v47  ;;  %v11469_v47 = vsub.f32 %v11429_v29, %v12665_v26 }
 0x601   : > { %v4006_v2 = vsub.f32 %v11474_v37, %v12885_v30 }
 0x602   : > { %v3993_v18 = vand.u32 4294901760, %v3992_v7 }
 0x603   : > { %v4007_v30 = vand.u32 4294901760, %v4006_v2 }
 0x651   : > { %v3675_v33 = vpop.permute.xlu1 %3674 }
 0x652   : > { %v11442_v60 = vmax.f32 %v3660_v4, %v3675_v33  ;;  %v11461_v4 = vsub.f32 %v11422_v38, %v12660_v27  ;;  %v3986_v27 = vand.u32 4294901760, %v3985_v43  ;;  %v3763_v43 = vld [vmem:[%s12568_s7 + $0xf8] sm:$0xff] }
 0x654   : > { %12883 = vst [vmem:[#allocation5_spill] sm:$0xff] %v11442_v60  ;;  %v3673_v55 = vpop.permute.xlu0 %3672  ;;  %3708 = vrot.lane.b32.xlu1 %v11442_v60, %s9702_s20  ;;  %v12684_v60 = vand.u32 4294901760, %v11461_v4  ;;  %v9084_v7 = vpack.c.bf16 %v3993_v18, %v3986_v27  ;;  %v12884_v18 = vand.u32 4294901760, %v11469_v47 }
 0x655   : > { %v3683_v14 = vsel %vm484_vm1, %v3673_v55, %v3675_v33  ;;  %v3878_v33 = vand.u32 4294901760, %v3763_v43 }
 0x656   : > { %v11480_v45 = vmax.f32 %v3659_v57, %v3683_v14  ;;  %v3875_v57 = vand.u32 4294901760, %v3762_v25  ;;  %v3746_v14 = vld [vmem:[%s12568_s7 + $0x70] sm:$0xff]  ;;  %v4118_v32 = vsub.f32 %v11461_v4, %v12684_v60  ;;  %v3999_v27 = vsub.f32 %v11469_v47, %v12884_v18  ;;  %9085 = vmatpush3.bf16.msra.mxu1 %v9084_v7  ;;  %v3747_v60 = vld [vmem:[%s12568_s7 + $0x78] sm:$0xff] }
 0x657   : > { %v3827_v6 = vand.u32 4294901760, %v3746_v14  ;;  %v11511_v20 = vsub.f32 %v3763_v43, %v3878_v33  ;;  %v12889_v7 = vand.u32 4294901760, %v11392_v19 }
 0x658   : > { %v3671_v62 = vpop.permute.xlu0 %3670  ;;  %3706 = vrot.lane.b32.xlu0 %v11480_v45, %s9702_s20  ;;  %v3679_v26 = vpop.permute.xlu1 %3678  ;;  %v11509_v61 = vsub.f32 %v3762_v25, %v3875_v57  ;;  %v4119_v58 = vand.u32 4294901760, %v4118_v32  ;;  %v4000_v15 = vand.u32 4294901760, %v3999_v27  ;;  %v12891_v27 = vmax.f32 %v11036_v16, 0.0 }
 0x659   : > { %v3682_v41 = vsel %vm484_vm1, %v3671_v62, %v3673_v55  ;;  %v12888_v55 = vand.u32 4294901760, %v11326_v12  ;;  %v4131_v43 = vand.u32 4294901760, %v11511_v20  ;;  %v11532_v17 = vpack.c.bf16 %v12890_v52, %v12889_v7 }
 0x65a   : > { %v11518_v18 = vmax.f32 %v12886_v21, %v3682_v41  ;;  %v4124_v25 = vand.u32 4294901760, %v11509_v61  ;;  %v9086_v34 = vpack.c.bf16 %v4119_v58, %v4112_v0  ;;  %v9088_v32 = vpack.c.bf16 %v4007_v30, %v4000_v15 }
 0x65b   : > { %v11524_v62 = vpack.c.bf16 %v12888_v55, %v12887_v10  ;;  %v3830_v12 = vand.u32 4294901760, %v3747_v60  ;;  %v11536_v10 = vsub.f32 %v3746_v14, %v3827_v6  ;;  %v4132_v0 = vsub.f32 %v11511_v20, %v4131_v43 }
 0x65c   : > { %v3681_v41 = vpop.permute.xlu0 %3680  ;;  %3704 = vrot.lane.b32.xlu0 %v11518_v18, %s9702_s20  ;;  %v3677_v2 = vpop.permute.xlu1 %3676  ;;  %v4125_v19 = vsub.f32 %v11509_v61, %v4124_v25  ;;  %9087 = vmatprep.subr.bf16.mxu1 %v9086_v34  ;;  %v12894_v14 = vand.u32 4294901760, %v11417_v42  ;;  %v12895_v30 = vand.u32 4294901760, %v11422_v38  ;;  %v12898_v38 = vmax.f32 %v11041_v49, 0.0 }
 0x65d   : > { %v3685_v21 = vsel %vm484_vm1, %v3679_v26, %v3681_v41  ;;  %v11541_v55 = vmax.f32 %v12891_v27, %v3681_v41  ;;  %9051 = vmatprep.subr.bf16.mxu0 %v11524_v62  ;;  %v3684_v52 = vsel %vm484_vm1, %v3677_v2, %v3679_v26  ;;  %v4012_v15 = vand.u32 4294901760, %v11536_v10  ;;  %9089 = vmatpush3.bf16.msra.mxu1 %v9088_v32 }
 0x65e   : > { %v3696_v7 = vmax.f32 %v12893_v53, %v3685_v21  ;;  %9053 = vmatpush3.bf16.msra.mxu0 %v11532_v17  ;;  %v4126_v16 = vand.u32 4294901760, %v4125_v19  ;;  %v11551_v58 = vsub.f32 %v3747_v60, %v3830_v12  ;;  %v11557_v41 = vpack.c.bf16 %v12895_v30, %v12894_v14 }
 0x65f   : > { %12892 = vst [vmem:[#allocation6_spill] sm:$0xff] %v11541_v55  ;;  %v12897_v26 = vand.u32 4294901760, %v11438_v13  ;;  %v4133_v34 = vand.u32 4294901760, %v4132_v0  ;;  %v4013_v60 = vsub.f32 %v11536_v10, %v4012_v15  ;;  %v11569_v32 = vpack.c.bf16 %v3878_v33, %v3875_v57 }
 0x660   : > { %3714 = vrot.lane.b32.xlu0 %v11541_v55, %s9702_s20  ;;  %3712 = vrot.lane.b32.xlu1 %v3696_v7, %s9702_s20  ;;  %v4019_v42 = vand.u32 4294901760, %v11551_v58  ;;  %v3695_v29 = vmax.f32 %v12898_v38, %v3684_v52  ;;  %v11576_v21 = vpack.c.bf16 %v3830_v12, %v3827_v6  ;;  %v9094_v57 = vpack.c.bf16 %v11100_v44, %v11098_v59 }
 0x661   : > { %v11563_v2 = vpack.c.bf16 %v12897_v26, %v12896_v1  ;;  %9055 = vmatprep.subr.bf16.mxu0 %v11557_v41  ;;  %v9090_v13 = vpack.c.bf16 %v4133_v34, %v4126_v16  ;;  %v4014_v27 = vand.u32 4294901760, %v4013_v60  ;;  %v12899_v16 = vand.u32 4294901760, %v11405_v35 }
 0x662   : > { %v4020_v19 = vsub.f32 %v11551_v58, %v4019_v42  ;;  %v12900_v14 = vand.u32 4294901760, %v11410_v31  ;;  %v12901_v1 = vand.u32 4294901760, %v11456_v51  ;;  %v12902_v26 = vand.u32 4294901760, %v11461_v4 }
 0x663   : > { %9057 = vmatpush3.bf16.msra.mxu0 %v11563_v2  ;;  %9091 = vmatprep.subr.bf16.mxu1 %v9090_v13  ;;  %v12903_v60 = vand.u32 4294901760, %v11469_v47  ;;  %v12904_v38 = vand.u32 4294901760, %v11474_v37  ;;  %vm3780_vm1 = vcmask 1043456  }
 0x664   : > { %9059 = vmatprep.subr.bf16.mxu0 %v11569_v32  ;;  %3710 = vrot.lane.b32.xlu1 %v3695_v29, %s9702_s20  ;;  %v4021_v33 = vand.u32 4294901760, %v4020_v19  ;;  %v11599_v30 = vpack.c.bf16 %v12900_v14, %v12899_v16  ;;  %v11605_v34 = vpack.c.bf16 %v12902_v26, %v12901_v1  ;;  %v11615_v19 = vpack.c.bf16 %v4019_v42, %v4012_v15  ;;  %s9722_s20 = smov 122  }
 0x665   : > { %v11611_v13 = vpack.c.bf16 %v12904_v38, %v12903_v60 }
 0x666   : > { %v9092_v49 = vpack.c.bf16 %v4021_v33, %v4014_v27  ;;  %v11613_v27 = vpack.c.bf16 %v4131_v43, %v4124_v25  ;;  %12907 = vst [vmem:[#allocation19_spill] sm:$0xff] %v11615_v19 }
 0x667   : > { %9061 = vmatpush3.bf16.msra.mxu0 %v11576_v21  ;;  %12905 = vst [vmem:[#allocation7_spill] sm:$0xff] %v11611_v13  ;;  %v12919_v13 = vld [vmem:[#allocation17_spill] sm:$0xff] }
 0x668   : > { %9095 = vmatprep.subr.bf16.mxu0 %v9094_v57  ;;  %9093 = vmatpush3.bf16.msra.mxu1 %v9092_v49  ;;  %12906 = vst [vmem:[#allocation3_spill] sm:$0xff] %v11613_v27  ;;  %v12917_v27 = vld [vmem:[#allocation16_spill] sm:$0xff] }
 0x669   : > { %9127 = vmatprep.subr.bf16.mxu1 %v11184_v39 }
 0x6c6   : > { %v11617_v57 = vpop.permute.xlu1 %3708 }
 0x6ca   : > { %v3707_v33 = vpop.permute.xlu0 %3706 }
 0x6cb   : > { %v3717_v49 = vsel %vm532_vm5, %v3707_v33, %v11617_v57 }
 0x6cc   : > { %v3727_v16 = vmax.f32 %v11480_v45, %v3717_v49 }
 0x6ce   : > { %v11622_v14 = vand.u32 4294901760, %v3727_v16  ;;  %v3705_v1 = vpop.permute.xlu0 %3704 }
 0x6cf   : > { %v3716_v26 = vsel %vm532_vm5, %v3705_v1, %v3707_v33 }
 0x6d0   : > { %v3881_v60 = vsub.f32 %v3727_v16, %v11622_v14  ;;  %v3726_v25 = vmax.f32 %v11518_v18, %v3716_v26  ;;  %4136 = vmatprep.mubr.f32.mxu1 %v11622_v14 }
 0x6d2   : > { %v11628_v43 = vand.u32 4294901760, %v3726_v25  ;;  %v11630_v15 = vpop.permute.xlu0 %3714  ;;  %v3713_v42 = vpop.permute.xlu1 %3712  ;;  %v3882_v38 = vand.u32 4294901760, %v3881_v60 }
 0x6d3   : > { %12909 = vst [vmem:[#allocation21_spill] sm:$0xff] %v11630_v15  ;;  %v3719_v45 = vsel %vm532_vm5, %v3713_v42, %v11630_v15 }
 0x6d4   : > { %12908 = vst [vmem:[#allocation20_spill] sm:$0xff] %v11628_v43  ;;  %v11635_v49 = vsub.f32 %v3726_v25, %v11628_v43  ;;  %v3730_v0 = vmax.f32 %v3696_v7, %v3719_v45  ;;  %4138 = vmatmul.mubr.f32.vlgmr.msra.gmra.mrb[6].mxu1 %v11628_v43  ;;  %v3883_v33 = vsub.f32 %v3881_v60, %v3882_v38 }
 0x6d5   : > { %9129 = vmatpush3.bf16.msra.mxu1 %v11202_v50  ;;  %v9096_v45 = vpack.c.bf16 %v11107_v24, %v11103_v36 }
 0x6d6   : > { %v3888_v18 = vand.u32 4294901760, %v11635_v49  ;;  %v11640_v16 = vand.u32 4294901760, %v3730_v0  ;;  %v3711_v1 = vpop.permute.xlu1 %3710  ;;  %9131 = vmatprep.subr.bf16.mxu1 %v11214_v56  ;;  %v3884_v26 = vand.u32 4294901760, %v3883_v33 }
 0x6d7   : > { %v3718_v52 = vsel %vm532_vm5, %v3711_v1, %v3713_v42  ;;  %v9098_v42 = vpack.c.bf16 %v11113_v63, %v11110_v8  ;;  %v9102_v1 = vpack.c.bf16 %v11212_v28, %v11200_v46  ;;  %vm7524_vm5 = vcmask 0  }
 0x6d8   : > { %12910 = vst [vmem:[#allocation22_spill] sm:$0xff] %v11640_v16  ;;  %v3889_v53 = vsub.f32 %v11635_v49, %v3888_v18  ;;  %v11646_v25 = vsub.f32 %v3730_v0, %v11640_v16  ;;  %v3729_v7 = vmax.f32 %v3695_v29, %v3718_v52  ;;  %3885 = vmatprep.mubr.f32.mxu0 %v3884_v26 }
 0x6d9   : > { %4143 = vmatprep.mubr.f32.mxu1 %v11640_v16  ;;  %9133 = vmatpush3.bf16.msra.mxu1 %v11242_v9 }
 0x6da   : > { %v3890_v12 = vand.u32 4294901760, %v3889_v53  ;;  %v11652_v6 = vand.u32 4294901760, %v3729_v7  ;;  %9135 = vmatprep.subr.bf16.mxu1 %v11293_v22  ;;  %v3897_v0 = vand.u32 4294901760, %v11646_v25  ;;  %v9100_v53 = vpack.c.bf16 %v11136_v11, %v11122_v40 }
 0x6dc   : > { %12911 = vst [vmem:[#allocation23_spill] sm:$0xff] %v11652_v6  ;;  %v11659_v29 = vsub.f32 %v3729_v7, %v11652_v6  ;;  %3891 = vmatmul.mubr.f32.vlgmr.msra.gmra.mrb[6].mxu0 %v3890_v12  ;;  %4145 = vmatmul.mubr.f32.gmra.mrb[8].mxu1 %v11652_v6  ;;  %v3898_v52 = vsub.f32 %v11646_v25, %v3897_v0  ;;  %v12915_v6 = vld [vmem:[#allocation4_spill] sm:$0xff] }
 0x6dd   : > { %9097 = vmatpush3.bf16.msra.mxu0 %v9096_v45  ;;  %9137 = vmatpush3.bf16.msra.mxu1 %v11320_v48  ;;  %v9104_v7 = vpack.c.bf16 %v11223_v3, %v11220_v5 }
 0x6de   : > { %4396 = vmatprep.mubr.f32.mxu1 %v3882_v38  ;;  %9099 = vmatprep.subr.bf16.mxu0 %v9098_v42  ;;  %v3899_v33 = vand.u32 4294901760, %v3898_v52  ;;  %v3903_v26 = vand.u32 4294901760, %v11659_v29  ;;  %v12912_v38 = vld [vmem:[#allocation13_spill] sm:$0xff]  ;;  %v12913_v42 = vld [vmem:[#allocation8_spill] sm:$0xff]  ;;  %v12914_v52 = vld [vmem:[#allocation11_spill] sm:$0xff] }
 0x6df   : > { %9139 = vmatprep.subr.bf16.mxu1 %v11341_v23  ;;  %v9106_v19 = vpack.c.bf16 %v12914_v52, %v12913_v42 }
 0x6e0   : > { %3900 = vmatprep.mubr.f32.mxu0 %v3899_v33  ;;  %v3904_v12 = vsub.f32 %v11659_v29, %v3903_v26  ;;  %v12916_v33 = vld [vmem:[#allocation15_spill] sm:$0xff] }
 0x6e1   : > { %9101 = vmatpush3.bf16.msra.mxu0 %v9100_v53  ;;  %9141 = vmatpush3.bf16.msra.mxu1 %v11387_v54  ;;  %v9108_v16 = vpack.c.bf16 %v12917_v27, %v12916_v33  ;;  %v12918_v53 = vld [vmem:[#allocation12_spill] sm:$0xff] }
 0x6e2   : > { %9103 = vmatprep.subr.bf16.mxu0 %v9102_v1  ;;  %9143 = vmatprep.subr.bf16.mxu1 %v12912_v38  ;;  %v3905_v45 = vand.u32 4294901760, %v3904_v12  ;;  %v9110_v43 = vpack.c.bf16 %v12919_v13, %v12918_v53  ;;  %v12920_v1 = vld [vmem:[#allocation18_spill] sm:$0xff] }
 0x6e3   : > { %v12921_v12 = vld [vmem:[#allocation10_spill] sm:$0xff] }
 0x6e4   : > { %3906 = vmatmul.mubr.f32.gmra.mrb[8].mxu0 %v3905_v45  ;;  %v9112_v55 = vpack.c.bf16 %v12921_v12, %v12920_v1  ;;  %v12923_v45 = vld [vmem:[#allocation9_spill] sm:$0xff] }
 0x6e5   : > { %9105 = vmatpush3.bf16.msra.mxu0 %v9104_v7  ;;  %9145 = vmatpush3.bf16.msra.mxu1 %v12915_v6  ;;  %v12922_v7 = vld [vmem:[#allocation14_spill] sm:$0xff] }
 0x6e6   : > { %4280 = vmatprep.mubr.f32.mxu0 %v3881_v60  ;;  %9107 = vmatprep.subr.bf16.mxu0 %v9106_v19  ;;  %v9114_v15 = vpack.c.bf16 %v12923_v45, %v12922_v7  ;;  %v12924_v19 = vpack.c.bf16 %v11410_v31, %v11405_v35  ;;  %v12925_v60 = vpack.c.bf16 %v11461_v4, %v11456_v51  ;;  %v12928_v31 = vand.u32 4294901760, %v11098_v59 }
 0x6e7   : > { %9147 = vmatprep.subr.bf16.mxu1 %v11524_v62  ;;  %v12927_v35 = vpack.c.bf16 %v11511_v20, %v11509_v61  ;;  %v12933_v59 = vand.u32 4294901760, %v11110_v8  ;;  %v12937_v8 = vand.u32 4294901760, %v11200_v46  ;;  %v12942_v46 = vand.u32 4294901760, %v12914_v52 }
 0x6e9   : > { %9109 = vmatpush3.bf16.msra.mxu0 %v9108_v16  ;;  %9149 = vmatpush3.bf16.msra.mxu1 %v11532_v17 }
 0x6ea   : > { %9111 = vmatprep.subr.bf16.mxu0 %v9110_v43  ;;  %9151 = vmatprep.subr.bf16.mxu1 %v11557_v41  ;;  %v12929_v43 = vand.u32 4294901760, %v11100_v44  ;;  %v12934_v44 = vand.u32 4294901760, %v11113_v63  ;;  %v12938_v63 = vand.u32 4294901760, %v11212_v28 }
 0x6ec   : > { %v9158_v51 = vpack.c.bf16 %v12929_v43, %v12928_v31  ;;  %v3770_v31 = vld [vmem:[%s12568_s7 + $0x130] sm:$0xff]  ;;  %v3771_v43 = vld [vmem:[%s12568_s7 + $0x138] sm:$0xff] }
 0x6ed   : > { %9113 = vmatpush3.bf16.msra.mxu0 %v9112_v55  ;;  %9153 = vmatpush3.bf16.msra.mxu1 %v11563_v2  ;;  %v12926_v55 = vpack.c.bf16 %v11474_v37, %v11469_v47  ;;  %v12932_v37 = vand.u32 4294901760, %v11107_v24  ;;  %v12936_v24 = vand.u32 4294901760, %v11136_v11  ;;  %v12940_v11 = vand.u32 4294901760, %v11223_v3 }
 0x6ee   : > { %9115 = vmatprep.subr.bf16.mxu0 %v9114_v15  ;;  %9155 = vmatprep.subr.bf16.mxu1 %v11569_v32  ;;  %v12944_v47 = vand.u32 4294901760, %v12917_v27  ;;  %v12946_v3 = vand.u32 4294901760, %v12919_v13  ;;  %v12949_v27 = vand.u32 4294901760, %v12921_v12  ;;  %v12951_v13 = vand.u32 4294901760, %v12923_v45  ;;  %v12958_v45 = vld [vmem:[#allocation23_spill] sm:$0xff] }
 0x6f1   : > { %9117 = vmatpush3.bf16.msra.mxu0 %v12924_v19  ;;  %9157 = vmatpush3.bf16.msra.mxu1 %v11576_v21  ;;  %v12959_v19 = vld [vmem:[#allocation19_spill] sm:$0xff] }
 0x6f2   : > { %9119 = vmatprep.subr.bf16.mxu0 %v12925_v60  ;;  %9191 = vmatprep.subr.bf16.mxu1 %v11184_v39  ;;  %v12930_v39 = vpack.c.bf16 %v11551_v58, %v11536_v10  ;;  %v12947_v10 = vld [vmem:[#allocation5_spill] sm:$0xff] }
 0x6f3   : > { %v3728_v58 = vmax.f32 %v12947_v10, %v11617_v57 }
 0x6f4   : > { %4400 = vmatmul.mubr.f32.vlgmr.msra.gmra.mrb[10].mxu1 %v3888_v18  ;;  %v3765_v18 = vld [vmem:[%s12568_s7 + $0x108] sm:$0xff] }
 0x6f5   : > { %9121 = vmatpush3.bf16.msra.mxu0 %v12926_v55  ;;  %4407 = vmatprep.mubr.f32.mxu1 %v3897_v0  ;;  %v12952_v0 = vld [vmem:[#allocation21_spill] sm:$0xff] }
 0x6f6   : > { %9193 = vmatpush3.bf16.msra.mxu1 %v11202_v50  ;;  %9123 = vmatprep.subr.bf16.mxu0 %v12927_v35  ;;  %v12931_v50 = vand.u32 4294901760, %v11103_v36  ;;  %v12935_v36 = vand.u32 4294901760, %v11122_v40  ;;  %v12939_v40 = vand.u32 4294901760, %v11220_v5  ;;  %v12945_v5 = vand.u32 4294901760, %v12918_v53  ;;  %v3768_v53 = vld [vmem:[%s12568_s7 + $0x120] sm:$0xff] }
 0x6f7   : > { %9195 = vmatprep.subr.bf16.mxu1 %v11214_v56  ;;  %v9162_v56 = vpack.c.bf16 %v12934_v44, %v12933_v59  ;;  %v4715_v60 = vand.u32 4294901760, %v3768_v53 }
 0x6f8   : > { %4411 = vmatmul.mubr.f32.gmra.mrb[12].mxu1 %v3903_v26  ;;  %v9160_v20 = vpack.c.bf16 %v12932_v37, %v12931_v50  ;;  %v9164_v61 = vpack.c.bf16 %v12936_v24, %v12935_v36  ;;  %v12954_v26 = vld [vmem:[#allocation20_spill] sm:$0xff]  ;;  %v4724_v36 = vand.u32 4294901760, %v3771_v43 }
 0x6f9   : > { %9125 = vmatpush3.bf16.msra.mxu0 %v12930_v39  ;;  %4688 = vmatprep.mubr.f32.mxu1 %v11622_v14 }
 0x6fa   : > { %9197 = vmatpush3.bf16.msra.mxu1 %v11242_v9  ;;  %9159 = vmatprep.subr.bf16.mxu0 %v9158_v51  ;;  %v9166_v9 = vpack.c.bf16 %v12938_v63, %v12937_v8 }
 0x6fb   : > { %9199 = vmatprep.subr.bf16.mxu1 %v11293_v22  ;;  %v9168_v22 = vpack.c.bf16 %v12940_v11, %v12939_v40  ;;  %v11847_v11 = vsub.f32 %v3768_v53, %v4715_v60 }
 0x6fc   : > { %4283 = vmatmul.mubr.f32.vlgmr.msra.gmra.mrb[10].mxu0 %v11635_v49 }
 0x6fd   : > { %4289 = vmatprep.mubr.f32.mxu0 %v11646_v25  ;;  %9161 = vmatpush3.bf16.msra.mxu0 %v9160_v20  ;;  %v3767_v25 = vld [vmem:[%s12568_s7 + $0x118] sm:$0xff] }
 0x6fe   : > { %9201 = vmatpush3.bf16.msra.mxu1 %v11320_v48  ;;  %9163 = vmatprep.subr.bf16.mxu0 %v9162_v56  ;;  %v12941_v48 = vand.u32 4294901760, %v12913_v42  ;;  %v4721_v56 = vand.u32 4294901760, %v3770_v31 }
 0x6ff   : > { %9203 = vmatprep.subr.bf16.mxu1 %v11341_v23  ;;  %v12943_v23 = vand.u32 4294901760, %v12916_v33  ;;  %v4712_v33 = vand.u32 4294901760, %v3767_v25 }
 0x700   : > { %4292 = vmatmul.mubr.f32.gmra.mrb[12].mxu0 %v11659_v29  ;;  %v9170_v28 = vpack.c.bf16 %v12942_v46, %v12941_v48  ;;  %v12953_v29 = vld [vmem:[#allocation6_spill] sm:$0xff]  ;;  %v11857_v46 = vpack.c.bf16 %v4724_v36, %v4721_v56 }
 0x701   : > { %9165 = vmatpush3.bf16.msra.mxu0 %v9164_v61  ;;  %4577 = vmatprep.mubr.f32.mxu0 %v11622_v14  ;;  %v9172_v4 = vpack.c.bf16 %v12944_v47, %v12943_v23  ;;  %v12948_v14 = vand.u32 4294901760, %v12920_v1  ;;  %v3769_v1 = vld [vmem:[%s12568_s7 + $0x128] sm:$0xff]  ;;  %v11830_v20 = vsub.f32 %v3767_v25, %v4712_v33 }
 0x702   : > { %9205 = vmatpush3.bf16.msra.mxu1 %v11387_v54  ;;  %9167 = vmatprep.subr.bf16.mxu0 %v9166_v9  ;;  %v9174_v54 = vpack.c.bf16 %v12946_v3, %v12945_v5  ;;  %v4718_v55 = vand.u32 4294901760, %v3769_v1  ;;  %v3772_v9 = vld [vmem:[%s12568_s7 + $0x140] sm:$0xf]  ;;  %v4827_v3 = vand.u32 4294901760, %v11847_v11 }
 0x703   : > { %9207 = vmatprep.subr.bf16.mxu1 %v12912_v38  ;;  %v9176_v15 = vpack.c.bf16 %v12949_v27, %v12948_v14  ;;  %v12957_v38 = vld [vmem:[#allocation3_spill] sm:$0xff]  ;;  %v4820_v40 = vand.u32 4294901760, %v11830_v20  ;;  %v11877_v14 = vsub.f32 %v3771_v43, %v4724_v36 }
 0x704   : > { %v11837_v44 = vpack.c.bf16 %v4718_v55, %v4715_v60 }
 0x705   : > { %9169 = vmatpush3.bf16.msra.mxu0 %v9168_v22  ;;  %v11849_v22 = vsub.f32 %v3769_v1, %v4718_v55  ;;  %v4821_v5 = vsub.f32 %v11830_v20, %v4820_v40 }
 0x706   : > { %9209 = vmatpush3.bf16.msra.mxu1 %v12915_v6  ;;  %9171 = vmatprep.subr.bf16.mxu0 %v9170_v28  ;;  %v12950_v6 = vand.u32 4294901760, %v12922_v7  ;;  %v3782_v28 = vsel %vm3780_vm1, %v3772_v9, 0 }
 0x707   : > { %9211 = vmatprep.subr.bf16.mxu1 %v11524_v62  ;;  %v3775_v62 = vsel %vm3773_vm0, %v3728_v58, 0  ;;  %v11875_v58 = vsub.f32 %v3770_v31, %v4721_v56  ;;  %v11881_v27 = vand.u32 4294901760, %v3782_v28  ;;  %v9262_v55 = vpack.c.bf16 %v11849_v22, %v11847_v11 }
 0x708   : > { %v9178_v49 = vpack.c.bf16 %v12951_v13, %v12950_v6  ;;  %v11773_v57 = vand.u32 4294901760, %v3775_v62 }
 0x709   : > { %9173 = vmatpush3.bf16.msra.mxu0 %v9172_v4  ;;  %v9266_v31 = vpack.c.bf16 %v11877_v14, %v11875_v58 }
 0x70a   : > { %9213 = vmatpush3.bf16.msra.mxu1 %v11532_v17  ;;  %9175 = vmatprep.subr.bf16.mxu0 %v9174_v54  ;;  %v3764_v17 = vld [vmem:[%s12568_s7 + $0x100] sm:$0xff]  ;;  %v11786_v16 = vsub.f32 %v3775_v62, %v11773_v57  ;;  %v4834_v54 = vand.u32 4294901760, %v11849_v22  ;;  %v4828_v62 = vsub.f32 %v11847_v11, %v4827_v3 }
 0x70b   : > { %9215 = vmatprep.subr.bf16.mxu1 %v11557_v41  ;;  %v4703_v41 = vand.u32 4294901760, %v3764_v17 }
 0x70c   : > { %v4778_v12 = vand.u32 4294901760, %v11786_v16  ;;  %v9294_v43 = vpack.c.bf16 %v4834_v54, %v4827_v3 }
 0x70d   : > { %9177 = vmatpush3.bf16.msra.mxu0 %v9176_v15  ;;  %v11821_v51 = vsub.f32 %v3764_v17, %v4703_v41  ;;  %v4835_v17 = vsub.f32 %v11849_v22, %v4834_v54 }
 0x70e   : > { %9217 = vmatpush3.bf16.msra.mxu1 %v11563_v2  ;;  %9179 = vmatprep.subr.bf16.mxu0 %v9178_v49  ;;  %v4706_v2 = vand.u32 4294901760, %v3765_v18  ;;  %v4779_v37 = vsub.f32 %v11786_v16, %v4778_v12  ;;  %v4822_v49 = vand.u32 4294901760, %v4821_v5 }
 0x70f   : > { %9219 = vmatprep.subr.bf16.mxu1 %v11569_v32  ;;  %v3766_v32 = vld [vmem:[%s12568_s7 + $0x110] sm:$0xff]  ;;  %v4799_v24 = vand.u32 4294901760, %v11821_v51 }
 0x710   : > { %v11800_v42 = vpack.c.bf16 %v4706_v2, %v4703_v41  ;;  %v4709_v52 = vand.u32 4294901760, %v3766_v32  ;;  %v11823_v39 = vsub.f32 %v3765_v18, %v4706_v2  ;;  %v4780_v63 = vand.u32 4294901760, %v4779_v37 }
 0x711   : > { %9181 = vmatpush3.bf16.msra.mxu0 %v11599_v30  ;;  %v3731_v30 = vmax.f32 %v12953_v29, %v12952_v0  ;;  %v4800_v23 = vsub.f32 %v11821_v51, %v4799_v24  ;;  %v4841_v41 = vand.u32 4294901760, %v11875_v58  ;;  %v4848_v2 = vand.u32 4294901760, %v11877_v14 }
 0x712   : > { %9221 = vmatpush3.bf16.msra.mxu1 %v11576_v21  ;;  %9183 = vmatprep.subr.bf16.mxu0 %v11605_v34  ;;  %v12955_v21 = vld [vmem:[#allocation7_spill] sm:$0xff]  ;;  %v12956_v34 = vld [vmem:[#allocation22_spill] sm:$0xff]  ;;  %v11813_v35 = vpack.c.bf16 %v4712_v33, %v4709_v52  ;;  %v11825_v50 = vsub.f32 %v3766_v32, %v4709_v52  ;;  %v4806_v61 = vand.u32 4294901760, %v11823_v39  ;;  %v4829_v0 = vand.u32 4294901760, %v4828_v62 }
 0x713   : > { %v3778_v7 = vsel %vm3773_vm0, %v3731_v30, 0  ;;  %v4801_v15 = vand.u32 4294901760, %v4800_v23  ;;  %v4836_v29 = vand.u32 4294901760, %v4835_v17 }
 0x714   : > { %v11832_v59 = vand.u32 4294901760, %v3778_v7  ;;  %v4813_v8 = vand.u32 4294901760, %v11825_v50  ;;  %v4807_v47 = vsub.f32 %v11823_v39, %v4806_v61  ;;  %v9258_v60 = vpack.c.bf16 %v11830_v20, %v11825_v50 }
 0x715   : > { %4690 = vmatmul.mubr.f32.vlgmr.msra.gmra.mrb[14].mxu1 %v12954_v26  ;;  %9185 = vmatpush3.bf16.msra.mxu0 %v12955_v21  ;;  %v4849_v21 = vsub.f32 %v11877_v14, %v4848_v2 }
 0x716   : > { %4695 = vmatprep.mubr.f32.mxu1 %v12956_v34  ;;  %9187 = vmatprep.subr.bf16.mxu0 %v12957_v38  ;;  %v11852_v48 = vsub.f32 %v3778_v7, %v11832_v59  ;;  %v4814_v4 = vsub.f32 %v11825_v50, %v4813_v8  ;;  %v4808_v6 = vand.u32 4294901760, %v4807_v47  ;;  %v9246_v38 = vpack.c.bf16 %v4836_v29, %v4829_v0 }
 0x717   : > { %v4850_v33 = vand.u32 4294901760, %v4849_v21  ;;  %v5396_v21 = vld [vmem:[%s12570_s9 + $0x8] sm:$0xff] }
 0x718   : > { %v4788_v10 = vand.u32 4294901760, %v11852_v48  ;;  %v4815_v13 = vand.u32 4294901760, %v4814_v4  ;;  %v9238_v32 = vpack.c.bf16 %v4808_v6, %v4801_v15 }
 0x719   : > { %4697 = vmatmul.mubr.f32.gmra.mrb[16].mxu1 %v12958_v45  ;;  %9189 = vmatpush3.bf16.msra.mxu0 %v12959_v19  ;;  %v9254_v19 = vpack.c.bf16 %v11823_v39, %v11821_v51  ;;  %v9298_v51 = vpack.c.bf16 %v4848_v2, %v4841_v41 }
 0x71a   : > { %9223 = vmatprep.subr.bf16.mxu0 %v11800_v42  ;;  %v4789_v18 = vsub.f32 %v11852_v48, %v4788_v10  ;;  %v9242_v25 = vpack.c.bf16 %v4822_v49, %v4815_v13 }
 0x71c   : > { %4579 = vmatmul.mubr.f32.vlgmr.msra.gmra.mrb[14].mxu0 %v12954_v26  ;;  %v4790_v30 = vand.u32 4294901760, %v4789_v18  ;;  %v4842_v26 = vsub.f32 %v11875_v58, %v4841_v41 }
 0x71d   : > { %4584 = vmatprep.mubr.f32.mxu0 %v12956_v34  ;;  %9225 = vmatpush3.bf16.msra.mxu0 %v11800_v42  ;;  %v4854_v34 = vsub.f32 %v3782_v28, %v11881_v27 }
 0x71e   : > { %9227 = vmatprep.subr.bf16.mxu0 %v11813_v35  ;;  %v4843_v52 = vand.u32 4294901760, %v4842_v26  ;;  %v5395_v26 = vld [vmem:[%s12570_s9] sm:$0xff] }
 0x71f   : > { %v4855_v53 = vand.u32 4294901760, %v4854_v34 }
 0x720   : > { %4586 = vmatmul.mubr.f32.gmra.mrb[16].mxu0 %v12958_v45  ;;  %v9250_v1 = vpack.c.bf16 %v4850_v33, %v4843_v52  ;;  %v5405_v52 = vsel %vm5400_vm2, %v5396_v21, 0 }
 0x721   : > { %9229 = vmatpush3.bf16.msra.mxu0 %v11813_v35  ;;  %8424 = vmatprep.mubr.f32.mxu0 %v4780_v63  ;;  %v4856_v7 = vsub.f32 %v4854_v34, %v4855_v53 }
 0x722   : > { %9231 = vmatprep.subr.bf16.mxu0 %v11837_v44 }
 0x723   : > { %v4857_v45 = vand.u32 4294901760, %v4856_v7 }
 0x725   : > { %9233 = vmatpush3.bf16.msra.mxu0 %v11837_v44 }
 0x726   : > { %9235 = vmatprep.subr.bf16.mxu0 %v11857_v46 }
 0x729   : > { %9237 = vmatpush3.bf16.msra.mxu0 %v11857_v46 }
 0x72a   : > { %8422 = vmatprep.subr.mxu0 %v11881_v27 }
 0x72d   : > { %8423 = vmatpush3.msra.mxu0 %v11881_v27 }
 0x72e   : > { %8425 = vmatmul.mubr.f32.vlgmr.msra.gmra.mrb[18].mxu0 %v4790_v30  ;;  %9239 = vmatprep.subr.bf16.mxu0 %v9238_v32 }
 0x72f   : > { %9241 = vmatpush3.bf16.msra.mxu0 %v9238_v32  ;;  %8445 = vmatprep.mubr.f32.mxu0 %v11773_v57 }
 0x730   : > { %9243 = vmatprep.subr.bf16.mxu0 %v9242_v25 }
 0x733   : > { %9245 = vmatpush3.bf16.msra.mxu0 %v9242_v25 }
 0x734   : > { %9247 = vmatprep.subr.bf16.mxu0 %v9246_v38 }
 0x737   : > { %9249 = vmatpush3.bf16.msra.mxu0 %v9246_v38  ;;  %v5402_v38 = vsel %vm5400_vm2, %v5395_v26, 0 }
 0x738   : > { %9251 = vmatprep.subr.bf16.mxu0 %v9250_v1  ;;  %v5482_v7 = vand.u32 4294901760, %v5402_v38 }
 0x73b   : > { %9253 = vmatpush3.bf16.msra.mxu0 %v9250_v1  ;;  %v5399_v1 = vld [vmem:[%s452_s18] sm:$0xf] }
 0x73c   : > { %8443 = vmatprep.subr.mxu0 %v4857_v45 }
 0x73f   : > { %8444 = vmatpush3.msra.mxu0 %v4857_v45  ;;  %v5492_v45 = vand.u32 4294901760, %v5405_v52 }
 0x740   : > { %8446 = vmatmul.mubr.f32.vlgmr.msra.gmra.mrb[18].mxu0 %v11832_v59  ;;  %9255 = vmatprep.subr.bf16.mxu0 %v9254_v19 }
 0x741   : > { %9257 = vmatpush3.bf16.msra.mxu0 %v9254_v19  ;;  %8466 = vmatprep.mubr.f32.mxu0 %v11786_v16  ;;  %v9286_v16 = vpack.c.bf16 %v4806_v61, %v4799_v24 }
 0x742   : > { %9259 = vmatprep.subr.bf16.mxu0 %v9258_v60 }
 0x745   : > { %9261 = vmatpush3.bf16.msra.mxu0 %v9258_v60 }
 0x746   : > { %9263 = vmatprep.subr.bf16.mxu0 %v9262_v55 }
 0x749   : > { %9265 = vmatpush3.bf16.msra.mxu0 %v9262_v55  ;;  %v5414_v55 = vsel %vm3780_vm1, %v5399_v1, 0 }
 0x74a   : > { %9267 = vmatprep.subr.bf16.mxu0 %v9266_v31 }
 0x74d   : > { %9269 = vmatpush3.bf16.msra.mxu0 %v9266_v31 }
 0x74e   : > { %8464 = vmatprep.subr.mxu0 %v4854_v34 }
 0x751   : > { %8465 = vmatpush3.msra.mxu0 %v4854_v34  ;;  %v5397_v34 = vld [vmem:[%s12570_s9 + $0x10] sm:$0xff] }
 0x752   : > { %8467 = vmatmul.mubr.f32.vlgmr.msra.gmra.mrb[18].mxu0 %v11852_v48  ;;  %9271 = vmatprep.subr.bf16.mxu0 %v11800_v42  ;;  %v5408_v33 = vsel %vm5400_vm2, %v5397_v34, 0 }
 0x753   : > { %9273 = vmatpush3.bf16.msra.mxu0 %v11800_v42  ;;  %8487 = vmatprep.mubr.f32.mxu0 %v4778_v12  ;;  %v9290_v12 = vpack.c.bf16 %v4820_v40, %v4813_v8  ;;  %v5502_v19 = vand.u32 4294901760, %v5408_v33 }
 0x754   : > { %9275 = vmatprep.subr.bf16.mxu0 %v11813_v35 }
 0x757   : > { %9277 = vmatpush3.bf16.msra.mxu0 %v11813_v35 }
 0x758   : > { %9279 = vmatprep.subr.bf16.mxu0 %v11837_v44 }
 0x75b   : > { %9281 = vmatpush3.bf16.msra.mxu0 %v11837_v44 }
 0x75c   : > { %9283 = vmatprep.subr.bf16.mxu0 %v11857_v46 }
 0x75f   : > { %9285 = vmatpush3.bf16.msra.mxu0 %v11857_v46 }
 0x760   : > { %8485 = vmatprep.subr.mxu0 %v11881_v27 }
 0x763   : > { %8486 = vmatpush3.msra.mxu0 %v11881_v27 }
 0x764   : > { %8488 = vmatmul.mubr.f32.vlgmr.msra.gmra.mrb[18].mxu0 %v4788_v10  ;;  %9287 = vmatprep.subr.bf16.mxu0 %v9286_v16 }
 0x765   : > { %9289 = vmatpush3.bf16.msra.mxu0 %v9286_v16  ;;  %8508 = vmatprep.mubr.f32.mxu0 %v11773_v57  ;;  %v5417_v16 = vand.u32 4294901760, %v5414_v55 }
 0x766   : > { %9291 = vmatprep.subr.bf16.mxu0 %v9290_v12 }
 0x767   : > { %8532 = vmatprep.subr.mxu1 %v5417_v16 }
 0x768   : > { %8533 = vmatpush3.msra.mxu1 %v5417_v16 }
 0x769   : > { %9293 = vmatpush3.bf16.msra.mxu0 %v9290_v12  ;;  %v5483_v12 = vsub.f32 %v5402_v38, %v5482_v7 }
 0x76a   : > { %9295 = vmatprep.subr.bf16.mxu0 %v9294_v43 }
 0x76d   : > { %9297 = vmatpush3.bf16.msra.mxu0 %v9294_v43  ;;  %v5493_v43 = vsub.f32 %v5405_v52, %v5492_v45 }
 0x76e   : > { %9299 = vmatprep.subr.bf16.mxu0 %v9298_v51 }
 0x771   : > { %9301 = vmatpush3.bf16.msra.mxu0 %v9298_v51  ;;  %v5503_v51 = vsub.f32 %v5408_v33, %v5502_v19 }
 0x772   : > { %8506 = vmatprep.subr.mxu0 %v4855_v53 }
 0x775   : > { %8507 = vmatpush3.msra.mxu0 %v4855_v53  ;;  %v5398_v53 = vld [vmem:[%s12570_s9 + $0x18] sm:$0xff] }
 0x776   : > { %8509 = vmatmul.mubr.f32.vlgmr.msra.gmra.mrb[18].mxu0 %v11832_v59  ;;  %9303 = vmatprep.subr.bf16.mxu0 %v11800_v42  ;;  %v5411_v60 = vsel %vm5400_vm2, %v5398_v53, 0 }
 0x777   : > { %9305 = vmatpush3.bf16.msra.mxu0 %v11800_v42  ;;  %8529 = vmatprep.mubr.f32.mxu0 %v11773_v57  ;;  %v5512_v31 = vand.u32 4294901760, %v5411_v60 }
 0x778   : > { %9307 = vmatprep.subr.bf16.mxu0 %v11813_v35 }
 0x77b   : > { %9309 = vmatpush3.bf16.msra.mxu0 %v11813_v35 }
 0x77c   : > { %9311 = vmatprep.subr.bf16.mxu0 %v11837_v44 }
 0x77f   : > { %9313 = vmatpush3.bf16.msra.mxu0 %v11837_v44 }
 0x780   : > { %9315 = vmatprep.subr.bf16.mxu0 %v11857_v46 }
 0x783   : > { %9317 = vmatpush3.bf16.msra.mxu0 %v11857_v46 }
 0x784   : > { %8527 = vmatprep.subr.mxu0 %v11881_v27 }
 0x787   : > { %8528 = vmatpush3.msra.mxu0 %v11881_v27 }
 0x788   : > { %8530 = vmatmul.mubr.f32.vlgmr.msra.gmra.mrb[18].mxu0 %v11832_v59 }
 0x7a7   : > { %v7732_v42 = vpop.f32.mrb[6].mxu1 }
 0x7a8   : > { %v7733_v57 = vpop.f32.mrb[7].mxu1 }
 0x7a9   : > { %v7734_v39 = vadd.f32 %v7733_v57, %v7732_v42  ;;  %v5513_v42 = vsub.f32 %v5411_v60, %v5512_v31  ;;  %v5484_v57 = vand.u32 4294901760, %v5483_v12 }
 0x7af   : > { %v7694_v50 = vpop.f32.mrb[6].mxu0  ;;  %v7735_v37 = vpop.f32.mrb[8].mxu1 }
 0x7b0   : > { %v7695_v35 = vpop.f32.mrb[7].mxu0  ;;  %v7736_v20 = vpop.f32.mrb[9].mxu1 }
 0x7b1   : > { %v7696_v56 = vadd.f32 %v7695_v35, %v7694_v50  ;;  %v7737_v36 = vadd.f32 %v7736_v20, %v7735_v37  ;;  %v5504_v50 = vand.u32 4294901760, %v5503_v51  ;;  %v5524_v37 = vsub.f32 %v5414_v55, %v5417_v16 }
 0x7b2   : > { %v5514_v35 = vand.u32 4294901760, %v5513_v42  ;;  %v5485_v20 = vsub.f32 %v5483_v12, %v5484_v57 }
 0x7b3   : > { %v4140_v44 = vadd.f32 %v7734_v39, %v7696_v56  ;;  %v5494_v39 = vand.u32 4294901760, %v5493_v43 }
 0x7b5   : > { %v5495_v56 = vsub.f32 %v5493_v43, %v5494_v39 }
 0x7b7   : > { %v7697_v24 = vpop.f32.mrb[8].mxu0 }
 0x7b8   : > { %v7698_v61 = vpop.f32.mrb[9].mxu0 }
 0x7b9   : > { %v7699_v8 = vadd.f32 %v7698_v61, %v7697_v24  ;;  %v5515_v24 = vsub.f32 %v5513_v42, %v5514_v35  ;;  %v5486_v61 = vand.u32 4294901760, %v5485_v20 }
 0x7bb   : > { %v4147_v63 = vadd.f32 %v7737_v36, %v7699_v8  ;;  %v5505_v36 = vsub.f32 %v5503_v51, %v5504_v50  ;;  %v5496_v8 = vand.u32 4294901760, %v5495_v56  ;;  %8534 = vmatprep.mubr.f32.mxu1 %v5486_v61 }
 0x7bd   : > { %8535 = vmatmul.mubr.f32.vlgmr.msra.gmra.mrb[18].mxu1 %v5496_v8 }
 0x7c7   : > { %v7808_v9 = vpop.f32.mrb[10].mxu1 }
 0x7c8   : > { %v7809_v40 = vpop.f32.mrb[11].mxu1 }
 0x7c9   : > { %v7810_v11 = vadd.f32 %v7809_v40, %v7808_v9 }
 0x7cb   : > { %v7811_v22 = vpop.f32.mrb[12].mxu1 }
 0x7cc   : > { %v7812_v48 = vpop.f32.mrb[13].mxu1 }
 0x7cd   : > { %v7813_v59 = vadd.f32 %v7812_v48, %v7811_v22 }
 0x7cf   : > { %v7770_v46 = vpop.f32.mrb[10].mxu0 }
 0x7d0   : > { %v7771_v28 = vpop.f32.mrb[11].mxu0 }
 0x7d1   : > { %v7772_v23 = vadd.f32 %v7771_v28, %v7770_v46 }
 0x7d3   : > { %v4285_v47 = vadd.f32 %v7772_v23, %v4140_v44  ;;  %v7773_v4 = vpop.f32.mrb[12].mxu0  ;;  %v5525_v44 = vand.u32 4294901760, %v5524_v37 }
 0x7d4   : > { %v7774_v5 = vpop.f32.mrb[13].mxu0 }
 0x7d5   : > { %v7775_v3 = vadd.f32 %v7774_v5, %v7773_v4  ;;  %v4402_v54 = vadd.f32 %v7810_v11, %v4285_v47  ;;  %v5526_v9 = vsub.f32 %v5524_v37, %v5525_v44  ;;  %v5516_v11 = vand.u32 4294901760, %v5515_v24 }
 0x7d7   : > { %v4294_v10 = vadd.f32 %v7775_v3, %v4147_v63  ;;  %v5506_v63 = vand.u32 4294901760, %v5505_v36  ;;  %v5527_v40 = vand.u32 4294901760, %v5526_v9 }
 0x7d9   : > { %v4413_v58 = vadd.f32 %v7813_v59, %v4294_v10  ;;  %8537 = vmatprep.mubr.f32.mxu1 %v5506_v63  ;;  %8540 = vmatprep.subr.mxu1 %v5527_v40 }
 0x7da   : > { %8541 = vmatpush3.msra.mxu1 %v5527_v40 }
 0x7db   : > { %8548 = vmatprep.subr.mxu1 %v5524_v37  ;;  %8538 = vmatmul.mubr.f32.gmra.mrb[20].mxu1 %v5516_v11 }
 0x7dc   : > { %8542 = vmatprep.mubr.f32.mxu1 %v5482_v7 }
 0x7df   : > { %8543 = vmatmul.mubr.f32.vlgmr.msra.gmra.mrb[18].mxu1 %v5492_v45 }
 0x7e0   : > { %8545 = vmatprep.mubr.f32.mxu1 %v5502_v19  ;;  %8549 = vmatpush3.msra.mxu1 %v5524_v37 }
 0x7e1   : > { %8556 = vmatprep.subr.mxu1 %v5417_v16 }
 0x7e3   : > { %8546 = vmatmul.mubr.f32.gmra.mrb[20].mxu1 %v5512_v31 }
 0x7e4   : > { %8550 = vmatprep.mubr.f32.mxu1 %v5483_v12 }
 0x7e7   : > { %8551 = vmatmul.mubr.f32.vlgmr.msra.gmra.mrb[18].mxu1 %v5493_v43 }
 0x7e8   : > { %v7884_v14 = vpop.f32.mrb[14].mxu1  ;;  %8553 = vmatprep.mubr.f32.mxu1 %v5503_v51  ;;  %8557 = vmatpush3.msra.mxu1 %v5417_v16 }
 0x7e9   : > { %v7885_v27 = vpop.f32.mrb[15].mxu1  ;;  %8564 = vmatprep.subr.mxu1 %v5525_v44 }
 0x7ea   : > { %v7886_v15 = vadd.f32 %v7885_v27, %v7884_v14 }
 0x7eb   : > { %8554 = vmatmul.mubr.f32.gmra.mrb[20].mxu1 %v5513_v42 }
 0x7ec   : > { %v7887_v6 = vpop.f32.mrb[16].mxu1  ;;  %8558 = vmatprep.mubr.f32.mxu1 %v5484_v57 }
 0x7ed   : > { %v7888_v13 = vpop.f32.mrb[17].mxu1 }
 0x7ee   : > { %v7889_v49 = vadd.f32 %v7888_v13, %v7887_v6 }
 0x7ef   : > { %v7846_v62 = vpop.f32.mrb[14].mxu0  ;;  %8559 = vmatmul.mubr.f32.vlgmr.msra.gmra.mrb[18].mxu1 %v5494_v39 }
 0x7f0   : > { %v7847_v17 = vpop.f32.mrb[15].mxu0  ;;  %8561 = vmatprep.mubr.f32.mxu1 %v5504_v50  ;;  %8565 = vmatpush3.msra.mxu1 %v5525_v44 }
 0x7f1   : > { %v7848_v18 = vadd.f32 %v7847_v17, %v7846_v62  ;;  %8572 = vmatprep.subr.mxu1 %v5417_v16 }
 0x7f3   : > { %v4581_v41 = vadd.f32 %v7848_v18, %v4402_v54  ;;  %v7849_v2 = vpop.f32.mrb[16].mxu0  ;;  %8562 = vmatmul.mubr.f32.gmra.mrb[20].mxu1 %v5514_v35 }
 0x7f4   : > { %v7850_v32 = vpop.f32.mrb[17].mxu0  ;;  %8566 = vmatprep.mubr.f32.mxu1 %v5482_v7 }
 0x7f5   : > { %v7851_v25 = vadd.f32 %v7850_v32, %v7849_v2  ;;  %v11960_v0 = vadd.f32 %v7886_v15, %v4581_v41 }
 0x7f7   : > { %v4588_v29 = vadd.f32 %v7851_v25, %v4413_v58  ;;  %8567 = vmatmul.mubr.f32.vlgmr.msra.gmra.mrb[18].mxu1 %v5492_v45 }
 0x7f8   : > { %8569 = vmatprep.mubr.f32.mxu1 %v5502_v19  ;;  %8573 = vmatpush3.msra.mxu1 %v5417_v16 }
 0x7f9   : > { %v11962_v30 = vadd.f32 %v7889_v49, %v4588_v29  ;;  %v5388_v49 = vld [vmem:[%s12569_s8 + $0x8] sm:$0xff] }
 0x7fa   : > { %v12010_v62 = vand.u32 4294901760, %v5388_v49 }
 0x7fb   : > { %8570 = vmatmul.mubr.f32.gmra.mrb[20].mxu1 %v5512_v31 }
 0x7fc   : > { %8574 = vmatprep.mubr.f32.mxu1 %v5482_v7  ;;  %12961 = vst [vmem:[#allocation8_spill] sm:$0xff] %v12010_v62  ;;  %v12013_v17 = vsub.f32 %v5388_v49, %v12010_v62 }
 0x7fe   : > { %12962 = vst [vmem:[#allocation11_spill] sm:$0xff] %v12013_v17  ;;  %v12701_v18 = vand.u32 4294901760, %v12013_v17  ;;  %6531 = vmatprep.mubr.f32.mxu0 %v12013_v17 }
 0x7ff   : > { %8575 = vmatmul.mubr.f32.vlgmr.msra.gmra.mrb[18].mxu1 %v5492_v45 }
 0x800   : > { %8577 = vmatprep.mubr.f32.mxu1 %v5502_v19  ;;  %v6090_v41 = vsub.f32 %v12013_v17, %v12701_v18 }
 0x802   : > { %v6091_v2 = vand.u32 4294901760, %v6090_v41  ;;  %v5387_v41 = vld [vmem:[%s12569_s8] sm:$0xff] }
 0x803   : > { %8578 = vmatmul.mubr.f32.gmra.mrb[20].mxu1 %v5512_v31 }
 0x804   : > { %6092 = vmatprep.mubr.f32.mxu1 %v6091_v2 }
 0x85b   : > { %v8531_v22 = vpop.f32.mrb[18].mxu0 }
 0x85c   : > { %v9558_v48 = vadd.f32 %v8531_v22, %v11962_v30  ;;  %v5285_v59 = vpop.f32.mrb[19].mxu0 }
 0x85d   : > { %v9559_v46 = vadd.f32 %v5285_v59, %v11960_v0 }
 0x85e   : > { %5341 = vrot.lane.b32.xlu1 %v9558_v48, %s9714_s22  ;;  %v5995_v28 = vand.u32 4294901760, %v9558_v48 }
 0x85f   : > { %5339 = vrot.lane.b32.xlu0 %v9559_v46, %s9714_s22  ;;  %v5992_v23 = vand.u32 4294901760, %v9559_v46 }
 0x860   : > { %v11983_v47 = vsub.f32 %v9558_v48, %v5995_v28 }
 0x861   : > { %v11985_v4 = vpack.c.bf16 %v5995_v28, %v5992_v23  ;;  %v11987_v5 = vsub.f32 %v9559_v46, %v5992_v23 }
 0x862   : > { %5347 = vrot.lane.b32.xlu1 %v9558_v48, %s9715_s25  ;;  %v6158_v3 = vand.u32 4294901760, %v11983_v47 }
 0x863   : > { %12960 = vst [vmem:[#allocation13_spill] sm:$0xff] %v11985_v4  ;;  %5345 = vrot.lane.b32.xlu0 %v9559_v46, %s9715_s25  ;;  %v9384_v54 = vpack.c.bf16 %v11983_v47, %v11987_v5  ;;  %v6151_v10 = vand.u32 4294901760, %v11987_v5 }
 0x864   : > { %v6159_v58 = vsub.f32 %v11983_v47, %v6158_v3 }
 0x865   : > { %v6152_v14 = vsub.f32 %v11987_v5, %v6151_v10  ;;  %v11995_v27 = vpack.c.bf16 %v6158_v3, %v6151_v10 }
 0x866   : > { %5299 = vrot.lane.b32.xlu1 %v9558_v48, %s9697_s15  ;;  %v6160_v15 = vand.u32 4294901760, %v6159_v58 }
 0x867   : > { %5297 = vrot.lane.b32.xlu0 %v9559_v46, %s9697_s15  ;;  %v6153_v6 = vand.u32 4294901760, %v6152_v14  ;;  %s9720_s15 = smov 115  }
 0x869   : > { %v11999_v13 = vpack.c.bf16 %v6160_v15, %v6153_v6 }
 0x86a   : > { %5353 = vrot.lane.b32.xlu1 %v9558_v48, %s9716_s26 }
 0x86b   : > { %5351 = vrot.lane.b32.xlu0 %v9559_v46, %s9716_s26 }
 0x86e   : > { %5305 = vrot.lane.b32.xlu1 %v9558_v48, %s9698_s16 }
 0x86f   : > { %5303 = vrot.lane.b32.xlu0 %v9559_v46, %s9698_s16  ;;  %s9721_s16 = smov 114  }
 0x872   : > { %5359 = vrot.lane.b32.xlu1 %v9558_v48, %s9717_s12 }
 0x873   : > { %5357 = vrot.lane.b32.xlu0 %v9559_v46, %s9717_s12 }
 0x876   : > { %5311 = vrot.lane.b32.xlu1 %v9558_v48, %s9718_s29 }
 0x877   : > { %5309 = vrot.lane.b32.xlu0 %v9559_v46, %s9718_s29 }
 0x87a   : > { %5365 = vrot.lane.b32.xlu1 %v9558_v48, %s9719_s30 }
 0x87b   : > { %5363 = vrot.lane.b32.xlu0 %v9559_v46, %s9719_s30 }
 0x87e   : > { %5317 = vrot.lane.b32.xlu1 %v9558_v48, %s9712_s21 }
 0x87f   : > { %5315 = vrot.lane.b32.xlu0 %v9559_v46, %s9712_s21  ;;  %s9724_s21 = smov 121  }
 0x882   : > { %5371 = vrot.lane.b32.xlu1 %v9558_v48, %s9720_s15 }
 0x883   : > { %5369 = vrot.lane.b32.xlu0 %v9559_v46, %s9720_s15 }
 0x886   : > { %5323 = vrot.lane.b32.xlu1 %v9558_v48, %s9705_s23 }
 0x887   : > { %5321 = vrot.lane.b32.xlu0 %v9559_v46, %s9705_s23 }
 0x88a   : > { %5377 = vrot.lane.b32.xlu1 %v9558_v48, %s9721_s16 }
 0x88b   : > { %5375 = vrot.lane.b32.xlu0 %v9559_v46, %s9721_s16  ;;  %s455_s16 = scalar_lea.vmem %s12574_s13, %s13052_s28 }
 0x88e   : > { %5329 = vrot.lane.b32.xlu1 %v9558_v48, %s9722_s20 }
 0x88f   : > { %5327 = vrot.lane.b32.xlu0 %v9559_v46, %s9722_s20 }
 0x892   : > { %5383 = vrot.lane.b32.xlu1 %v9558_v48, %s9723_s14 }
 0x893   : > { %5381 = vrot.lane.b32.xlu0 %v9559_v46, %s9723_s14 }
 0x896   : > { %5335 = vrot.lane.b32.xlu1 %v9558_v48, %s9724_s21 }
 0x897   : > { %5333 = vrot.lane.b32.xlu0 %v9559_v46, %s9724_s21 }
 0x8d0   : > { %v5342_v32 = vpop.permute.xlu1 %5341 }
 0x8d1   : > { %v6043_v25 = vand.u32 4294901760, %v5342_v32  ;;  %v5340_v0 = vpop.permute.xlu0 %5339 }
 0x8d2   : > { %v6040_v29 = vand.u32 4294901760, %v5340_v0 }
 0x8d3   : > { %v12020_v30 = vsub.f32 %v5342_v32, %v6043_v25 }
 0x8d4   : > { %v12022_v26 = vpack.c.bf16 %v6043_v25, %v6040_v29  ;;  %v12024_v21 = vsub.f32 %v5340_v0, %v6040_v29  ;;  %v5348_v34 = vpop.permute.xlu1 %5347 }
 0x8d5   : > { %v6049_v38 = vand.u32 4294901760, %v5348_v34  ;;  %v5346_v52 = vpop.permute.xlu0 %5345 }
 0x8d6   : > { %12963 = vst [vmem:[#allocation4_spill] sm:$0xff] %v12022_v26  ;;  %v6046_v33 = vand.u32 4294901760, %v5346_v52  ;;  %9319 = vmatprep.subr.bf16.mxu1 %v12022_v26  ;;  %v9382_v53 = vpack.c.bf16 %v12020_v30, %v12024_v21 }
 0x8d7   : > { %v12029_v1 = vsub.f32 %v5348_v34, %v6049_v38  ;;  %9321 = vmatpush3.bf16.msra.mxu1 %v11985_v4  ;;  %v12092_v34 = vand.u32 4294901760, %v5387_v41 }
 0x8d8   : > { %v12032_v7 = vpack.c.bf16 %v6049_v38, %v6046_v33  ;;  %v12034_v45 = vsub.f32 %v5346_v52, %v6046_v33  ;;  %9383 = vmatprep.subr.bf16.mxu0 %v9382_v53  ;;  %v5300_v19 = vpop.permute.xlu1 %5299  ;;  %v5390_v53 = vld [vmem:[%s12569_s8 + $0x18] sm:$0xff] }
 0x8d9   : > { %v6001_v60 = vand.u32 4294901760, %v5300_v19  ;;  %v5298_v55 = vpop.permute.xlu0 %5297  ;;  %9385 = vmatpush3.bf16.msra.mxu0 %v9384_v54  ;;  %12970 = vst [vmem:[#allocation14_spill] sm:$0xff] %v12092_v34 }
 0x8da   : > { %12964 = vst [vmem:[#allocation15_spill] sm:$0xff] %v12032_v7  ;;  %v5998_v31 = vand.u32 4294901760, %v5298_v55  ;;  %9323 = vmatprep.subr.bf16.mxu1 %v12032_v7  ;;  %v9386_v16 = vpack.c.bf16 %v12029_v1, %v12034_v45 }
 0x8db   : > { %v12042_v12 = vsub.f32 %v5300_v19, %v6001_v60  ;;  %v5389_v19 = vld [vmem:[%s12569_s8 + $0x10] sm:$0xff] }
 0x8dc   : > { %v12044_v43 = vpack.c.bf16 %v6001_v60, %v5998_v31  ;;  %v12046_v51 = vsub.f32 %v5298_v55, %v5998_v31  ;;  %v5354_v42 = vpop.permute.xlu1 %5353  ;;  %9387 = vmatprep.subr.bf16.mxu0 %v9386_v16 }
 0x8dd   : > { %v6055_v57 = vand.u32 4294901760, %v5354_v42  ;;  %v5352_v39 = vpop.permute.xlu0 %5351 }
 0x8de   : > { %12965 = vst [vmem:[#allocation16_spill] sm:$0xff] %v12044_v43  ;;  %v9388_v50 = vpack.c.bf16 %v12042_v12, %v12046_v51  ;;  %v6052_v37 = vand.u32 4294901760, %v5352_v39  ;;  %9325 = vmatpush3.bf16.msra.mxu1 %v12044_v43  ;;  %v6165_v43 = vand.u32 4294901760, %v12046_v51 }
 0x8df   : > { %v12051_v35 = vsub.f32 %v5354_v42, %v6055_v57  ;;  %v5392_v42 = vld [vmem:[%s12569_s8 + $0x28] sm:$0xff] }
 0x8e0   : > { %v12053_v20 = vpack.c.bf16 %v6055_v57, %v6052_v37  ;;  %v12055_v56 = vsub.f32 %v5352_v39, %v6052_v37  ;;  %v5306_v36 = vpop.permute.xlu1 %5305  ;;  %9389 = vmatpush3.bf16.msra.mxu0 %v9388_v50  ;;  %v12113_v39 = vsub.f32 %v5387_v41, %v12092_v34  ;;  %v12115_v50 = vand.u32 4294901760, %v5390_v53 }
 0x8e1   : > { %v6007_v44 = vand.u32 4294901760, %v5306_v36  ;;  %v5304_v24 = vpop.permute.xlu0 %5303  ;;  %v12117_v37 = vand.u32 4294901760, %v5389_v19 }
 0x8e2   : > { %12966 = vst [vmem:[#allocation12_spill] sm:$0xff] %v12053_v20  ;;  %v6004_v61 = vand.u32 4294901760, %v5304_v24  ;;  %9327 = vmatprep.subr.bf16.mxu1 %v12053_v20  ;;  %v9390_v8 = vpack.c.bf16 %v12051_v35, %v12055_v56  ;;  %12972 = vst [vmem:[#allocation5_spill] sm:$0xff] %v12115_v50 }
 0x8e3   : > { %v12060_v63 = vsub.f32 %v5306_v36, %v6007_v44  ;;  %12973 = vst [vmem:[#allocation21_spill] sm:$0xff] %v12117_v37 }
 0x8e4   : > { %v12062_v9 = vpack.c.bf16 %v6007_v44, %v6004_v61  ;;  %v12064_v40 = vsub.f32 %v5304_v24, %v6004_v61  ;;  %v5360_v11 = vpop.permute.xlu1 %5359  ;;  %9391 = vmatprep.subr.bf16.mxu0 %v9390_v8 }
 0x8e5   : > { %v6061_v22 = vand.u32 4294901760, %v5360_v11  ;;  %v5358_v48 = vpop.permute.xlu0 %5357 }
 0x8e6   : > { %12967 = vst [vmem:[#allocation17_spill] sm:$0xff] %v12062_v9  ;;  %v9392_v59 = vpack.c.bf16 %v12060_v63, %v12064_v40  ;;  %v6058_v46 = vand.u32 4294901760, %v5358_v48  ;;  %9329 = vmatpush3.bf16.msra.mxu1 %v12062_v9 }
 0x8e7   : > { %v12069_v28 = vsub.f32 %v5360_v11, %v6061_v22  ;;  %v12123_v11 = vand.u32 4294901760, %v5392_v42 }
 0x8e8   : > { %v12071_v23 = vpack.c.bf16 %v6061_v22, %v6058_v46  ;;  %v12073_v47 = vsub.f32 %v5358_v48, %v6058_v46  ;;  %v5312_v5 = vpop.permute.xlu1 %5311  ;;  %9393 = vmatpush3.bf16.msra.mxu0 %v9392_v59  ;;  %v5391_v59 = vld [vmem:[%s12569_s8 + $0x20] sm:$0xff] }
 0x8e9   : > { %v6013_v3 = vand.u32 4294901760, %v5312_v5  ;;  %v5310_v54 = vpop.permute.xlu0 %5309  ;;  %12975 = vst [vmem:[#allocation20_spill] sm:$0xff] %v12123_v11 }
 0x8ea   : > { %12968 = vst [vmem:[#allocation18_spill] sm:$0xff] %v12071_v23  ;;  %v6010_v10 = vand.u32 4294901760, %v5310_v54  ;;  %9331 = vmatprep.subr.bf16.mxu1 %v12071_v23  ;;  %v9394_v58 = vpack.c.bf16 %v12069_v28, %v12073_v47 }
 0x8eb   : > { %v12078_v14 = vsub.f32 %v5312_v5, %v6013_v3  ;;  %v12704_v5 = vand.u32 4294901760, %v12113_v39 }
 0x8ec   : > { %v12080_v15 = vpack.c.bf16 %v6013_v3, %v6010_v10  ;;  %v12082_v6 = vsub.f32 %v5310_v54, %v6010_v10  ;;  %v5366_v49 = vpop.permute.xlu1 %5365  ;;  %9395 = vmatprep.subr.bf16.mxu0 %v9394_v58  ;;  %v12135_v3 = vsub.f32 %v5390_v53, %v12115_v50  ;;  %v12138_v54 = vsub.f32 %v5389_v19, %v12117_v37  ;;  %v5394_v10 = vld [vmem:[%s12569_s8 + $0x38] sm:$0xff]  ;;  %v5393_v58 = vld [vmem:[%s12569_s8 + $0x30] sm:$0xff] }
 0x8ed   : > { %v6067_v2 = vand.u32 4294901760, %v5366_v49  ;;  %v5364_v32 = vpop.permute.xlu0 %5363 }
 0x8ee   : > { %12969 = vst [vmem:[#allocation10_spill] sm:$0xff] %v12080_v15  ;;  %v9396_v25 = vpack.c.bf16 %v12078_v14, %v12082_v6  ;;  %v6064_v0 = vand.u32 4294901760, %v5364_v32  ;;  %9333 = vmatpush3.bf16.msra.mxu1 %v12080_v15 }
 0x8ef   : > { %v12090_v29 = vsub.f32 %v5366_v49, %v6067_v2 }
 0x8f0   : > { %v12094_v38 = vpack.c.bf16 %v6067_v2, %v6064_v0  ;;  %v12096_v52 = vsub.f32 %v5364_v32, %v6064_v0  ;;  %v5318_v33 = vpop.permute.xlu1 %5317  ;;  %9397 = vmatpush3.bf16.msra.mxu0 %v9396_v25  ;;  %v12151_v0 = vsub.f32 %v5392_v42, %v12123_v11  ;;  %v12712_v42 = vand.u32 4294901760, %v12135_v3 }
 0x8f1   : > { %v6019_v60 = vand.u32 4294901760, %v5318_v33  ;;  %v5316_v55 = vpop.permute.xlu0 %5315 }
 0x8f2   : > { %12971 = vst [vmem:[#allocation9_spill] sm:$0xff] %v12094_v38  ;;  %v6016_v31 = vand.u32 4294901760, %v5316_v55  ;;  %9335 = vmatprep.subr.bf16.mxu1 %v12094_v38  ;;  %v9398_v16 = vpack.c.bf16 %v12090_v29, %v12096_v52  ;;  %v12984_v15 = vand.u32 4294901760, %v12151_v0 }
 0x8f3   : > { %v12110_v57 = vsub.f32 %v5318_v33, %v6019_v60  ;;  %v12153_v33 = vand.u32 4294901760, %v5391_v59 }
 0x8f4   : > { %v12119_v36 = vpack.c.bf16 %v6019_v60, %v6016_v31  ;;  %v12121_v44 = vsub.f32 %v5316_v55, %v6016_v31  ;;  %v5372_v24 = vpop.permute.xlu1 %5371  ;;  %9399 = vmatprep.subr.bf16.mxu0 %v9398_v16  ;;  %v12158_v60 = vand.u32 4294901760, %v5394_v10  ;;  %v12160_v55 = vand.u32 4294901760, %v5393_v58 }
 0x8f5   : > { %v6073_v61 = vand.u32 4294901760, %v5372_v24  ;;  %v5370_v8 = vpop.permute.xlu0 %5369  ;;  %12977 = vst [vmem:[#allocation22_spill] sm:$0xff] %v12153_v33  ;;  %v12167_v16 = vsub.f32 %v12113_v39, %v12704_v5 }
 0x8f6   : > { %12974 = vst [vmem:[#allocation6_spill] sm:$0xff] %v12119_v36  ;;  %v9400_v22 = vpack.c.bf16 %v12110_v57, %v12121_v44  ;;  %v6070_v48 = vand.u32 4294901760, %v5370_v8  ;;  %9337 = vmatpush3.bf16.msra.mxu1 %v12119_v36  ;;  %12978 = vst [vmem:[#allocation3_spill] sm:$0xff] %v12158_v60 }
 0x8f7   : > { %v12131_v46 = vsub.f32 %v5372_v24, %v6073_v61  ;;  %12979 = vst [vmem:[#allocation23_spill] sm:$0xff] %v12160_v55  ;;  %v12717_v24 = vand.u32 4294901760, %v12138_v54 }
 0x8f8   : > { %v12146_v49 = vpack.c.bf16 %v6073_v61, %v6070_v48  ;;  %v12148_v41 = vsub.f32 %v5370_v8, %v6070_v48  ;;  %v5324_v2 = vpop.permute.xlu1 %5323  ;;  %9401 = vmatpush3.bf16.msra.mxu0 %v9400_v22 }
 0x8f9   : > { %v6025_v32 = vand.u32 4294901760, %v5324_v2  ;;  %v5322_v25 = vpop.permute.xlu0 %5321 }
 0x8fa   : > { %12976 = vst [vmem:[#allocation7_spill] sm:$0xff] %v12146_v49  ;;  %v6022_v53 = vand.u32 4294901760, %v5322_v25  ;;  %9339 = vmatprep.subr.bf16.mxu1 %v12146_v49  ;;  %v9402_v19 = vpack.c.bf16 %v12131_v46, %v12148_v41  ;;  %v12177_v49 = vsub.f32 %v5391_v59, %v12153_v33  ;;  %v12194_v59 = vsub.f32 %v12135_v3, %v12712_v42 }
 0x8fb   : > { %v12162_v31 = vsub.f32 %v5324_v2, %v6025_v32  ;;  %v12199_v2 = vsub.f32 %v12138_v54, %v12717_v24  ;;  %v12985_v24 = vand.u32 4294901760, %v12020_v30 }
 0x8fc   : > { %v12171_v61 = vpack.c.bf16 %v6025_v32, %v6022_v53  ;;  %v12173_v8 = vsub.f32 %v5322_v25, %v6022_v53  ;;  %v5378_v22 = vpop.permute.xlu1 %5377  ;;  %9403 = vmatprep.subr.bf16.mxu0 %v9402_v19  ;;  %v12183_v32 = vsub.f32 %v5394_v10, %v12158_v60  ;;  %v12186_v25 = vsub.f32 %v5393_v58, %v12160_v55 }
 0x8fd   : > { %v6079_v48 = vand.u32 4294901760, %v5378_v22  ;;  %v5376_v18 = vpop.permute.xlu0 %5375  ;;  %v12211_v55 = vsub.f32 %v12151_v0, %v12984_v15  ;;  %v6271_v23 = vsub.f32 %v12020_v30, %v12985_v24  ;;  %v12989_v24 = vand.u32 4294901760, %v12177_v49 }
 0x8fe   : > { %12980 = vst [vmem:[#allocation19_spill] sm:$0xff] %v12171_v61  ;;  %v9404_v5 = vpack.c.bf16 %v12162_v31, %v12173_v8  ;;  %v6076_v36 = vand.u32 4294901760, %v5376_v18  ;;  %9341 = vmatpush3.bf16.msra.mxu1 %v12171_v61  ;;  %12981 = vst [vmem:[#allocation24_spill] sm:$0xff] %v12183_v32 }
 0x8ff   : > { %12982 = vst [vmem:[#allocation25_spill] sm:$0xff] %v12186_v25  ;;  %v12188_v53 = vsub.f32 %v5378_v22, %v6079_v48  ;;  %v12241_v11 = vsub.f32 %v12177_v49, %v12989_v24  ;;  %v6172_v24 = vand.u32 4294901760, %v12042_v12  ;;  %v6272_v4 = vand.u32 4294901760, %v6271_v23 }
 0x900   : > { %v12203_v58 = vpack.c.bf16 %v6079_v48, %v6076_v36  ;;  %v12205_v22 = vsub.f32 %v5376_v18, %v6076_v36  ;;  %v5330_v38 = vpop.permute.xlu1 %5329  ;;  %9405 = vmatpush3.bf16.msra.mxu0 %v9404_v5  ;;  %v6277_v48 = vand.u32 4294901760, %v12034_v45  ;;  %v6166_v23 = vsub.f32 %v12046_v51, %v6165_v43 }
 0x901   : > { %v6031_v17 = vand.u32 4294901760, %v5330_v38  ;;  %v5328_v42 = vpop.permute.xlu0 %5327  ;;  %v12998_v51 = vand.u32 4294901760, %v12055_v56 }
 0x902   : > { %12983 = vst [vmem:[#allocation26_spill] sm:$0xff] %v12203_v58  ;;  %v6028_v10 = vand.u32 4294901760, %v5328_v42  ;;  %9343 = vmatprep.subr.bf16.mxu1 %v12203_v58  ;;  %v9406_v18 = vpack.c.bf16 %v12188_v53, %v12205_v22  ;;  %v12986_v58 = vand.u32 4294901760, %v12024_v21  ;;  %v6278_v20 = vsub.f32 %v12034_v45, %v6277_v48 }
 0x903   : > { %v12220_v19 = vsub.f32 %v5330_v38, %v6031_v17  ;;  %v12988_v38 = vand.u32 4294901760, %v12029_v1 }
 0x904   : > { %v6264_v60 = vsub.f32 %v12024_v21, %v12986_v58  ;;  %v12230_v9 = vpack.c.bf16 %v6031_v17, %v6028_v10  ;;  %v12232_v36 = vsub.f32 %v5328_v42, %v6028_v10  ;;  %v5384_v5 = vpop.permute.xlu1 %5383  ;;  %9407 = vmatprep.subr.bf16.mxu0 %v9406_v18  ;;  %v12990_v10 = vand.u32 4294901760, %v12183_v32 }
 0x905   : > { %v6285_v61 = vsub.f32 %v12029_v1, %v12988_v38  ;;  %v6085_v33 = vand.u32 4294901760, %v5384_v5  ;;  %v5382_v15 = vpop.permute.xlu0 %5381  ;;  %v12991_v18 = vand.u32 4294901760, %v12186_v25 }
 0x906   : > { %12987 = vst [vmem:[#allocation27_spill] sm:$0xff] %v12230_v9  ;;  %v9408_v17 = vpack.c.bf16 %v12220_v19, %v12232_v36  ;;  %v6082_v42 = vand.u32 4294901760, %v5382_v15  ;;  %9345 = vmatpush3.bf16.msra.mxu1 %v12230_v9  ;;  %v12249_v58 = vsub.f32 %v12183_v32, %v12990_v10  ;;  %v6265_v10 = vand.u32 4294901760, %v6264_v60 }
 0x907   : > { %v12254_v38 = vsub.f32 %v12186_v25, %v12991_v18  ;;  %v12259_v37 = vsub.f32 %v5384_v5, %v6085_v33  ;;  %v6286_v25 = vand.u32 4294901760, %v6285_v61  ;;  %v6173_v60 = vsub.f32 %v12042_v12, %v6172_v24 }
 0x908   : > { %v12261_v7 = vpack.c.bf16 %v6085_v33, %v6082_v42  ;;  %v12263_v9 = vsub.f32 %v5382_v15, %v6082_v42  ;;  %v5336_v50 = vpop.permute.xlu1 %5335  ;;  %9409 = vmatpush3.bf16.msra.mxu0 %v9408_v17  ;;  %v6279_v17 = vand.u32 4294901760, %v6278_v20  ;;  %v9350_v62 = vpack.c.bf16 %v6272_v4, %v6265_v10 }
 0x909   : > { %v6037_v26 = vand.u32 4294901760, %v5336_v50  ;;  %v5334_v45 = vpop.permute.xlu0 %5333  ;;  %v12995_v5 = vand.u32 4294901760, %v12024_v21  ;;  %v12996_v18 = vand.u32 4294901760, %v12020_v30  ;;  %v13000_v21 = vand.u32 4294901760, %v12064_v40 }
 0x90a   : > { %12992 = vst [vmem:[#allocation28_spill] sm:$0xff] %v12261_v7  ;;  %v6034_v32 = vand.u32 4294901760, %v5334_v45  ;;  %9347 = vmatprep.subr.bf16.mxu1 %v12261_v7  ;;  %v9410_v33 = vpack.c.bf16 %v12259_v37, %v12263_v9  ;;  %v12997_v7 = vand.u32 4294901760, %v12051_v35  ;;  %v6326_v20 = vand.u32 4294901760, %v12090_v29 }
 0x90b   : > { %v12274_v15 = vsub.f32 %v5336_v50, %v6037_v26  ;;  %v9446_v34 = vpack.c.bf16 %v12996_v18, %v12995_v5  ;;  %v6292_v50 = vsub.f32 %v12055_v56, %v12998_v51  ;;  %v6180_v30 = vsub.f32 %v12064_v40, %v13000_v21 }
 0x90c   : > { %v12276_v42 = vpack.c.bf16 %v6037_v26, %v6034_v32  ;;  %v12278_v61 = vsub.f32 %v5334_v45, %v6034_v32  ;;  %9411 = vmatprep.subr.bf16.mxu0 %v9410_v33  ;;  %v6299_v12 = vsub.f32 %v12051_v35, %v12997_v7  ;;  %v12999_v32 = vand.u32 4294901760, %v12060_v63 }
 0x90d   : > { %v13001_v7 = vand.u32 4294901760, %v12029_v1  ;;  %v6174_v45 = vand.u32 4294901760, %v6173_v60  ;;  %v6167_v5 = vand.u32 4294901760, %v6166_v23  ;;  %v6200_v33 = vand.u32 4294901760, %v12078_v14 }
 0x90e   : > { %12993 = vst [vmem:[#allocation29_spill] sm:$0xff] %v12276_v42  ;;  %12994 = vst [vmem:[#allocation30_spill] sm:$0xff] %v12278_v61  ;;  %v6187_v4 = vsub.f32 %v12060_v63, %v12999_v32  ;;  %v9412_v10 = vpack.c.bf16 %v12274_v15, %v12278_v61  ;;  %9349 = vmatpush3.bf16.msra.mxu1 %v12276_v42  ;;  %v9354_v51 = vpack.c.bf16 %v6286_v25, %v6279_v17 }
 0x90f   : > { %v9450_v18 = vpack.c.bf16 %v13001_v7, %v6277_v48  ;;  %9351 = vmatprep.subr.bf16.mxu1 %v9350_v62  ;;  %v6193_v32 = vand.u32 4294901760, %v12082_v6  ;;  %v6319_v21 = vand.u32 4294901760, %v12096_v52  ;;  %v9452_v26 = vpack.c.bf16 %v6172_v24, %v6165_v43 }
 0x910   : > { %9413 = vmatpush3.bf16.msra.mxu0 %v9412_v10  ;;  %v13002_v61 = vand.u32 4294901760, %v12069_v28  ;;  %v13003_v1 = vand.u32 4294901760, %v12073_v47  ;;  %v13004_v60 = vand.u32 4294901760, %v12167_v16  ;;  %v6293_v62 = vand.u32 4294901760, %v6292_v50 }
 0x911   : > { %9447 = vmatprep.subr.bf16.mxu0 %v9446_v34  ;;  %v6300_v25 = vand.u32 4294901760, %v6299_v12  ;;  %v6188_v23 = vand.u32 4294901760, %v6187_v4  ;;  %v6181_v17 = vand.u32 4294901760, %v6180_v30  ;;  %v6214_v7 = vand.u32 4294901760, %v12110_v57 }
 0x912   : > { %v6313_v42 = vsub.f32 %v12069_v28, %v13002_v61  ;;  %v6306_v48 = vsub.f32 %v12073_v47, %v13003_v1  ;;  %6098 = vmatmul.mubr.f32.vlgmr.msra.gmra.mrb[22].mxu1 %v13004_v60  ;;  %v6207_v43 = vand.u32 4294901760, %v12121_v44  ;;  %v13005_v24 = vand.u32 4294901760, %v12194_v59 }
 0x913   : > { %9353 = vmatpush3.bf16.msra.mxu1 %v11999_v13  ;;  %v6201_v61 = vsub.f32 %v12078_v14, %v6200_v33  ;;  %v6340_v16 = vand.u32 4294901760, %v12131_v46  ;;  %v6333_v34 = vand.u32 4294901760, %v12148_v41  ;;  %6534 = vmatmul.mubr.f32.vlgmr.msra.gmra.mrb[20].mxu0 %v12113_v39  ;;  %v9356_v12 = vpack.c.bf16 %v6174_v45, %v6167_v5 }
 0x914   : > { %6107 = vmatprep.mubr.f32.mxu1 %v13005_v24  ;;  %9355 = vmatprep.subr.bf16.mxu1 %v9354_v51  ;;  %v6194_v50 = vsub.f32 %v12082_v6, %v6193_v32  ;;  %v6327_v13 = vsub.f32 %v12090_v29, %v6326_v20  ;;  %v6320_v59 = vsub.f32 %v12096_v52, %v6319_v21  ;;  %v6127_v4 = vand.u32 4294901760, %v12241_v11 }
 0x915   : > { %9449 = vmatpush3.bf16.msra.mxu0 %v11995_v27  ;;  %6540 = vmatprep.mubr.f32.mxu0 %v12135_v3  ;;  %v13006_v30 = vand.u32 4294901760, %v12199_v2  ;;  %v9358_v10 = vpack.c.bf16 %v6300_v25, %v6293_v62  ;;  %v13007_v45 = vand.u32 4294901760, %v12055_v56  ;;  %v13008_v5 = vand.u32 4294901760, %v12051_v35 }
 0x916   : > { %9451 = vmatprep.subr.bf16.mxu0 %v9450_v18  ;;  %v6307_v1 = vand.u32 4294901760, %v6306_v48  ;;  %v6314_v60 = vand.u32 4294901760, %v6313_v42  ;;  %v6215_v27 = vsub.f32 %v12110_v57, %v6214_v7  ;;  %v6208_v11 = vsub.f32 %v12121_v44, %v6207_v43 }
 0x917   : > { %6113 = vmatmul.mubr.f32.gmra.mrb[24].mxu1 %v13006_v30  ;;  %v9454_v51 = vpack.c.bf16 %v13008_v5, %v13007_v45  ;;  %v13009_v2 = vand.u32 4294901760, %v12211_v55  ;;  %v9360_v18 = vpack.c.bf16 %v6188_v23, %v6181_v17  ;;  %v6136_v56 = vand.u32 4294901760, %v12249_v58  ;;  %6543 = vmatmul.mubr.f32.gmra.mrb[22].mxu0 %v12138_v54 }
 0x918   : > { %9357 = vmatpush3.bf16.msra.mxu1 %v9356_v12  ;;  %v6341_v35 = vsub.f32 %v12131_v46, %v6340_v16  ;;  %v6334_v42 = vsub.f32 %v12148_v41, %v6333_v34  ;;  %v6228_v48 = vand.u32 4294901760, %v12162_v31  ;;  %v6221_v62 = vand.u32 4294901760, %v12173_v8  ;;  %6549 = vmatprep.mubr.f32.mxu0 %v12151_v0 }
 0x919   : > { %6122 = vmatprep.mubr.f32.mxu1 %v13009_v2  ;;  %9359 = vmatprep.subr.bf16.mxu1 %v9358_v10  ;;  %v6202_v55 = vand.u32 4294901760, %v6201_v61  ;;  %v6195_v25 = vand.u32 4294901760, %v6194_v50  ;;  %v6321_v23 = vand.u32 4294901760, %v6320_v59  ;;  %v6328_v58 = vand.u32 4294901760, %v6327_v13 }
 0x91a   : > { %9453 = vmatpush3.bf16.msra.mxu0 %v9452_v26  ;;  %v6354_v17 = vand.u32 4294901760, %v12188_v53  ;;  %v6347_v24 = vand.u32 4294901760, %v12205_v22  ;;  %v9362_v12 = vpack.c.bf16 %v6314_v60, %v6307_v1  ;;  %v6142_v30 = vand.u32 4294901760, %v12254_v38  ;;  %v13014_v60 = vld [vmem:[#allocation24_spill] sm:$0xff] }
 0x91b   : > { %6128 = vmatmul.mubr.f32.gmra.mrb[26].mxu1 %v6127_v4  ;;  %9455 = vmatprep.subr.bf16.mxu0 %v9454_v51  ;;  %v6216_v45 = vand.u32 4294901760, %v6215_v27  ;;  %v6209_v10 = vand.u32 4294901760, %v6208_v11  ;;  %v13010_v61 = vand.u32 4294901760, %v12064_v40  ;;  %v13011_v26 = vand.u32 4294901760, %v12060_v63 }
 0x91c   : > { %9361 = vmatpush3.bf16.msra.mxu1 %v9360_v18  ;;  %6137 = vmatprep.mubr.f32.mxu1 %v6136_v56  ;;  %v13012_v13 = vand.u32 4294901760, %v12073_v47  ;;  %v13013_v59 = vand.u32 4294901760, %v12069_v28  ;;  %v6229_v4 = vsub.f32 %v12162_v31, %v6228_v48  ;;  %v6222_v38 = vsub.f32 %v12173_v8, %v6221_v62 }
 0x91d   : > { %v9456_v50 = vpack.c.bf16 %v13011_v26, %v13010_v61  ;;  %9363 = vmatprep.subr.bf16.mxu1 %v9362_v12  ;;  %v6335_v51 = vand.u32 4294901760, %v6334_v42  ;;  %v6342_v1 = vand.u32 4294901760, %v6341_v35  ;;  %6552 = vmatmul.mubr.f32.gmra.mrb[24].mxu0 %v12177_v49  ;;  %v6242_v63 = vand.u32 4294901760, %v12220_v19  ;;  %v13015_v42 = vld [vmem:[#allocation8_spill] sm:$0xff]  ;;  %v13016_v12 = vld [vmem:[#allocation25_spill] sm:$0xff] }
 0x91e   : > { %v9458_v5 = vpack.c.bf16 %v13013_v59, %v13012_v13  ;;  %v6235_v40 = vand.u32 4294901760, %v12232_v36  ;;  %v9364_v28 = vpack.c.bf16 %v6202_v55, %v6195_v25  ;;  %v9366_v47 = vpack.c.bf16 %v6328_v58, %v6321_v23  ;;  %6558 = vmatprep.mubr.f32.mxu0 %v13014_v60 }
 0x91f   : > { %9457 = vmatpush3.bf16.msra.mxu0 %v9456_v50  ;;  %v6355_v27 = vsub.f32 %v12188_v53, %v6354_v17  ;;  %v6348_v11 = vsub.f32 %v12205_v22, %v6347_v24  ;;  %v6368_v2 = vand.u32 4294901760, %v12259_v37  ;;  %v6361_v18 = vand.u32 4294901760, %v12263_v9  ;;  %6143 = vmatmul.mubr.f32.gmra.mrb[28].mxu1 %v6142_v30  ;;  %v12402_v30 = vpop.f32.mrb[18].mxu1  ;;  %v13019_v53 = vld [vmem:[#allocation14_spill] sm:$0xff]  ;;  %v13020_v22 = vld [vmem:[#allocation13_spill] sm:$0xff] }
 0x920   : > { %9459 = vmatprep.subr.bf16.mxu0 %v9458_v5  ;;  %9365 = vmatpush3.bf16.msra.mxu1 %v9364_v28  ;;  %v9460_v56 = vpack.c.bf16 %v6200_v33, %v6193_v32  ;;  %v9462_v35 = vpack.c.bf16 %v6326_v20, %v6319_v21  ;;  %v6230_v55 = vand.u32 4294901760, %v6229_v4  ;;  %v6223_v25 = vand.u32 4294901760, %v6222_v38  ;;  %v13017_v33 = vld [vmem:[#allocation30_spill] sm:$0xff]  ;;  %v12409_v20 = vpop.f32.mrb[19].mxu1  ;;  %v13024_v38 = vld [vmem:[#allocation16_spill] sm:$0xff]  ;;  %v13029_v28 = vld [vmem:[#allocation3_spill] sm:$0xff] }
 0x921   : > { %6373 = vmatprep.mubr.f32.mxu1 %v13015_v42  ;;  %9367 = vmatprep.subr.bf16.mxu1 %v9366_v47  ;;  %v9368_v23 = vpack.c.bf16 %v6216_v45, %v6209_v10  ;;  %v9370_v58 = vpack.c.bf16 %v6342_v1, %v6335_v51  ;;  %v6243_v6 = vsub.f32 %v12220_v19, %v6242_v63  ;;  %v6256_v52 = vand.u32 4294901760, %v12274_v15  ;;  %v12421_v26 = vpop.f32.mrb[20].mxu1  ;;  %v13025_v51 = vld [vmem:[#allocation20_spill] sm:$0xff]  ;;  %v13030_v47 = vld [vmem:[#allocation18_spill] sm:$0xff] }
 0x922   : > { %6561 = vmatmul.mubr.f32.gmra.mrb[26].mxu0 %v13016_v12  ;;  %v6236_v14 = vsub.f32 %v12232_v36, %v6235_v40  ;;  %v6249_v29 = vand.u32 4294901760, %v13017_v33  ;;  %v6369_v32 = vsub.f32 %v12259_v37, %v6368_v2  ;;  %v6362_v21 = vsub.f32 %v12263_v9, %v6361_v18  ;;  %v12425_v44 = vpop.f32.mrb[21].mxu1  ;;  %v13026_v1 = vld [vmem:[#allocation12_spill] sm:$0xff] }
 0x923   : > { %9461 = vmatpush3.bf16.msra.mxu0 %v9460_v56  ;;  %6868 = vmatprep.mubr.f32.mxu0 %v13015_v42  ;;  %v6349_v45 = vand.u32 4294901760, %v6348_v11  ;;  %v6356_v10 = vand.u32 4294901760, %v6355_v27  ;;  %v9464_v19 = vpack.c.bf16 %v6214_v7, %v6207_v43  ;;  %v9466_v36 = vpack.c.bf16 %v6340_v16, %v6333_v34  ;;  %v13031_v27 = vld [vmem:[#allocation23_spill] sm:$0xff]  ;;  %v13032_v11 = vld [vmem:[#allocation10_spill] sm:$0xff]  ;;  %v13035_v56 = vld [vmem:[#allocation9_spill] sm:$0xff] }
 0x924   : > { %9463 = vmatprep.subr.bf16.mxu0 %v9462_v35  ;;  %9369 = vmatpush3.bf16.msra.mxu1 %v9368_v23  ;;  %v9372_v61 = vpack.c.bf16 %v6230_v55, %v6223_v25  ;;  %v6244_v37 = vand.u32 4294901760, %v6243_v6  ;;  %v6237_v9 = vand.u32 4294901760, %v6236_v14  ;;  %v6257_v50 = vsub.f32 %v12274_v15, %v6256_v52  ;;  %v13036_v35 = vld [vmem:[#allocation6_spill] sm:$0xff]  ;;  %v13037_v55 = vld [vmem:[#allocation7_spill] sm:$0xff]  ;;  %v13041_v6 = vld [vmem:[#allocation28_spill] sm:$0xff] }
 0x925   : > { %9371 = vmatprep.subr.bf16.mxu1 %v9370_v58  ;;  %v6250_v13 = vsub.f32 %v13017_v33, %v6249_v29  ;;  %v9374_v57 = vpack.c.bf16 %v6356_v10, %v6349_v45  ;;  %v6363_v7 = vand.u32 4294901760, %v6362_v21  ;;  %v6370_v43 = vand.u32 4294901760, %v6369_v32  ;;  %v13038_v25 = vld [vmem:[#allocation19_spill] sm:$0xff]  ;;  %v13039_v23 = vld [vmem:[#allocation26_spill] sm:$0xff]  ;;  %v13042_v14 = vld [vmem:[#allocation29_spill] sm:$0xff] }
 0x926   : > { %v9468_v46 = vpack.c.bf16 %v6228_v48, %v6221_v62  ;;  %v9470_v41 = vpack.c.bf16 %v6354_v17, %v6347_v24  ;;  %v6258_v15 = vand.u32 4294901760, %v6257_v50  ;;  %v9376_v34 = vpack.c.bf16 %v6244_v37, %v6237_v9  ;;  %v13018_v48 = vld [vmem:[#allocation4_spill] sm:$0xff]  ;;  %v13021_v62 = vld [vmem:[#allocation5_spill] sm:$0xff]  ;;  %v13022_v17 = vld [vmem:[#allocation15_spill] sm:$0xff] }
 0x927   : > { %9465 = vmatpush3.bf16.msra.mxu0 %v9464_v19  ;;  %v6251_v16 = vand.u32 4294901760, %v6250_v13  ;;  %v9378_v59 = vpack.c.bf16 %v6370_v43, %v6363_v7  ;;  %v9472_v5 = vpack.c.bf16 %v6242_v63, %v6235_v40  ;;  %v9474_v4 = vpack.c.bf16 %v6368_v2, %v6361_v18  ;;  %v13023_v24 = vld [vmem:[#allocation21_spill] sm:$0xff]  ;;  %v13027_v63 = vld [vmem:[#allocation22_spill] sm:$0xff]  ;;  %v13033_v2 = vld [vmem:[#allocation11_spill] sm:$0xff] }
 0x928   : > { %9467 = vmatprep.subr.bf16.mxu0 %v9466_v36  ;;  %9373 = vmatpush3.bf16.msra.mxu1 %v9372_v61  ;;  %v9476_v31 = vpack.c.bf16 %v6256_v52, %v6249_v29  ;;  %v13028_v40 = vld [vmem:[#allocation17_spill] sm:$0xff]  ;;  %v13034_v18 = vand.u32 4294901760, %v13033_v2  ;;  %v13040_v58 = vld [vmem:[#allocation27_spill] sm:$0xff]  ;;  %v13043_v52 = vand.u32 4294901760, %v12113_v39  ;;  %v13044_v33 = vand.u32 4294901760, %v12135_v3 }
 0x929   : > { %9375 = vmatprep.subr.bf16.mxu1 %v9374_v57  ;;  %v9380_v8 = vpack.c.bf16 %v6258_v15, %v6251_v16  ;;  %v13045_v29 = vand.u32 4294901760, %v12138_v54  ;;  %v13046_v32 = vand.u32 4294901760, %v12151_v0  ;;  %v13047_v39 = vand.u32 4294901760, %v12177_v49 }
 0x92a   : > { %v13048_v3 = vand.u32 4294901760, %v13014_v60  ;;  %v13049_v54 = vand.u32 4294901760, %v13016_v12  ;;  %v9725_v49 = vmov 0.0|0.0   ;;  %v13050_v0 = vmov 0.0  }
 0x92b   : > { %9469 = vmatpush3.bf16.msra.mxu0 %v9468_v46 }
 0x92c   : > { %9471 = vmatprep.subr.bf16.mxu0 %v9470_v41  ;;  %9377 = vmatpush3.bf16.msra.mxu1 %v9376_v34 }
 0x92d   : > { %9379 = vmatprep.subr.bf16.mxu1 %v9378_v59 }
 0x92f   : > { %9473 = vmatpush3.bf16.msra.mxu0 %v9472_v5 }
 0x930   : > { %9475 = vmatprep.subr.bf16.mxu0 %v9474_v4  ;;  %9381 = vmatpush3.bf16.msra.mxu1 %v9380_v8 }
 0x931   : > { %9415 = vmatprep.subr.bf16.mxu1 %v13018_v48 }
 0x933   : > { %9477 = vmatpush3.bf16.msra.mxu0 %v9476_v31  ;;  %6375 = vmatmul.mubr.f32.vlgmr.msra.gmra.mrb[30].mxu1 %v13019_v53 }
 0x934   : > { %9417 = vmatpush3.bf16.msra.mxu1 %v13020_v22  ;;  %6380 = vmatprep.mubr.f32.mxu1 %v13021_v62 }
 0x935   : > { %9419 = vmatprep.subr.bf16.mxu1 %v13022_v17  ;;  %9510 = vmatprep.subr.bf16.mxu0 %v9725_v49 }
 0x936   : > { %6870 = vmatmul.mubr.f32.vlgmr.msra.gmra.mrb[28].mxu0 %v13019_v53 }
 0x937   : > { %6875 = vmatprep.mubr.f32.mxu0 %v13021_v62  ;;  %6382 = vmatmul.mubr.f32.gmra.mrb[32].mxu1 %v13023_v24 }
 0x938   : > { %9421 = vmatpush3.bf16.msra.mxu1 %v13024_v38  ;;  %6387 = vmatprep.mubr.f32.mxu1 %v13025_v51 }
 0x939   : > { %9423 = vmatprep.subr.bf16.mxu1 %v13026_v1 }
 0x93a   : > { %6877 = vmatmul.mubr.f32.gmra.mrb[30].mxu0 %v13023_v24 }
 0x93b   : > { %6882 = vmatprep.mubr.f32.mxu0 %v13025_v51  ;;  %6389 = vmatmul.mubr.f32.gmra.mrb[34].mxu1 %v13027_v63 }
 0x93c   : > { %9425 = vmatpush3.bf16.msra.mxu1 %v13028_v40  ;;  %6394 = vmatprep.mubr.f32.mxu1 %v13029_v28 }
 0x93d   : > { %9427 = vmatprep.subr.bf16.mxu1 %v13030_v47 }
 0x93e   : > { %6884 = vmatmul.mubr.f32.gmra.mrb[32].mxu0 %v13027_v63 }
 0x93f   : > { %6889 = vmatprep.mubr.f32.mxu0 %v13029_v28  ;;  %6396 = vmatmul.mubr.f32.gmra.mrb[36].mxu1 %v13031_v27 }
 0x940   : > { %9429 = vmatpush3.bf16.msra.mxu1 %v13032_v11  ;;  %6665 = vmatprep.mubr.f32.mxu1 %v13034_v18 }
 0x941   : > { %9431 = vmatprep.subr.bf16.mxu1 %v13035_v56 }
 0x942   : > { %6891 = vmatmul.mubr.f32.gmra.mrb[34].mxu0 %v13031_v27 }
 0x943   : > { %8588 = vmatprep.mubr.msk.f32.mxu0 %vm9726_vm3, %v13050_v0 }
 0x944   : > { %9433 = vmatpush3.bf16.msra.mxu1 %v13036_v35 }
 0x945   : > { %9435 = vmatprep.subr.bf16.mxu1 %v13037_v55 }
 0x948   : > { %9437 = vmatpush3.bf16.msra.mxu1 %v13038_v25 }
 0x949   : > { %9439 = vmatprep.subr.bf16.mxu1 %v13039_v23 }
 0x94c   : > { %9441 = vmatpush3.bf16.msra.mxu1 %v13040_v58 }
 0x94d   : > { %9443 = vmatprep.subr.bf16.mxu1 %v13041_v6 }
 0x950   : > { %9445 = vmatpush3.bf16.msra.mxu1 %v13042_v14 }
 0x951   : > { %9479 = vmatprep.subr.bf16.mxu1 %v13018_v48 }
 0x953   : > { %6669 = vmatmul.mubr.f32.vlgmr.msra.gmra.mrb[38].mxu1 %v13043_v52 }
 0x954   : > { %9481 = vmatpush3.bf16.msra.mxu1 %v13020_v22  ;;  %6676 = vmatprep.mubr.f32.mxu1 %v13044_v33 }
 0x955   : > { %9483 = vmatprep.subr.bf16.mxu1 %v13022_v17 }
 0x957   : > { %6680 = vmatmul.mubr.f32.gmra.mrb[40].mxu1 %v13045_v29 }
 0x958   : > { %9485 = vmatpush3.bf16.msra.mxu1 %v13024_v38  ;;  %6687 = vmatprep.mubr.f32.mxu1 %v13046_v32 }
 0x959   : > { %9487 = vmatprep.subr.bf16.mxu1 %v13026_v1 }
 0x95b   : > { %6691 = vmatmul.mubr.f32.gmra.mrb[42].mxu1 %v13047_v39 }
 0x95c   : > { %9489 = vmatpush3.bf16.msra.mxu1 %v13028_v40  ;;  %6698 = vmatprep.mubr.f32.mxu1 %v13048_v3 }
 0x95d   : > { %9491 = vmatprep.subr.bf16.mxu1 %v13030_v47 }
 0x95f   : > { %6702 = vmatmul.mubr.f32.gmra.mrb[44].mxu1 %v13049_v54 }
 0x960   : > { %9493 = vmatpush3.bf16.msra.mxu1 %v13032_v11  ;;  %6993 = vmatprep.mubr.f32.mxu1 %v13015_v42 }
 0x961   : > { %9495 = vmatprep.subr.bf16.mxu1 %v13035_v56 }
 0x964   : > { %9497 = vmatpush3.bf16.msra.mxu1 %v13036_v35 }
 0x965   : > { %9499 = vmatprep.subr.bf16.mxu1 %v13037_v55 }
 0x968   : > { %9501 = vmatpush3.bf16.msra.mxu1 %v13038_v25 }
 0x969   : > { %9503 = vmatprep.subr.bf16.mxu1 %v13039_v23 }
 0x96c   : > { %9505 = vmatpush3.bf16.msra.mxu1 %v13040_v58 }
 0x96d   : > { %9507 = vmatprep.subr.bf16.mxu1 %v13041_v6 }
 0x970   : > { %9509 = vmatpush3.bf16.msra.mxu1 %v13042_v14 }
 0x973   : > { %6995 = vmatmul.mubr.f32.vlgmr.msra.gmra.mrb[46].mxu1 %v13019_v53 }
 0x974   : > { %7000 = vmatprep.mubr.f32.mxu1 %v13021_v62 }
 0x977   : > { %7002 = vmatmul.mubr.f32.gmra.mrb[48].mxu1 %v13023_v24 }
 0x978   : > { %7007 = vmatprep.mubr.f32.mxu1 %v13025_v51 }
 0x97b   : > { %7009 = vmatmul.mubr.f32.gmra.mrb[50].mxu1 %v13027_v63 }
 0x97c   : > { %7014 = vmatprep.mubr.f32.mxu1 %v13029_v28 }
 0x97f   : > { %7016 = vmatmul.mubr.f32.gmra.mrb[52].mxu1 %v13031_v27 }
 0x9e5   : > { %v8018_v60 = vpop.f32.mrb[22].mxu1 }
 0x9e6   : > { %v8019_v42 = vpop.f32.mrb[23].mxu1  ;;  %v8106_v21 = vpop.f32.mrb[20].mxu0 }
 0x9e7   : > { %v8020_v12 = vadd.f32 %v8019_v42, %v8018_v60  ;;  %v8107_v45 = vpop.f32.mrb[21].mxu0 }
 0x9e8   : > { %v8108_v36 = vadd.f32 %v8107_v45, %v8106_v21 }
 0x9e9   : > { %v6100_v10 = vadd.f32 %v8020_v12, %v12409_v20 }
 0x9ea   : > { %v8021_v19 = vpop.f32.mrb[24].mxu1  ;;  %v8109_v9 = vpop.f32.mrb[22].mxu0 }
 0x9eb   : > { %v8022_v61 = vpop.f32.mrb[25].mxu1  ;;  %v8110_v50 = vpop.f32.mrb[23].mxu0 }
 0x9ec   : > { %v8023_v37 = vadd.f32 %v8022_v61, %v8021_v19  ;;  %v8111_v7 = vadd.f32 %v8110_v50, %v8109_v9 }
 0x9ee   : > { %v6115_v13 = vadd.f32 %v12402_v30, %v8023_v37  ;;  %v8024_v57 = vpop.f32.mrb[26].mxu1 }
 0x9ef   : > { %v8025_v43 = vpop.f32.mrb[27].mxu1 }
 0x9f0   : > { %v8026_v46 = vadd.f32 %v8025_v43, %v8024_v57  ;;  %v8112_v41 = vpop.f32.mrb[24].mxu0 }
 0x9f1   : > { %v8113_v15 = vpop.f32.mrb[25].mxu0 }
 0x9f2   : > { %v6130_v16 = vadd.f32 %v8026_v46, %v12425_v44  ;;  %v8027_v34 = vpop.f32.mrb[28].mxu1  ;;  %v8114_v59 = vadd.f32 %v8113_v15, %v8112_v41 }
 0x9f3   : > { %v8028_v5 = vpop.f32.mrb[29].mxu1 }
 0x9f4   : > { %v8029_v20 = vadd.f32 %v8028_v5, %v8027_v34  ;;  %v7033_v5 = vld [vmem:[%s12572_s11] sm:$0x1] }
 0x9f5   : > { %v8115_v4 = vpop.f32.mrb[26].mxu0 }
 0x9f6   : > { %v8116_v8 = vpop.f32.mrb[27].mxu0  ;;  %v6145_v31 = vadd.f32 %v12421_v26, %v8029_v20 }
 0x9f7   : > { %v8117_v48 = vadd.f32 %v8116_v8, %v8115_v4 }
 0xa06   : > { %v8062_v53 = vpop.f32.mrb[30].mxu1 }
 0xa07   : > { %v8063_v22 = vpop.f32.mrb[31].mxu1 }
 0xa08   : > { %v8064_v30 = vadd.f32 %v8063_v22, %v8062_v53  ;;  %v7037_v53 = vsel %vm7035_vm4, %v7033_v5, 0  ;;  %v7022_v22 = vld [vmem:[%s12571_s10 + $0x8] sm:$0xff] }
 0xa09   : > { %v8194_v62 = vpop.f32.mrb[28].mxu0 }
 0xa0a   : > { %v8195_v17 = vpop.f32.mrb[29].mxu0  ;;  %v6377_v24 = vadd.f32 %v8064_v30, %v6100_v10  ;;  %v8065_v38 = vpop.f32.mrb[32].mxu1 }
 0xa0b   : > { %v8196_v51 = vadd.f32 %v8195_v17, %v8194_v62  ;;  %v8066_v1 = vpop.f32.mrb[33].mxu1 }
 0xa0c   : > { %v6536_v63 = vadd.f32 %v8108_v36, %v6377_v24  ;;  %v8067_v44 = vadd.f32 %v8066_v1, %v8065_v38  ;;  %v12521_v38 = vand.u32 4294901760, %v7037_v53 }
 0xa0d   : > { %v8197_v40 = vpop.f32.mrb[30].mxu0 }
 0xa0e   : > { %v8198_v28 = vpop.f32.mrb[31].mxu0  ;;  %v6384_v47 = vadd.f32 %v8067_v44, %v6115_v13  ;;  %v8068_v27 = vpop.f32.mrb[34].mxu1  ;;  %v7023_v44 = vld [vmem:[%s12571_s10 + $0x10] sm:$0xff] }
 0xa0f   : > { %v8199_v11 = vadd.f32 %v8198_v28, %v8197_v40  ;;  %v8069_v2 = vpop.f32.mrb[35].mxu1 }
 0xa10   : > { %v6545_v18 = vadd.f32 %v8111_v7, %v6384_v47  ;;  %v8070_v26 = vadd.f32 %v8069_v2, %v8068_v27  ;;  %v7109_v2 = vsub.f32 %v7037_v53, %v12521_v38 }
 0xa11   : > { %v8200_v56 = vpop.f32.mrb[32].mxu0 }
 0xa12   : > { %v8201_v35 = vpop.f32.mrb[33].mxu0  ;;  %v6391_v55 = vadd.f32 %v8070_v26, %v6130_v16  ;;  %v8071_v25 = vpop.f32.mrb[36].mxu1 }
 0xa13   : > { %v8202_v23 = vadd.f32 %v8201_v35, %v8200_v56  ;;  %v8072_v58 = vpop.f32.mrb[37].mxu1 }
 0xa14   : > { %v6554_v6 = vadd.f32 %v8114_v59, %v6391_v55  ;;  %v8073_v14 = vadd.f32 %v8072_v58, %v8071_v25  ;;  %v7021_v59 = vld [vmem:[%s12571_s10] sm:$0xff]  ;;  %v7024_v55 = vld [vmem:[%s12571_s10 + $0x18] sm:$0xff] }
 0xa15   : > { %v8203_v52 = vpop.f32.mrb[34].mxu0 }
 0xa16   : > { %v8204_v33 = vpop.f32.mrb[35].mxu0  ;;  %v6398_v29 = vadd.f32 %v8073_v14, %v6145_v31  ;;  %v7110_v14 = vand.u32 4294901760, %v7109_v2 }
 0xa17   : > { %v8205_v32 = vadd.f32 %v8204_v33, %v8203_v52 }
 0xa18   : > { %v6563_v39 = vadd.f32 %v8117_v48, %v6398_v29 }
 0xa26   : > { %v8150_v3 = vpop.f32.mrb[38].mxu1 }
 0xa27   : > { %v8151_v54 = vpop.f32.mrb[39].mxu1 }
 0xa28   : > { %v8152_v60 = vadd.f32 %v8151_v54, %v8150_v3 }
 0xa2a   : > { %v6671_v42 = vadd.f32 %v8152_v60, %v6536_v63  ;;  %v8153_v12 = vpop.f32.mrb[40].mxu1 }
 0xa2b   : > { %v8154_v21 = vpop.f32.mrb[41].mxu1 }
 0xa2c   : > { %v6872_v45 = vadd.f32 %v8196_v51, %v6671_v42  ;;  %v8155_v10 = vadd.f32 %v8154_v21, %v8153_v12  ;;  %v7111_v12 = vsub.f32 %v7109_v2, %v7110_v14 }
 0xa2e   : > { %v6682_v19 = vadd.f32 %v8155_v10, %v6545_v18  ;;  %v8156_v36 = vpop.f32.mrb[42].mxu1 }
 0xa2f   : > { %v8157_v61 = vpop.f32.mrb[43].mxu1 }
 0xa30   : > { %v6879_v37 = vadd.f32 %v8199_v11, %v6682_v19  ;;  %v8158_v9 = vadd.f32 %v8157_v61, %v8156_v36 }
 0xa32   : > { %v6693_v50 = vadd.f32 %v8158_v9, %v6554_v6  ;;  %v8159_v13 = vpop.f32.mrb[44].mxu1  ;;  %v7112_v9 = vand.u32 4294901760, %v7111_v12 }
 0xa33   : > { %v8160_v57 = vpop.f32.mrb[45].mxu1 }
 0xa34   : > { %v6886_v7 = vadd.f32 %v8202_v23, %v6693_v50  ;;  %v8161_v43 = vadd.f32 %v8160_v57, %v8159_v13 }
 0xa36   : > { %v6704_v46 = vadd.f32 %v8161_v43, %v6563_v39 }
 0xa38   : > { %v6893_v41 = vadd.f32 %v8205_v32, %v6704_v46 }
 0xa46   : > { %v8238_v15 = vpop.f32.mrb[46].mxu1 }
 0xa47   : > { %v8239_v16 = vpop.f32.mrb[47].mxu1 }
 0xa48   : > { %v8240_v34 = vadd.f32 %v8239_v16, %v8238_v15  ;;  %v7034_v16 = vld [vmem:[#allocation2] sm:$0x1] }
 0xa4a   : > { %v6997_v20 = vadd.f32 %v8240_v34, %v6872_v45  ;;  %v8241_v4 = vpop.f32.mrb[48].mxu1 }
 0xa4b   : > { %v8242_v8 = vpop.f32.mrb[49].mxu1 }
 0xa4c   : > { %v7025_v31 = vadd.f32 %v7021_v59, %v6997_v20  ;;  %v8243_v48 = vadd.f32 %v8242_v8, %v8241_v4 }
 0xa4e   : > { %v7029_v30 = vmax.f32 %v7025_v31, 0.0  ;;  %v7004_v62 = vadd.f32 %v8243_v48, %v6879_v37  ;;  %v8244_v17 = vpop.f32.mrb[50].mxu1 }
 0xa4f   : > { %v8245_v24 = vpop.f32.mrb[51].mxu1 }
 0xa50   : > { %v7040_v51 = vand.u32 4294901760, %v7029_v30  ;;  %v7026_v1 = vadd.f32 %v7022_v22, %v7004_v62  ;;  %v8246_v63 = vadd.f32 %v8245_v24, %v8244_v17 }
 0xa52   : > { %v7120_v40 = vsub.f32 %v7029_v30, %v7040_v51  ;;  %v7030_v28 = vmax.f32 %v7026_v1, 0.0  ;;  %v7011_v47 = vadd.f32 %v8246_v63, %v6886_v7  ;;  %v8247_v27 = vpop.f32.mrb[52].mxu1 }
 0xa53   : > { %v8248_v11 = vpop.f32.mrb[53].mxu1 }
 0xa54   : > { %v7121_v18 = vand.u32 4294901760, %v7120_v40  ;;  %v7043_v26 = vand.u32 4294901760, %v7030_v28  ;;  %v7027_v56 = vadd.f32 %v7023_v44, %v7011_v47  ;;  %v8249_v35 = vadd.f32 %v8248_v11, %v8247_v27 }
 0xa56   : > { %v7127_v25 = vsub.f32 %v7030_v28, %v7043_v26  ;;  %v7031_v23 = vmax.f32 %v7027_v56, 0.0  ;;  %v7018_v58 = vadd.f32 %v8249_v35, %v6893_v41  ;;  %v9511_v6 = vpack.c.bf16 %v7043_v26, %v7040_v51 }
 0xa57   : > { %v7122_v52 = vsub.f32 %v7120_v40, %v7121_v18 }
 0xa58   : > { %v7128_v33 = vand.u32 4294901760, %v7127_v25  ;;  %v7046_v29 = vand.u32 4294901760, %v7031_v23  ;;  %v7028_v32 = vadd.f32 %v7024_v55, %v7018_v58  ;;  %9512 = vmatpush3.bf16.msra.mxu0 %v9511_v6  ;;  %v9523_v39 = vpack.c.bf16 %v7127_v25, %v7120_v40 }
 0xa59   : > { %9513 = vmatprep.subr.bf16.mxu0 %v9725_v49  ;;  %v7123_v10 = vand.u32 4294901760, %v7122_v52 }
 0xa5a   : > { %v7134_v3 = vsub.f32 %v7031_v23, %v7046_v29  ;;  %v7032_v54 = vmax.f32 %v7028_v32, 0.0  ;;  %v7129_v60 = vsub.f32 %v7127_v25, %v7128_v33  ;;  %v9535_v42 = vpack.c.bf16 %v7128_v33, %v7121_v18 }
 0xa5c   : > { %v7135_v21 = vand.u32 4294901760, %v7134_v3  ;;  %v7049_v45 = vand.u32 4294901760, %v7032_v54  ;;  %v7130_v19 = vand.u32 4294901760, %v7129_v60 }
 0xa5e   : > { %v7141_v36 = vsub.f32 %v7032_v54, %v7049_v45  ;;  %v9514_v61 = vpack.c.bf16 %v7049_v45, %v7046_v29  ;;  %v9517_v37 = vpack.c.bf16 %v7130_v19, %v7123_v10  ;;  %v7136_v13 = vsub.f32 %v7134_v3, %v7135_v21 }
 0xa60   : > { %v7142_v50 = vand.u32 4294901760, %v7141_v36  ;;  %9515 = vmatpush3.bf16.msra.mxu0 %v9514_v61  ;;  %v9526_v57 = vpack.c.bf16 %v7141_v36, %v7134_v3  ;;  %v7137_v46 = vand.u32 4294901760, %v7136_v13 }
 0xa61   : > { %9516 = vmatprep.subr.bf16.mxu0 %v9725_v49 }
 0xa62   : > { %v7143_v7 = vsub.f32 %v7141_v36, %v7142_v50  ;;  %v9538_v43 = vpack.c.bf16 %v7142_v50, %v7135_v21 }
 0xa63   : > { %8589 = vmatmul.mubr.f32.vlgmr.msra.gmra.mrb[36].mxu0 %v7112_v9 }
 0xa64   : > { %9518 = vmatpush3.bf16.msra.mxu0 %v9517_v37  ;;  %v7144_v41 = vand.u32 4294901760, %v7143_v7  ;;  %8599 = vmatprep.mubr.msk.f32.mxu0 %vm9726_vm3, %v13050_v0 }
 0xa65   : > { %9519 = vmatprep.subr.bf16.mxu0 %v9725_v49 }
 0xa66   : > { %v9520_v15 = vpack.c.bf16 %v7144_v41, %v7137_v46 }
 0xa68   : > { %9521 = vmatpush3.bf16.msra.mxu0 %v9520_v15 }
 0xa69   : > { %9522 = vmatprep.subr.bf16.mxu0 %v9725_v49 }
 0xa6b   : > { %8600 = vmatmul.mubr.f32.vlgmr.msra.gmra.mrb[36].mxu0 %v12521_v38 }
 0xa6c   : > { %9524 = vmatpush3.bf16.msra.mxu0 %v9523_v39  ;;  %8610 = vmatprep.mubr.msk.f32.mxu0 %vm9726_vm3, %v13050_v0 }
 0xa6d   : > { %9525 = vmatprep.subr.bf16.mxu0 %v9725_v49 }
 0xa70   : > { %9527 = vmatpush3.bf16.msra.mxu0 %v9526_v57 }
 0xa71   : > { %9528 = vmatprep.subr.bf16.mxu0 %v9725_v49 }
 0xa73   : > { %8611 = vmatmul.mubr.f32.vlgmr.msra.gmra.mrb[36].mxu0 %v7109_v2 }
 0xa74   : > { %9530 = vmatpush3.bf16.msra.mxu0 %v9511_v6  ;;  %8621 = vmatprep.mubr.msk.f32.mxu0 %vm9726_vm3, %v13050_v0 }
 0xa75   : > { %9531 = vmatprep.subr.bf16.mxu0 %v9725_v49 }
 0xa78   : > { %9533 = vmatpush3.bf16.msra.mxu0 %v9514_v61 }
 0xa79   : > { %9534 = vmatprep.subr.bf16.mxu0 %v9725_v49 }
 0xa7b   : > { %8622 = vmatmul.mubr.f32.vlgmr.msra.gmra.mrb[36].mxu0 %v7110_v14 }
 0xa7c   : > { %9536 = vmatpush3.bf16.msra.mxu0 %v9535_v42  ;;  %8632 = vmatprep.mubr.msk.f32.mxu0 %vm9726_vm3, %v13050_v0 }
 0xa7d   : > { %9537 = vmatprep.subr.bf16.mxu0 %v9725_v49 }
 0xa80   : > { %9539 = vmatpush3.bf16.msra.mxu0 %v9538_v43 }
 0xa81   : > { %9540 = vmatprep.subr.bf16.mxu0 %v9725_v49 }
 0xa83   : > { %8633 = vmatmul.mubr.f32.vlgmr.msra.gmra.mrb[36].mxu0 %v12521_v38 }
 0xa84   : > { %9542 = vmatpush3.bf16.msra.mxu0 %v9511_v6  ;;  %8643 = vmatprep.mubr.msk.f32.mxu0 %vm9726_vm3, %v13050_v0 }
 0xa85   : > { %9543 = vmatprep.subr.bf16.mxu0 %v9725_v49 }
 0xa88   : > { %9545 = vmatpush3.bf16.msra.mxu0 %v9514_v61 }
 0xa8b   : > { %8644 = vmatmul.mubr.f32.vlgmr.msra.gmra.mrb[36].mxu0 %v12521_v38 }
 0xb5e   : > { %v7520_v34 = vpop.f32.mrb[36].mxu0 }
 0xb5f   : > { %v9560_v59 = vadd.f32 %v7520_v34, %v7034_v16  ;;  %v8645_v5 = vpop.f32.mrb[37].mxu0 }
 0xb61   : > { %7525 = vst.msk [vmem:[%s455_s16] sm:$0x1] %vm7524_vm5, %v9560_v59 }
 0xb62 PF: > { %s25_s27 = sadd.s32 1, %s9695_s27  }
 0xb63   : > { %p22_p4 = scmp.ge.s32.totalorder %s25_s27, 4  }
 0xb65   :  { %24 = sbr.rel (!%p22_p4) target bundleno = 3 (0x3), region = 105 }

</bundles_post_ra>
